<compile_context>
chip_gen: v7x
topology: tpu7x:2x2x1
jax: 0.10.0
libtpu: 0.0.40
codegen_flags: <defaults>
</compile_context>

<pallas_src>
import functools
import math

import jax
import jax.numpy as jnp
from jax.experimental import pallas as pl
from jax.experimental.pallas import tpu as pltpu


# ----------------------------------------------------------------------------
# Pallas kernels: fused (im2col-rows @ packed-W) + bias (+ ReLU)
# ----------------------------------------------------------------------------
def _matmul_bias_kernel(a_ref, w_ref, b_ref, o_ref, *, relu):
    # a: (TM, K) bf16, w: (K, Cout) bf16, b: (1, Cout) f32 -> o: (TM, Cout)
    acc = jnp.dot(a_ref[...], w_ref[...], preferred_element_type=jnp.float32)
    acc = acc + b_ref[...]
    if relu:
        acc = jnp.maximum(acc, 0.0)
    o_ref[...] = acc.astype(o_ref.dtype)


def _rowdot_bias_kernel(a_ref, w_ref, b_ref, o_ref, *, relu):
    # Cout == 1 path: avoid wasting 127/128 MXU columns; VPU multiply + lane reduce.
    a = a_ref[...].astype(jnp.float32)            # (TM, K)
    w = w_ref[...].astype(jnp.float32)            # (1, K)
    acc = jnp.sum(a * w, axis=1, keepdims=True) + b_ref[...]
    if relu:
        acc = jnp.maximum(acc, 0.0)
    o_ref[...] = acc.astype(o_ref.dtype)


def _pick_tile_m(m, cap=512):
    """Largest row-tile <= cap that exactly divides M and is a multiple of 8."""
    if m <= cap or m % 8 != 0:
        return m
    for t in range(cap, 7, -8):
        if m % t == 0:
            return t
    return m


def _fused_matmul_bias_act(a, w, b, relu, cout, out_dtype):
    """a: (M, K) bf16, w packed at init, b: (1, Cout) f32 -> (M, Cout) out_dtype."""
    m, kdim = a.shape
    tm = _pick_tile_m(m)
    grid = (m // tm,)

    out_itemsize = jnp.dtype(out_dtype).itemsize
    cost = pl.CostEstimate(
        flops=2 * m * kdim * cout,
        transcendentals=0,
        bytes_accessed=(a.size * a.dtype.itemsize + w.size * w.dtype.itemsize
                        + b.size * 4 + m * cout * out_itemsize),
    )

    if cout == 1:
        kernel = functools.partial(_rowdot_bias_kernel, relu=relu)
        in_specs = [
            pl.BlockSpec((tm, kdim), lambda i: (i, 0)),
            pl.BlockSpec((1, kdim), lambda i: (0, 0)),
            pl.BlockSpec((1, 1), lambda i: (0, 0)),
        ]
        out_spec = pl.BlockSpec((tm, 1), lambda i: (i, 0))
        out_shape = jax.ShapeDtypeStruct((m, 1), out_dtype)
    else:
        kernel = functools.partial(_matmul_bias_kernel, relu=relu)
        in_specs = [
            pl.BlockSpec((tm, kdim), lambda i: (i, 0)),
            pl.BlockSpec((kdim, cout), lambda i: (0, 0)),
            pl.BlockSpec((1, cout), lambda i: (0, 0)),
        ]
        out_spec = pl.BlockSpec((tm, cout), lambda i: (i, 0))
        out_shape = jax.ShapeDtypeStruct((m, cout), out_dtype)

    return pl.pallas_call(
        kernel,
        out_shape=out_shape,
        grid=grid,
        in_specs=in_specs,
        out_specs=out_spec,
        compiler_params=pltpu.CompilerParams(dimension_semantics=("parallel",)),
        cost_estimate=cost,
    )(a, w, b)


# ----------------------------------------------------------------------------
# JAX glue: NHWC patch extraction (PyTorch conv / conv-transpose semantics)
# ----------------------------------------------------------------------------
def _patches_nhwc(xp, kh, kw, stride):
    """xp: (N, Hp, Wp, C) already padded -> (N*Ho*Wo, kh*kw*C) bf16, Ho, Wo."""
    n, h, w, c = xp.shape
    ho = (h - kh) // stride + 1
    wo = (w - kw) // stride + 1
    cols = []
    for i in range(kh):
        for j in range(kw):
            cols.append(xp[:, i:i + stride * (ho - 1) + 1:stride,
                              j:j + stride * (wo - 1) + 1:stride, :])
    a = jnp.concatenate(cols, axis=-1)            # (N, Ho, Wo, kh*kw*C); K order (i, j, ci)
    return a.reshape(n * ho * wo, kh * kw * c).astype(jnp.bfloat16), ho, wo


def conv2d_nhwc(x, layer):
    k, s, p = layer["k"], layer["stride"], layer["padding"]
    n = x.shape[0]
    xp = jnp.pad(x, ((0, 0), (p, p), (p, p), (0, 0)))
    a, ho, wo = _patches_nhwc(xp, k, k, s)
    out = _fused_matmul_bias_act(a, layer["w"], layer["b"], layer["relu"],
                                 layer["cout"], layer["out_dtype"])
    return out.reshape(n, ho, wo, layer["cout"])


def conv_transpose2d_nhwc(x, layer):
    k, s, p, op = layer["k"], layer["stride"], layer["padding"], layer["output_padding"]
    n, h, w, c = x.shape
    hd, wd = (h - 1) * s + 1, (w - 1) * s + 1
    lo, hi = k - 1 - p, k - 1 - p + op
    # Dilate (insert s-1 zeros between elements) and pad in one shot.
    xp = jnp.zeros((n, hd + lo + hi, wd + lo + hi, c), x.dtype)
    xp = xp.at[:, lo:lo + hd:s, lo:lo + wd:s, :].set(x)
    a, ho, wo = _patches_nhwc(xp, k, k, 1)
    out = _fused_matmul_bias_act(a, layer["w"], layer["b"], layer["relu"],
                                 layer["cout"], layer["out_dtype"])
    return out.reshape(n, ho, wo, layer["cout"])


# ----------------------------------------------------------------------------
# CNNAutoencoder: params (pre-packed weights) + forward
# ----------------------------------------------------------------------------
NUM_FILTERS = [16, 32, 64]
KERNEL_SIZES = [3, 3, 7]


def init_params(key):
    layers = []
    in_ch = 1
    # Encoder: Conv2d(in, nf[i], k[i], stride=2, padding=1) + ReLU
    for nf, k in zip(NUM_FILTERS, KERNEL_SIZES):
        key, kw_, kb_ = jax.random.split(key, 3)
        bound = 1.0 / math.sqrt(in_ch * k * k)
        w = jax.random.uniform(kw_, (nf, in_ch, k, k), jnp.float32, -bound, bound)
        b = jax.random.uniform(kb_, (nf,), jnp.float32, -bound, bound)
        # Pack once: (Cout, Cin, kh, kw) -> (kh*kw*Cin, Cout), bf16 for the MXU.
        w_packed = w.transpose(2, 3, 1, 0).reshape(k * k * in_ch, nf).astype(jnp.bfloat16)
        layers.append(dict(kind="conv", w=w_packed,
                           b=b.reshape(1, nf).astype(jnp.float32),
                           cout=nf, k=k, stride=2, padding=1, relu=True,
                           out_dtype=jnp.bfloat16))
        in_ch = nf
    # Decoder: ConvTranspose2d(nf[i], out, k[i], stride=2, padding=1,
    #                          output_padding = 1 if i < last else 0), ReLU except last.
    for i in reversed(range(len(NUM_FILTERS))):
        out_ch = NUM_FILTERS[i - 1] if i > 0 else 1
        cin = NUM_FILTERS[i]
        k = KERNEL_SIZES[i]
        key, kw_, kb_ = jax.random.split(key, 3)
        bound = 1.0 / math.sqrt(out_ch * k * k)
        w = jax.random.uniform(kw_, (cin, out_ch, k, k), jnp.float32, -bound, bound)
        b = jax.random.uniform(kb_, (out_ch,), jnp.float32, -bound, bound)
        # Equivalent direct-conv weight: flip spatial, swap channel axes; pack once.
        w_conv = jnp.flip(w, axis=(2, 3)).transpose(2, 3, 0, 1)      # (k, k, Cin, Cout)
        w_packed = w_conv.reshape(k * k * cin, out_ch)
        if out_ch == 1:
            w_store = w_packed.T.astype(jnp.bfloat16)                 # (1, K) row for VPU path
        else:
            w_store = w_packed.astype(jnp.bfloat16)
        is_last = (i == 0)
        layers.append(dict(kind="deconv", w=w_store,
                           b=b.reshape(1, out_ch).astype(jnp.float32),
                           cout=out_ch, k=k, stride=2, padding=1,
                           output_padding=(1 if i < len(NUM_FILTERS) - 1 else 0),
                           relu=(not is_last),
                           out_dtype=(jnp.float32 if is_last else jnp.bfloat16)))
    return layers


def cnn_autoencoder_forward(layers, x_nchw):
    x = jnp.transpose(x_nchw, (0, 2, 3, 1))          # NCHW -> NHWC, once
    for layer in layers:
        if layer["kind"] == "conv":
            x = conv2d_nhwc(x, layer)
        else:
            x = conv_transpose2d_nhwc(x, layer)
    return jnp.transpose(x, (0, 3, 1, 2))            # NHWC -> NCHW, once


if __name__ == "__main__":
    key = jax.random.PRNGKey(0)
    key, kx = jax.random.split(key)
    params = init_params(key)
    # NCHW single-channel input (PyTorch convention)
    x = jax.random.normal(kx, (2, 1, 32, 32), jnp.float32)

    fwd = jax.jit(lambda inp: cnn_autoencoder_forward(params, inp))
    y = fwd(x)
    jax.block_until_ready(y)

    # encoder: 32 -> 16 -> 8 -> 2 ; decoder: 2 -> 7 -> 14 -> 28 (matches PyTorch)
    assert y.shape == (2, 1, 28, 28), y.shape
    assert y.dtype == jnp.float32
    print("KERNEL_OK")
</pallas_src>

<mosaic_0001>
module attributes {stable_mosaic.version = 11 : i64} {
  func.func @_matmul_bias_kernel(%arg0: i32, %arg1: memref<512x9xbf16, #tpu.memory_space<vmem>>, %arg2: memref<9x16xbf16, #tpu.memory_space<vmem>>, %arg3: memref<1x16xf32, #tpu.memory_space<vmem>>, %arg4: memref<512x16xbf16, #tpu.memory_space<vmem>>) attributes {dimension_semantics = [#tpu.dimension_semantics<parallel>], iteration_bounds = array<i64: 1>, scalar_prefetch = 0 : i64, scratch_operands = 0 : i64, tpu.core_type = #tpu.core_type<tc>, window_params = [{transform_indices = @transform_0, window_bounds = array<i64: 512, 9>}, {pipeline_mode = #tpu.pipeline_mode<synchronous>, transform_indices = @transform_1, window_bounds = array<i64: 9, 16>}, {pipeline_mode = #tpu.pipeline_mode<synchronous>, transform_indices = @transform_2, window_bounds = array<i64: 1, 16>}, {transform_indices = @transform_3, window_bounds = array<i64: 512, 16>}]} {
    %c0 = arith.constant 0 : index
    %c0_0 = arith.constant 0 : index
    %0 = vector.load %arg1[%c0, %c0_0] : memref<512x9xbf16, #tpu.memory_space<vmem>>, vector<512x9xbf16>
    %c0_1 = arith.constant 0 : index
    %c0_2 = arith.constant 0 : index
    %1 = vector.load %arg2[%c0_1, %c0_2] : memref<9x16xbf16, #tpu.memory_space<vmem>>, vector<9x16xbf16>
    %cst = arith.constant dense<0.000000e+00> : vector<512x16xf32>
    %2 = tpu.matmul %0, %1, %cst {dimension_numbers = #tpu.dot_dimension_numbers<[1], [0], [0], [1], [0, 0, 1, 1], [], []>} : vector<512x9xbf16>, vector<9x16xbf16>, vector<512x16xf32> -> vector<512x16xf32>
    %c0_3 = arith.constant 0 : index
    %c0_4 = arith.constant 0 : index
    %3 = vector.load %arg3[%c0_3, %c0_4] : memref<1x16xf32, #tpu.memory_space<vmem>>, vector<1x16xf32>
    %4 = vector.broadcast %3 : vector<1x16xf32> to vector<512x16xf32>
    %5 = arith.addf %2, %4 : vector<512x16xf32>
    %cst_5 = arith.constant 0.000000e+00 : f32
    %6 = vector.broadcast %cst_5 : f32 to vector<512x16xf32>
    %7 = arith.maximumf %5, %6 : vector<512x16xf32>
    %8 = arith.truncf %7 : vector<512x16xf32> to vector<512x16xbf16>
    %c0_6 = arith.constant 0 : index
    %c0_7 = arith.constant 0 : index
    %9 = vector.load %arg4[%c0_6, %c0_7] : memref<512x16xbf16, #tpu.memory_space<vmem>>, vector<512x16xbf16>
    tpu.vector_store %arg4[%c0_6, %c0_7], %8 {strides = array<i32>} : memref<512x16xbf16, #tpu.memory_space<vmem>>, vector<512x16xbf16>,
    return
  }
  func.func @transform_0(%arg0: i32) -> (i32, i32) {
    %c0_i32 = arith.constant 0 : i32
    %c0_i32_0 = arith.constant 0 : i32
    return %arg0, %c0_i32 : i32, i32
  }
  func.func @transform_1(%arg0: i32) -> (i32, i32) {
    %c0_i32 = arith.constant 0 : i32
    %c0_i32_0 = arith.constant 0 : i32
    %c0_i32_1 = arith.constant 0 : i32
    return %c0_i32, %c0_i32_0 : i32, i32
  }
  func.func @transform_2(%arg0: i32) -> (i32, i32) {
    %c0_i32 = arith.constant 0 : i32
    %c0_i32_0 = arith.constant 0 : i32
    %c0_i32_1 = arith.constant 0 : i32
    return %c0_i32, %c0_i32_0 : i32, i32
  }
  func.func @transform_3(%arg0: i32) -> (i32, i32) {
    %c0_i32 = arith.constant 0 : i32
    %c0_i32_0 = arith.constant 0 : i32
    return %arg0, %c0_i32 : i32, i32
  }
}

module attributes {stable_mosaic.version = 11 : i64} {
  func.func @_matmul_bias_kernel(%arg0: i32, %arg1: memref<128x144xbf16, #tpu.memory_space<vmem>>, %arg2: memref<144x32xbf16, #tpu.memory_space<vmem>>, %arg3: memref<1x32xf32, #tpu.memory_space<vmem>>, %arg4: memref<128x32xbf16, #tpu.memory_space<vmem>>) attributes {dimension_semantics = [#tpu.dimension_semantics<parallel>], iteration_bounds = array<i64: 1>, scalar_prefetch = 0 : i64, scratch_operands = 0 : i64, tpu.core_type = #tpu.core_type<tc>, window_params = [{transform_indices = @transform_0, window_bounds = array<i64: 128, 144>}, {pipeline_mode = #tpu.pipeline_mode<synchronous>, transform_indices = @transform_1, window_bounds = array<i64: 144, 32>}, {pipeline_mode = #tpu.pipeline_mode<synchronous>, transform_indices = @transform_2, window_bounds = array<i64: 1, 32>}, {transform_indices = @transform_3, window_bounds = array<i64: 128, 32>}]} {
    %c0 = arith.constant 0 : index
    %c0_0 = arith.constant 0 : index
    %0 = vector.load %arg1[%c0, %c0_0] : memref<128x144xbf16, #tpu.memory_space<vmem>>, vector<128x144xbf16>
    %c0_1 = arith.constant 0 : index
    %c0_2 = arith.constant 0 : index
    %1 = vector.load %arg2[%c0_1, %c0_2] : memref<144x32xbf16, #tpu.memory_space<vmem>>, vector<144x32xbf16>
    %cst = arith.constant dense<0.000000e+00> : vector<128x32xf32>
    %2 = tpu.matmul %0, %1, %cst {dimension_numbers = #tpu.dot_dimension_numbers<[1], [0], [0], [1], [0, 0, 1, 1], [], []>} : vector<128x144xbf16>, vector<144x32xbf16>, vector<128x32xf32> -> vector<128x32xf32>
    %c0_3 = arith.constant 0 : index
    %c0_4 = arith.constant 0 : index
    %3 = vector.load %arg3[%c0_3, %c0_4] : memref<1x32xf32, #tpu.memory_space<vmem>>, vector<1x32xf32>
    %4 = vector.broadcast %3 : vector<1x32xf32> to vector<128x32xf32>
    %5 = arith.addf %2, %4 : vector<128x32xf32>
    %cst_5 = arith.constant 0.000000e+00 : f32
    %6 = vector.broadcast %cst_5 : f32 to vector<128x32xf32>
    %7 = arith.maximumf %5, %6 : vector<128x32xf32>
    %8 = arith.truncf %7 : vector<128x32xf32> to vector<128x32xbf16>
    %c0_6 = arith.constant 0 : index
    %c0_7 = arith.constant 0 : index
    %9 = vector.load %arg4[%c0_6, %c0_7] : memref<128x32xbf16, #tpu.memory_space<vmem>>, vector<128x32xbf16>
    tpu.vector_store %arg4[%c0_6, %c0_7], %8 {strides = array<i32>} : memref<128x32xbf16, #tpu.memory_space<vmem>>, vector<128x32xbf16>,
    return
  }
  func.func @transform_0(%arg0: i32) -> (i32, i32) {
    %c0_i32 = arith.constant 0 : i32
    %c0_i32_0 = arith.constant 0 : i32
    return %arg0, %c0_i32 : i32, i32
  }
  func.func @transform_1(%arg0: i32) -> (i32, i32) {
    %c0_i32 = arith.constant 0 : i32
    %c0_i32_0 = arith.constant 0 : i32
    %c0_i32_1 = arith.constant 0 : i32
    return %c0_i32, %c0_i32_0 : i32, i32
  }
  func.func @transform_2(%arg0: i32) -> (i32, i32) {
    %c0_i32 = arith.constant 0 : i32
    %c0_i32_0 = arith.constant 0 : i32
    %c0_i32_1 = arith.constant 0 : i32
    return %c0_i32, %c0_i32_0 : i32, i32
  }
  func.func @transform_3(%arg0: i32) -> (i32, i32) {
    %c0_i32 = arith.constant 0 : i32
    %c0_i32_0 = arith.constant 0 : i32
    return %arg0, %c0_i32 : i32, i32
  }
}

module attributes {stable_mosaic.version = 11 : i64} {
  func.func @_matmul_bias_kernel(%arg0: i32, %arg1: memref<8x1568xbf16, #tpu.memory_space<vmem>>, %arg2: memref<1568x64xbf16, #tpu.memory_space<vmem>>, %arg3: memref<1x64xf32, #tpu.memory_space<vmem>>, %arg4: memref<8x64xbf16, #tpu.memory_space<vmem>>) attributes {dimension_semantics = [#tpu.dimension_semantics<parallel>], iteration_bounds = array<i64: 1>, scalar_prefetch = 0 : i64, scratch_operands = 0 : i64, tpu.core_type = #tpu.core_type<tc>, window_params = [{transform_indices = @transform_0, window_bounds = array<i64: 8, 1568>}, {pipeline_mode = #tpu.pipeline_mode<synchronous>, transform_indices = @transform_1, window_bounds = array<i64: 1568, 64>}, {pipeline_mode = #tpu.pipeline_mode<synchronous>, transform_indices = @transform_2, window_bounds = array<i64: 1, 64>}, {transform_indices = @transform_3, window_bounds = array<i64: 8, 64>}]} {
    %c0 = arith.constant 0 : index
    %c0_0 = arith.constant 0 : index
    %0 = vector.load %arg1[%c0, %c0_0] : memref<8x1568xbf16, #tpu.memory_space<vmem>>, vector<8x1568xbf16>
    %c0_1 = arith.constant 0 : index
    %c0_2 = arith.constant 0 : index
    %1 = vector.load %arg2[%c0_1, %c0_2] : memref<1568x64xbf16, #tpu.memory_space<vmem>>, vector<1568x64xbf16>
    %cst = arith.constant dense<0.000000e+00> : vector<8x64xf32>
    %2 = tpu.matmul %0, %1, %cst {dimension_numbers = #tpu.dot_dimension_numbers<[1], [0], [0], [1], [0, 0, 1, 1], [], []>} : vector<8x1568xbf16>, vector<1568x64xbf16>, vector<8x64xf32> -> vector<8x64xf32>
    %c0_3 = arith.constant 0 : index
    %c0_4 = arith.constant 0 : index
    %3 = vector.load %arg3[%c0_3, %c0_4] : memref<1x64xf32, #tpu.memory_space<vmem>>, vector<1x64xf32>
    %4 = vector.broadcast %3 : vector<1x64xf32> to vector<8x64xf32>
    %5 = arith.addf %2, %4 : vector<8x64xf32>
    %cst_5 = arith.constant 0.000000e+00 : f32
    %6 = vector.broadcast %cst_5 : f32 to vector<8x64xf32>
    %7 = arith.maximumf %5, %6 : vector<8x64xf32>
    %8 = arith.truncf %7 : vector<8x64xf32> to vector<8x64xbf16>
    %c0_6 = arith.constant 0 : index
    %c0_7 = arith.constant 0 : index
    %9 = vector.load %arg4[%c0_6, %c0_7] : memref<8x64xbf16, #tpu.memory_space<vmem>>, vector<8x64xbf16>
    tpu.vector_store %arg4[%c0_6, %c0_7], %8 {strides = array<i32>} : memref<8x64xbf16, #tpu.memory_space<vmem>>, vector<8x64xbf16>,
    return
  }
  func.func @transform_0(%arg0: i32) -> (i32, i32) {
    %c0_i32 = arith.constant 0 : i32
    %c0_i32_0 = arith.constant 0 : i32
    return %arg0, %c0_i32 : i32, i32
  }
  func.func @transform_1(%arg0: i32) -> (i32, i32) {
    %c0_i32 = arith.constant 0 : i32
    %c0_i32_0 = arith.constant 0 : i32
    %c0_i32_1 = arith.constant 0 : i32
    return %c0_i32, %c0_i32_0 : i32, i32
  }
  func.func @transform_2(%arg0: i32) -> (i32, i32) {
    %c0_i32 = arith.constant 0 : i32
    %c0_i32_0 = arith.constant 0 : i32
    %c0_i32_1 = arith.constant 0 : i32
    return %c0_i32, %c0_i32_0 : i32, i32
  }
  func.func @transform_3(%arg0: i32) -> (i32, i32) {
    %c0_i32 = arith.constant 0 : i32
    %c0_i32_0 = arith.constant 0 : i32
    return %arg0, %c0_i32 : i32, i32
  }
}

module attributes {stable_mosaic.version = 11 : i64} {
  func.func @_matmul_bias_kernel(%arg0: i32, %arg1: memref<98x3136xbf16, #tpu.memory_space<vmem>>, %arg2: memref<3136x32xbf16, #tpu.memory_space<vmem>>, %arg3: memref<1x32xf32, #tpu.memory_space<vmem>>, %arg4: memref<98x32xbf16, #tpu.memory_space<vmem>>) attributes {dimension_semantics = [#tpu.dimension_semantics<parallel>], iteration_bounds = array<i64: 1>, scalar_prefetch = 0 : i64, scratch_operands = 0 : i64, tpu.core_type = #tpu.core_type<tc>, window_params = [{transform_indices = @transform_0, window_bounds = array<i64: 98, 3136>}, {pipeline_mode = #tpu.pipeline_mode<synchronous>, transform_indices = @transform_1, window_bounds = array<i64: 3136, 32>}, {pipeline_mode = #tpu.pipeline_mode<synchronous>, transform_indices = @transform_2, window_bounds = array<i64: 1, 32>}, {transform_indices = @transform_3, window_bounds = array<i64: 98, 32>}]} {
    %c0 = arith.constant 0 : index
    %c0_0 = arith.constant 0 : index
    %0 = vector.load %arg1[%c0, %c0_0] : memref<98x3136xbf16, #tpu.memory_space<vmem>>, vector<98x3136xbf16>
    %c0_1 = arith.constant 0 : index
    %c0_2 = arith.constant 0 : index
    %1 = vector.load %arg2[%c0_1, %c0_2] : memref<3136x32xbf16, #tpu.memory_space<vmem>>, vector<3136x32xbf16>
    %cst = arith.constant dense<0.000000e+00> : vector<98x32xf32>
    %2 = tpu.matmul %0, %1, %cst {dimension_numbers = #tpu.dot_dimension_numbers<[1], [0], [0], [1], [0, 0, 1, 1], [], []>} : vector<98x3136xbf16>, vector<3136x32xbf16>, vector<98x32xf32> -> vector<98x32xf32>
    %c0_3 = arith.constant 0 : index
    %c0_4 = arith.constant 0 : index
    %3 = vector.load %arg3[%c0_3, %c0_4] : memref<1x32xf32, #tpu.memory_space<vmem>>, vector<1x32xf32>
    %4 = vector.broadcast %3 : vector<1x32xf32> to vector<98x32xf32>
    %5 = arith.addf %2, %4 : vector<98x32xf32>
    %cst_5 = arith.constant 0.000000e+00 : f32
    %6 = vector.broadcast %cst_5 : f32 to vector<98x32xf32>
    %7 = arith.maximumf %5, %6 : vector<98x32xf32>
    %8 = arith.truncf %7 : vector<98x32xf32> to vector<98x32xbf16>
    %c0_6 = arith.constant 0 : index
    %c0_7 = arith.constant 0 : index
    %9 = vector.load %arg4[%c0_6, %c0_7] : memref<98x32xbf16, #tpu.memory_space<vmem>>, vector<98x32xbf16>
    tpu.vector_store %arg4[%c0_6, %c0_7], %8 {strides = array<i32>} : memref<98x32xbf16, #tpu.memory_space<vmem>>, vector<98x32xbf16>,
    return
  }
  func.func @transform_0(%arg0: i32) -> (i32, i32) {
    %c0_i32 = arith.constant 0 : i32
    %c0_i32_0 = arith.constant 0 : i32
    return %arg0, %c0_i32 : i32, i32
  }
  func.func @transform_1(%arg0: i32) -> (i32, i32) {
    %c0_i32 = arith.constant 0 : i32
    %c0_i32_0 = arith.constant 0 : i32
    %c0_i32_1 = arith.constant 0 : i32
    return %c0_i32, %c0_i32_0 : i32, i32
  }
  func.func @transform_2(%arg0: i32) -> (i32, i32) {
    %c0_i32 = arith.constant 0 : i32
    %c0_i32_0 = arith.constant 0 : i32
    %c0_i32_1 = arith.constant 0 : i32
    return %c0_i32, %c0_i32_0 : i32, i32
  }
  func.func @transform_3(%arg0: i32) -> (i32, i32) {
    %c0_i32 = arith.constant 0 : i32
    %c0_i32_0 = arith.constant 0 : i32
    return %arg0, %c0_i32 : i32, i32
  }
}

module attributes {stable_mosaic.version = 11 : i64} {
  func.func @_matmul_bias_kernel(%arg0: i32, %arg1: memref<392x288xbf16, #tpu.memory_space<vmem>>, %arg2: memref<288x16xbf16, #tpu.memory_space<vmem>>, %arg3: memref<1x16xf32, #tpu.memory_space<vmem>>, %arg4: memref<392x16xbf16, #tpu.memory_space<vmem>>) attributes {dimension_semantics = [#tpu.dimension_semantics<parallel>], iteration_bounds = array<i64: 1>, scalar_prefetch = 0 : i64, scratch_operands = 0 : i64, tpu.core_type = #tpu.core_type<tc>, window_params = [{transform_indices = @transform_0, window_bounds = array<i64: 392, 288>}, {pipeline_mode = #tpu.pipeline_mode<synchronous>, transform_indices = @transform_1, window_bounds = array<i64: 288, 16>}, {pipeline_mode = #tpu.pipeline_mode<synchronous>, transform_indices = @transform_2, window_bounds = array<i64: 1, 16>}, {transform_indices = @transform_3, window_bounds = array<i64: 392, 16>}]} {
    %c0 = arith.constant 0 : index
    %c0_0 = arith.constant 0 : index
    %0 = vector.load %arg1[%c0, %c0_0] : memref<392x288xbf16, #tpu.memory_space<vmem>>, vector<392x288xbf16>
    %c0_1 = arith.constant 0 : index
    %c0_2 = arith.constant 0 : index
    %1 = vector.load %arg2[%c0_1, %c0_2] : memref<288x16xbf16, #tpu.memory_space<vmem>>, vector<288x16xbf16>
    %cst = arith.constant dense<0.000000e+00> : vector<392x16xf32>
    %2 = tpu.matmul %0, %1, %cst {dimension_numbers = #tpu.dot_dimension_numbers<[1], [0], [0], [1], [0, 0, 1, 1], [], []>} : vector<392x288xbf16>, vector<288x16xbf16>, vector<392x16xf32> -> vector<392x16xf32>
    %c0_3 = arith.constant 0 : index
    %c0_4 = arith.constant 0 : index
    %3 = vector.load %arg3[%c0_3, %c0_4] : memref<1x16xf32, #tpu.memory_space<vmem>>, vector<1x16xf32>
    %4 = vector.broadcast %3 : vector<1x16xf32> to vector<392x16xf32>
    %5 = arith.addf %2, %4 : vector<392x16xf32>
    %cst_5 = arith.constant 0.000000e+00 : f32
    %6 = vector.broadcast %cst_5 : f32 to vector<392x16xf32>
    %7 = arith.maximumf %5, %6 : vector<392x16xf32>
    %8 = arith.truncf %7 : vector<392x16xf32> to vector<392x16xbf16>
    %c0_6 = arith.constant 0 : index
    %c0_7 = arith.constant 0 : index
    %9 = vector.load %arg4[%c0_6, %c0_7] : memref<392x16xbf16, #tpu.memory_space<vmem>>, vector<392x16xbf16>
    tpu.vector_store %arg4[%c0_6, %c0_7], %8 {strides = array<i32>} : memref<392x16xbf16, #tpu.memory_space<vmem>>, vector<392x16xbf16>,
    return
  }
  func.func @transform_0(%arg0: i32) -> (i32, i32) {
    %c0_i32 = arith.constant 0 : i32
    %c0_i32_0 = arith.constant 0 : i32
    return %arg0, %c0_i32 : i32, i32
  }
  func.func @transform_1(%arg0: i32) -> (i32, i32) {
    %c0_i32 = arith.constant 0 : i32
    %c0_i32_0 = arith.constant 0 : i32
    %c0_i32_1 = arith.constant 0 : i32
    return %c0_i32, %c0_i32_0 : i32, i32
  }
  func.func @transform_2(%arg0: i32) -> (i32, i32) {
    %c0_i32 = arith.constant 0 : i32
    %c0_i32_0 = arith.constant 0 : i32
    %c0_i32_1 = arith.constant 0 : i32
    return %c0_i32, %c0_i32_0 : i32, i32
  }
  func.func @transform_3(%arg0: i32) -> (i32, i32) {
    %c0_i32 = arith.constant 0 : i32
    %c0_i32_0 = arith.constant 0 : i32
    return %arg0, %c0_i32 : i32, i32
  }
}

module attributes {stable_mosaic.version = 11 : i64} {
  func.func @_rowdot_bias_kernel(%arg0: i32, %arg1: memref<392x144xbf16, #tpu.memory_space<vmem>>, %arg2: memref<1x144xbf16, #tpu.memory_space<vmem>>, %arg3: memref<1x1xf32, #tpu.memory_space<vmem>>, %arg4: memref<392x1xf32, #tpu.memory_space<vmem>>) attributes {dimension_semantics = [#tpu.dimension_semantics<parallel>], iteration_bounds = array<i64: 4>, scalar_prefetch = 0 : i64, scratch_operands = 0 : i64, tpu.core_type = #tpu.core_type<tc>, window_params = [{transform_indices = @transform_0, window_bounds = array<i64: 392, 144>}, {pipeline_mode = #tpu.pipeline_mode<synchronous>, transform_indices = @transform_1, window_bounds = array<i64: 1, 144>}, {pipeline_mode = #tpu.pipeline_mode<synchronous>, transform_indices = @transform_2, window_bounds = array<i64: 1, 1>}, {transform_indices = @transform_3, window_bounds = array<i64: 392, 1>}]} {
    %c0 = arith.constant 0 : index
    %c0_0 = arith.constant 0 : index
    %0 = vector.load %arg1[%c0, %c0_0] : memref<392x144xbf16, #tpu.memory_space<vmem>>, vector<392x144xbf16>
    %1 = arith.extf %0 : vector<392x144xbf16> to vector<392x144xf32>
    %c0_1 = arith.constant 0 : index
    %c0_2 = arith.constant 0 : index
    %2 = vector.load %arg2[%c0_1, %c0_2] : memref<1x144xbf16, #tpu.memory_space<vmem>>, vector<1x144xbf16>
    %3 = arith.extf %2 : vector<1x144xbf16> to vector<1x144xf32>
    %4 = vector.broadcast %3 : vector<1x144xf32> to vector<392x144xf32>
    %5 = arith.mulf %1, %4 : vector<392x144xf32>
    %cst = arith.constant dense<0.000000e+00> : vector<392xf32>
    %6 = vector.multi_reduction <add>, %5, %cst [1] : vector<392x144xf32> to vector<392xf32>
    %7 = vector.shape_cast %6 : vector<392xf32> to vector<392x1xf32>
    %c0_3 = arith.constant 0 : index
    %c0_4 = arith.constant 0 : index
    %8 = vector.load %arg3[%c0_3, %c0_4] : memref<1x1xf32, #tpu.memory_space<vmem>>, vector<1x1xf32>
    %9 = vector.broadcast %8 : vector<1x1xf32> to vector<392x1xf32>
    %10 = arith.addf %7, %9 : vector<392x1xf32>
    %c0_5 = arith.constant 0 : index
    %c0_6 = arith.constant 0 : index
    %11 = vector.load %arg4[%c0_5, %c0_6] : memref<392x1xf32, #tpu.memory_space<vmem>>, vector<392x1xf32>
    tpu.vector_store %arg4[%c0_5, %c0_6], %10 {strides = array<i32>} : memref<392x1xf32, #tpu.memory_space<vmem>>, vector<392x1xf32>,
    return
  }
  func.func @transform_0(%arg0: i32) -> (i32, i32) {
    %c0_i32 = arith.constant 0 : i32
    %c0_i32_0 = arith.constant 0 : i32
    return %arg0, %c0_i32 : i32, i32
  }
  func.func @transform_1(%arg0: i32) -> (i32, i32) {
    %c0_i32 = arith.constant 0 : i32
    %c0_i32_0 = arith.constant 0 : i32
    %c0_i32_1 = arith.constant 0 : i32
    return %c0_i32, %c0_i32_0 : i32, i32
  }
  func.func @transform_2(%arg0: i32) -> (i32, i32) {
    %c0_i32 = arith.constant 0 : i32
    %c0_i32_0 = arith.constant 0 : i32
    %c0_i32_1 = arith.constant 0 : i32
    return %c0_i32, %c0_i32_0 : i32, i32
  }
  func.func @transform_3(%arg0: i32) -> (i32, i32) {
    %c0_i32 = arith.constant 0 : i32
    %c0_i32_0 = arith.constant 0 : i32
    return %arg0, %c0_i32 : i32, i32
  }
}

</mosaic_0001>

<bundles_post_ra>
// kernel: _lambda_.7
= control target key start
LH: loop header
LB: loop body
LE: loop exit
PB: predicated region body
PF: predicated region fallthrough
CT: control target
= control target key end

     0   :  { %v523_v0 = vmov 0   ;;  %vm182_vm0 = vcmask 130048   ;;  %vm384_vm1 = vcmask 257024   ;;  %s712_s1 = inlined_call_operand.vmem [shape: bf16[144,32], index: 1, kind: input, shape index: {}]   ;;  %s713_s0 = inlined_call_operand.vmem [shape: bf16[128,144], index: 0, kind: input, shape index: {}]   ;;  %s714_s2 = inlined_call_operand.vmem [shape: f32[1,32], index: 2, kind: input, shape index: {}]   ;;  %s715_s3 = inlined_call_operand.vmem [shape: bf16[128,32], index: 3, kind: output, shape index: {}]  }
   0x1   :  { %207 = vmatprep.subr.bf16.mxu0 %v523_v0  ;;  %471 = vmatprep.subr.bf16.mxu1 %v523_v0  ;;  %v490_v1 = vld [vmem:[%s712_s1] sm:$0xff]   ;;  %v491_v2 = vld [vmem:[%s712_s1 + $0x8] sm:$0xff]   ;;  %v492_v3 = vld [vmem:[%s712_s1 + $0x10] sm:$0xff]  }
   0x2   :  { %208 = vmatpush1.bf16.msra.mxu0 %v490_v1  ;;  %480 = vmatpush1.bf16.msra.mxu1 %v490_v1  ;;  %v493_v4 = vld [vmem:[%s712_s1 + $0x18] sm:$0xff]   ;;  %v501_v5 = vld [vmem:[%s713_s0 + $0x4] ss:$8 sps:$4 sm:$0xff]   ;;  %v496_v9 = vld [vmem:[%s712_s1 + $0x30] sm:$0xff]  }
   0x3   :  { %209 = vmatprep.subr.bf16.mxu0 %v523_v0  ;;  %472 = vmatprep.subr.bf16.mxu1 %v523_v0  ;;  %v504_v6 = vld [vmem:[%s713_s0 + $0x44] ss:$8 sps:$4 sm:$0xff]   ;;  %v497_v10 = vld [vmem:[%s712_s1 + $0x38] sm:$0xff]   ;;  %v499_v12 = vld [vmem:[%s713_s0] ss:$8 sps:$4 sm:$0xff]  }
   0x4   :  { %431 = vmatprep.mubr.msk.bf16.mxu0 %vm182_vm0, %v501_v5  ;;  %435 = vmatprep.mubr.msk.bf16.mxu1 %vm182_vm0, %v504_v6  ;;  %v494_v7 = vld [vmem:[%s712_s1 + $0x20] sm:$0xff]   ;;  %v495_v8 = vld [vmem:[%s712_s1 + $0x28] sm:$0xff]   ;;  %v505_v14 = vld [vmem:[%s713_s0 + $0x14] ss:$8 sps:$4 sm:$0xff]  }
   0x5   :  { %v498_v11 = vld [vmem:[%s712_s1 + $0x40] sm:$0xff]   ;;  %v507_v15 = vld [vmem:[%s713_s0 + $0x54] ss:$8 sps:$4 sm:$0xff]   ;;  %v509_v16 = vld [vmem:[%s713_s0 + $0x10] ss:$8 sps:$4 sm:$0xff]  }
   0x6   :  { %210 = vmatpush1.bf16.msra.mxu0 %v491_v2  ;;  %481 = vmatpush1.bf16.msra.mxu1 %v491_v2  ;;  %v502_v13 = vld [vmem:[%s713_s0 + $0x40] ss:$8 sps:$4 sm:$0xff]   ;;  %v510_v17 = vld [vmem:[%s713_s0 + $0x50] ss:$8 sps:$4 sm:$0xff]   ;;  %v511_v18 = vld [vmem:[%s713_s0 + $0x24] ss:$8 sps:$4 sm:$0xff]  }
   0x7   :  { %211 = vmatprep.subr.bf16.mxu0 %v523_v0  ;;  %473 = vmatprep.subr.bf16.mxu1 %v523_v0  ;;  %v513_v19 = vld [vmem:[%s713_s0 + $0x64] ss:$8 sps:$4 sm:$0xff]   ;;  %v515_v20 = vld [vmem:[%s713_s0 + $0x20] ss:$8 sps:$4 sm:$0xff]   ;;  %v517_v22 = vld [vmem:[%s713_s0 + $0x34] ss:$8 sps:$4 sm:$0xff]  }
   0x8   :  { %v516_v21 = vld [vmem:[%s713_s0 + $0x60] ss:$8 sps:$4 sm:$0xff]   ;;  %v519_v23 = vld [vmem:[%s713_s0 + $0x74] ss:$8 sps:$4 sm:$0xff]   ;;  %v521_v24 = vld [vmem:[%s713_s0 + $0x30] ss:$8 sps:$4 sm:$0xff]  }
   0x9   :  { %v522_v25 = vld [vmem:[%s713_s0 + $0x70] ss:$8 sps:$4 sm:$0xff]   ;;  %v630_v26 = vld [vmem:[%s714_s2] ss:$0 sm:$0xff] }
   0xa   :  { %212 = vmatpush1.bf16.msra.mxu0 %v492_v3  ;;  %482 = vmatpush1.bf16.msra.mxu1 %v492_v3 }
   0xb   :  { %213 = vmatprep.subr.bf16.mxu0 %v523_v0  ;;  %474 = vmatprep.subr.bf16.mxu1 %v523_v0 }
   0xe   :  { %214 = vmatpush1.bf16.msra.mxu0 %v493_v4  ;;  %483 = vmatpush1.bf16.msra.mxu1 %v493_v4 }
   0xf   :  { %215 = vmatprep.subr.bf16.mxu0 %v523_v0  ;;  %475 = vmatprep.subr.bf16.mxu1 %v523_v0 }
  0x12   :  { %216 = vmatpush1.bf16.msra.mxu0 %v494_v7  ;;  %484 = vmatpush1.bf16.msra.mxu1 %v494_v7 }
  0x13   :  { %217 = vmatprep.subr.bf16.mxu0 %v523_v0  ;;  %476 = vmatprep.subr.bf16.mxu1 %v523_v0 }
  0x16   :  { %218 = vmatpush1.bf16.msra.mxu0 %v495_v8  ;;  %485 = vmatpush1.bf16.msra.mxu1 %v495_v8 }
  0x17   :  { %219 = vmatprep.subr.bf16.mxu0 %v523_v0  ;;  %477 = vmatprep.subr.bf16.mxu1 %v523_v0 }
  0x1a   :  { %220 = vmatpush1.bf16.msra.mxu0 %v496_v9  ;;  %486 = vmatpush1.bf16.msra.mxu1 %v496_v9 }
  0x1b   :  { %221 = vmatprep.subr.bf16.mxu0 %v523_v0  ;;  %478 = vmatprep.subr.bf16.mxu1 %v523_v0 }
  0x1e   :  { %222 = vmatpush1.bf16.msra.mxu0 %v497_v10  ;;  %487 = vmatpush1.bf16.msra.mxu1 %v497_v10 }
  0x1f   :  { %223 = vmatprep.subr.bf16.mxu0 %v523_v0  ;;  %479 = vmatprep.subr.bf16.mxu1 %v523_v0 }
  0x22   :  { %224 = vmatpush1.bf16.msra.mxu0 %v498_v11  ;;  %488 = vmatpush1.bf16.msra.mxu1 %v498_v11 }
  0x25   :  { %240 = vmatmul.mubr.bf16.vlgmr.msra.gmra.mrb[0].mxu0 %v499_v12  ;;  %272 = vmatmul.mubr.bf16.vlgmr.msra.gmra.mrb[0].mxu1 %v502_v13 }
  0x26   :  { %432 = vmatprep.mubr.msk.bf16.mxu0 %vm182_vm0, %v505_v14  ;;  %436 = vmatprep.mubr.msk.bf16.mxu1 %vm182_vm0, %v507_v15 }
  0x2d   :  { %248 = vmatmul.mubr.bf16.gmra.mrb[4].mxu0 %v509_v16  ;;  %280 = vmatmul.mubr.bf16.gmra.mrb[4].mxu1 %v510_v17 }
  0x2e   :  { %433 = vmatprep.mubr.msk.bf16.mxu0 %vm182_vm0, %v511_v18  ;;  %437 = vmatprep.mubr.msk.bf16.mxu1 %vm182_vm0, %v513_v19 }
  0x35   :  { %256 = vmatmul.mubr.bf16.gmra.mrb[8].mxu0 %v515_v20  ;;  %288 = vmatmul.mubr.bf16.gmra.mrb[8].mxu1 %v516_v21 }
  0x36   :  { %434 = vmatprep.mubr.msk.bf16.mxu0 %vm182_vm0, %v517_v22  ;;  %438 = vmatprep.mubr.msk.bf16.mxu1 %vm182_vm0, %v519_v23 }
  0x3d   :  { %264 = vmatmul.mubr.bf16.gmra.mrb[12].mxu0 %v521_v24  ;;  %296 = vmatmul.mubr.bf16.gmra.mrb[12].mxu1 %v522_v25 }
  0xf8   :  { %v241_v27 = vpop.f32.mrb[0].mxu0  ;;  %v273_v28 = vpop.f32.mrb[0].mxu1 }
  0xf9   :  { %v242_v29 = vadd.f32 %v630_v26, %v241_v27  ;;  %v274_v30 = vadd.f32 %v630_v26, %v273_v28  ;;  %v243_v31 = vpop.f32.mrb[1].mxu0  ;;  %v275_v32 = vpop.f32.mrb[1].mxu1 }
  0xfa   :  { %v244_v33 = vpop.f32.mrb[2].mxu0  ;;  %v276_v34 = vpop.f32.mrb[2].mxu1 }
  0xfb   :  { %v304_v35 = vmax.f32 %v242_v29, 0.0  ;;  %v312_v36 = vmax.f32 %v274_v30, 0.0  ;;  %v245_v37 = vadd.f32 %v630_v26, %v244_v33  ;;  %v277_v38 = vadd.f32 %v630_v26, %v276_v34  ;;  %v246_v39 = vpop.f32.mrb[3].mxu0  ;;  %v278_v40 = vpop.f32.mrb[3].mxu1 }
  0xfd   :  { %v455_v41 = vpack.c.bf16 %v304_v35, %v304_v35  ;;  %v463_v42 = vpack.c.bf16 %v312_v36, %v312_v36  ;;  %v305_v43 = vmax.f32 %v245_v37, 0.0  ;;  %v313_v44 = vmax.f32 %v277_v38, 0.0 }
  0xff   :  { %385 = vst.msk [vmem:[%s715_s3] sm:$0xf] %vm384_vm1, %v455_v41  ;;  %393 = vst.msk [vmem:[%s715_s3 + $0x20] sm:$0xf] %vm384_vm1, %v463_v42  ;;  %v456_v45 = vpack.c.bf16 %v305_v43, %v305_v43  ;;  %v464_v46 = vpack.c.bf16 %v313_v44, %v313_v44 }
 0x100   :  { %v249_v47 = vpop.f32.mrb[4].mxu0  ;;  %v281_v48 = vpop.f32.mrb[4].mxu1 }
 0x101   :  { %386 = vst.msk [vmem:[%s715_s3 + $0x4] sm:$0xf] %vm384_vm1, %v456_v45  ;;  %394 = vst.msk [vmem:[%s715_s3 + $0x24] sm:$0xf] %vm384_vm1, %v464_v46  ;;  %v250_v49 = vadd.f32 %v630_v26, %v249_v47  ;;  %v282_v50 = vadd.f32 %v630_v26, %v281_v48  ;;  %v251_v51 = vpop.f32.mrb[5].mxu0  ;;  %v283_v52 = vpop.f32.mrb[5].mxu1 }
 0x102   :  { %v252_v53 = vpop.f32.mrb[6].mxu0  ;;  %v284_v54 = vpop.f32.mrb[6].mxu1 }
 0x103   :  { %v306_v55 = vmax.f32 %v250_v49, 0.0  ;;  %v314_v56 = vmax.f32 %v282_v50, 0.0  ;;  %v253_v57 = vadd.f32 %v630_v26, %v252_v53  ;;  %v285_v58 = vadd.f32 %v630_v26, %v284_v54  ;;  %v254_v59 = vpop.f32.mrb[7].mxu0  ;;  %v286_v60 = vpop.f32.mrb[7].mxu1 }
 0x105   :  { %v457_v61 = vpack.c.bf16 %v306_v55, %v306_v55  ;;  %v465_v62 = vpack.c.bf16 %v314_v56, %v314_v56  ;;  %v307_v63 = vmax.f32 %v253_v57, 0.0  ;;  %v315_v0 = vmax.f32 %v285_v58, 0.0 }
 0x107   :  { %387 = vst.msk [vmem:[%s715_s3 + $0x8] sm:$0xf] %vm384_vm1, %v457_v61  ;;  %395 = vst.msk [vmem:[%s715_s3 + $0x28] sm:$0xf] %vm384_vm1, %v465_v62  ;;  %v458_v1 = vpack.c.bf16 %v307_v63, %v307_v63  ;;  %v466_v2 = vpack.c.bf16 %v315_v0, %v315_v0 }
 0x108   :  { %v257_v3 = vpop.f32.mrb[8].mxu0  ;;  %v289_v4 = vpop.f32.mrb[8].mxu1 }
 0x109   :  { %388 = vst.msk [vmem:[%s715_s3 + $0xc] sm:$0xf] %vm384_vm1, %v458_v1  ;;  %396 = vst.msk [vmem:[%s715_s3 + $0x2c] sm:$0xf] %vm384_vm1, %v466_v2  ;;  %v258_v5 = vadd.f32 %v630_v26, %v257_v3  ;;  %v290_v6 = vadd.f32 %v630_v26, %v289_v4  ;;  %v259_v7 = vpop.f32.mrb[9].mxu0  ;;  %v291_v8 = vpop.f32.mrb[9].mxu1 }
 0x10a   :  { %v260_v9 = vpop.f32.mrb[10].mxu0  ;;  %v292_v10 = vpop.f32.mrb[10].mxu1 }
 0x10b   :  { %v308_v11 = vmax.f32 %v258_v5, 0.0  ;;  %v316_v12 = vmax.f32 %v290_v6, 0.0  ;;  %v261_v13 = vadd.f32 %v630_v26, %v260_v9  ;;  %v293_v14 = vadd.f32 %v630_v26, %v292_v10  ;;  %v262_v15 = vpop.f32.mrb[11].mxu0  ;;  %v294_v16 = vpop.f32.mrb[11].mxu1 }
 0x10d   :  { %v459_v17 = vpack.c.bf16 %v308_v11, %v308_v11  ;;  %v467_v18 = vpack.c.bf16 %v316_v12, %v316_v12  ;;  %v309_v19 = vmax.f32 %v261_v13, 0.0  ;;  %v317_v20 = vmax.f32 %v293_v14, 0.0 }
 0x10f   :  { %389 = vst.msk [vmem:[%s715_s3 + $0x10] sm:$0xf] %vm384_vm1, %v459_v17  ;;  %397 = vst.msk [vmem:[%s715_s3 + $0x30] sm:$0xf] %vm384_vm1, %v467_v18  ;;  %v460_v21 = vpack.c.bf16 %v309_v19, %v309_v19  ;;  %v468_v22 = vpack.c.bf16 %v317_v20, %v317_v20 }
 0x110   :  { %v265_v23 = vpop.f32.mrb[12].mxu0  ;;  %v297_v24 = vpop.f32.mrb[12].mxu1 }
 0x111   :  { %390 = vst.msk [vmem:[%s715_s3 + $0x14] sm:$0xf] %vm384_vm1, %v460_v21  ;;  %398 = vst.msk [vmem:[%s715_s3 + $0x34] sm:$0xf] %vm384_vm1, %v468_v22  ;;  %v266_v25 = vadd.f32 %v630_v26, %v265_v23  ;;  %v298_v27 = vadd.f32 %v630_v26, %v297_v24  ;;  %v267_v28 = vpop.f32.mrb[13].mxu0  ;;  %v299_v29 = vpop.f32.mrb[13].mxu1 }
 0x112   :  { %v268_v30 = vpop.f32.mrb[14].mxu0  ;;  %v300_v31 = vpop.f32.mrb[14].mxu1 }
 0x113   :  { %v310_v32 = vmax.f32 %v266_v25, 0.0  ;;  %v318_v33 = vmax.f32 %v298_v27, 0.0  ;;  %v269_v34 = vadd.f32 %v630_v26, %v268_v30  ;;  %v301_v35 = vadd.f32 %v630_v26, %v300_v31  ;;  %v270_v36 = vpop.f32.mrb[15].mxu0  ;;  %v302_v37 = vpop.f32.mrb[15].mxu1 }
 0x115   :  { %v461_v38 = vpack.c.bf16 %v310_v32, %v310_v32  ;;  %v469_v39 = vpack.c.bf16 %v318_v33, %v318_v33  ;;  %v311_v40 = vmax.f32 %v269_v34, 0.0  ;;  %v319_v41 = vmax.f32 %v301_v35, 0.0 }
 0x117   :  { %391 = vst.msk [vmem:[%s715_s3 + $0x18] sm:$0xf] %vm384_vm1, %v461_v38  ;;  %399 = vst.msk [vmem:[%s715_s3 + $0x38] sm:$0xf] %vm384_vm1, %v469_v39  ;;  %v462_v42 = vpack.c.bf16 %v311_v40, %v311_v40  ;;  %v470_v43 = vpack.c.bf16 %v319_v41, %v319_v41 }
 0x119   :  { %392 = vst.msk [vmem:[%s715_s3 + $0x1c] sm:$0xf] %vm384_vm1, %v462_v42  ;;  %400 = vst.msk [vmem:[%s715_s3 + $0x3c] sm:$0xf] %vm384_vm1, %v470_v43 }

// kernel: _lambda_.6
= control target key start
LH: loop header
LB: loop body
LE: loop exit
PB: predicated region body
PF: predicated region fallthrough
CT: control target
= control target key end

     0   :  { %vm350_vm0 = vcmask 1043456   ;;  %vm351_vm1 = vcmask 1044480   ;;  %vm253_vm2 = vcmask 72704   ;;  %v1364_v1 = vmov 65535   ;;  %s1841_s1 = inlined_call_operand.vmem [shape: bf16[9,16], index: 1, kind: input, shape index: {}]   ;;  %s1842_s0 = inlined_call_operand.vmem [shape: bf16[512,9], index: 0, kind: input, shape index: {}]   ;;  %s1843_s2 = inlined_call_operand.vmem [shape: f32[1,16], index: 2, kind: input, shape index: {}]   ;;  %s1844_s3 = inlined_call_operand.vmem [shape: bf16[512,16], index: 3, kind: output, shape index: {}]  }
   0x1   :  { %v1331_v0 = vld [vmem:[%s1841_s1] sm:$0x1f]   ;;  %v352_v2 = vsel %vm350_vm0, 4294967295, %v1364_v1  ;;  %v1334_v7 = vld [vmem:[%s1842_s0 + $0x8] sm:$0xff]   ;;  %v1336_v9 = vld [vmem:[%s1842_s0 + $0x10] sm:$0xff]   ;;  %vm966_vm3 = vcmask 125952  }
   0x2   :  { %v1332_v3 = vld [vmem:[%s1842_s0] sm:$0xff]   ;;  %v353_v4 = vsel %vm351_vm1, %v352_v2, 0  ;;  %v1335_v8 = vld [vmem:[%s1842_s0 + $0x88] sm:$0xff]   ;;  %v1337_v10 = vld [vmem:[%s1842_s0 + $0x90] sm:$0xff]  }
   0x3   :  { %v1333_v5 = vld [vmem:[%s1842_s0 + $0x80] sm:$0xff]   ;;  %v355_v6 = vand.u32 %v1331_v0, %v353_v4  ;;  %1264 = vmatprep.mubr.msk.bf16.mxu0 %vm253_vm2, %v1332_v3  ;;  %v1338_v11 = vld [vmem:[%s1842_s0 + $0x18] sm:$0xff]   ;;  %v1342_v15 = vld [vmem:[%s1842_s0 + $0x28] sm:$0xff]  }
   0x4   :  { %1296 = vmatprep.mubr.msk.bf16.mxu1 %vm253_vm2, %v1333_v5  ;;  %v1339_v12 = vld [vmem:[%s1842_s0 + $0x98] sm:$0xff]   ;;  %v1340_v13 = vld [vmem:[%s1842_s0 + $0x20] sm:$0xff]   ;;  %v1343_v16 = vld [vmem:[%s1842_s0 + $0xa8] sm:$0xff]  }
   0x5   :  { %1262 = vmatprep.subr.bf16.mxu0 %v355_v6  ;;  %1328 = vmatprep.subr.bf16.mxu1 %v355_v6  ;;  %v1341_v14 = vld [vmem:[%s1842_s0 + $0xa0] sm:$0xff]   ;;  %v1344_v17 = vld [vmem:[%s1842_s0 + $0x30] sm:$0xff]   ;;  %v1346_v19 = vld [vmem:[%s1842_s0 + $0x38] sm:$0xff]  }
   0x6   :  { %1263 = vmatpush3.bf16.msra.mxu0 %v355_v6  ;;  %1329 = vmatpush3.bf16.msra.mxu1 %v355_v6  ;;  %v1345_v18 = vld [vmem:[%s1842_s0 + $0xb0] sm:$0xff]   ;;  %v1347_v20 = vld [vmem:[%s1842_s0 + $0xb8] sm:$0xff]   ;;  %v1348_v21 = vld [vmem:[%s1842_s0 + $0x40] sm:$0xff]  }
   0x7   :  { %v1349_v22 = vld [vmem:[%s1842_s0 + $0xc0] sm:$0xff]   ;;  %v1350_v23 = vld [vmem:[%s1842_s0 + $0x48] sm:$0xff]   ;;  %v1352_v25 = vld [vmem:[%s1842_s0 + $0x50] sm:$0xff]  }
   0x8   :  { %v1351_v24 = vld [vmem:[%s1842_s0 + $0xc8] sm:$0xff]   ;;  %v1353_v26 = vld [vmem:[%s1842_s0 + $0xd0] sm:$0xff]   ;;  %v1354_v27 = vld [vmem:[%s1842_s0 + $0x58] sm:$0xff]  }
   0x9   :  { %1265 = vmatmul.mubr.msk.bf16.vlgmr.msra.gmra.mrb[0].mxu0 %vm253_vm2, %v1334_v7  ;;  %1297 = vmatmul.mubr.msk.bf16.vlgmr.msra.gmra.mrb[0].mxu1 %vm253_vm2, %v1335_v8  ;;  %v1355_v28 = vld [vmem:[%s1842_s0 + $0xd8] sm:$0xff]   ;;  %v1356_v29 = vld [vmem:[%s1842_s0 + $0x60] sm:$0xff]   ;;  %v1358_v31 = vld [vmem:[%s1842_s0 + $0x68] sm:$0xff]  }
   0xa   :  { %1268 = vmatprep.mubr.msk.bf16.mxu0 %vm253_vm2, %v1336_v9  ;;  %1300 = vmatprep.mubr.msk.bf16.mxu1 %vm253_vm2, %v1337_v10  ;;  %v1357_v30 = vld [vmem:[%s1842_s0 + $0xe0] sm:$0xff]   ;;  %v1359_v32 = vld [vmem:[%s1842_s0 + $0xe8] sm:$0xff]   ;;  %v1360_v33 = vld [vmem:[%s1842_s0 + $0x70] sm:$0xff]  }
   0xb   :  { %v1361_v34 = vld [vmem:[%s1842_s0 + $0xf0] sm:$0xff]   ;;  %v1362_v35 = vld [vmem:[%s1842_s0 + $0x78] sm:$0xff]   ;;  %v1519_v37 = vld [vmem:[%s1843_s2] ss:$0 sm:$0xff] }
   0xc   :  { %v1363_v36 = vld [vmem:[%s1842_s0 + $0xf8] sm:$0xff]  }
  0x11   :  { %1269 = vmatmul.mubr.msk.bf16.gmra.mrb[4].mxu0 %vm253_vm2, %v1338_v11  ;;  %1301 = vmatmul.mubr.msk.bf16.gmra.mrb[4].mxu1 %vm253_vm2, %v1339_v12 }
  0x12   :  { %1272 = vmatprep.mubr.msk.bf16.mxu0 %vm253_vm2, %v1340_v13  ;;  %1304 = vmatprep.mubr.msk.bf16.mxu1 %vm253_vm2, %v1341_v14 }
  0x19   :  { %1273 = vmatmul.mubr.msk.bf16.gmra.mrb[8].mxu0 %vm253_vm2, %v1342_v15  ;;  %1305 = vmatmul.mubr.msk.bf16.gmra.mrb[8].mxu1 %vm253_vm2, %v1343_v16 }
  0x1a   :  { %1276 = vmatprep.mubr.msk.bf16.mxu0 %vm253_vm2, %v1344_v17  ;;  %1308 = vmatprep.mubr.msk.bf16.mxu1 %vm253_vm2, %v1345_v18 }
  0x21   :  { %1277 = vmatmul.mubr.msk.bf16.gmra.mrb[12].mxu0 %vm253_vm2, %v1346_v19  ;;  %1309 = vmatmul.mubr.msk.bf16.gmra.mrb[12].mxu1 %vm253_vm2, %v1347_v20 }
  0x22   :  { %1280 = vmatprep.mubr.msk.bf16.mxu0 %vm253_vm2, %v1348_v21  ;;  %1312 = vmatprep.mubr.msk.bf16.mxu1 %vm253_vm2, %v1349_v22 }
  0x29   :  { %1281 = vmatmul.mubr.msk.bf16.gmra.mrb[16].mxu0 %vm253_vm2, %v1350_v23  ;;  %1313 = vmatmul.mubr.msk.bf16.gmra.mrb[16].mxu1 %vm253_vm2, %v1351_v24 }
  0x2a   :  { %1284 = vmatprep.mubr.msk.bf16.mxu0 %vm253_vm2, %v1352_v25  ;;  %1316 = vmatprep.mubr.msk.bf16.mxu1 %vm253_vm2, %v1353_v26 }
  0x31   :  { %1285 = vmatmul.mubr.msk.bf16.gmra.mrb[20].mxu0 %vm253_vm2, %v1354_v27  ;;  %1317 = vmatmul.mubr.msk.bf16.gmra.mrb[20].mxu1 %vm253_vm2, %v1355_v28 }
  0x32   :  { %1288 = vmatprep.mubr.msk.bf16.mxu0 %vm253_vm2, %v1356_v29  ;;  %1320 = vmatprep.mubr.msk.bf16.mxu1 %vm253_vm2, %v1357_v30 }
  0x39   :  { %1289 = vmatmul.mubr.msk.bf16.gmra.mrb[24].mxu0 %vm253_vm2, %v1358_v31  ;;  %1321 = vmatmul.mubr.msk.bf16.gmra.mrb[24].mxu1 %vm253_vm2, %v1359_v32 }
  0x3a   :  { %1292 = vmatprep.mubr.msk.bf16.mxu0 %vm253_vm2, %v1360_v33  ;;  %1324 = vmatprep.mubr.msk.bf16.mxu1 %vm253_vm2, %v1361_v34 }
  0x41   :  { %1293 = vmatmul.mubr.msk.bf16.gmra.mrb[28].mxu0 %vm253_vm2, %v1362_v35  ;;  %1325 = vmatmul.mubr.msk.bf16.gmra.mrb[28].mxu1 %vm253_vm2, %v1363_v36 }
  0xdc   :  { %v1266_v38 = vpop.f32.mrb[0].mxu0  ;;  %v1298_v39 = vpop.f32.mrb[0].mxu1 }
  0xdd   :  { %v400_v40 = vadd.f32 %v1266_v38, %v1519_v37  ;;  %v528_v41 = vadd.f32 %v1298_v39, %v1519_v37  ;;  %v391_v42 = vpop.f32.mrb[1].mxu0  ;;  %v519_v43 = vpop.f32.mrb[1].mxu1 }
  0xde   :  { %v392_v44 = vadd.f32 %v1519_v37, %v391_v42  ;;  %v520_v45 = vadd.f32 %v1519_v37, %v519_v43  ;;  %v1267_v46 = vpop.f32.mrb[2].mxu0  ;;  %v1299_v47 = vpop.f32.mrb[2].mxu1 }
  0xdf   :  { %v648_v48 = vmax.f32 %v400_v40, 0.0  ;;  %v680_v49 = vmax.f32 %v528_v41, 0.0  ;;  %v403_v50 = vadd.f32 %v1267_v46, %v1519_v37  ;;  %v531_v51 = vadd.f32 %v1299_v47, %v1519_v37  ;;  %v394_v52 = vpop.f32.mrb[3].mxu0  ;;  %v522_v53 = vpop.f32.mrb[3].mxu1 }
  0xe0   :  { %v646_v54 = vmax.f32 %v392_v44, 0.0  ;;  %v678_v55 = vmax.f32 %v520_v45, 0.0  ;;  %v395_v56 = vadd.f32 %v1519_v37, %v394_v52  ;;  %v523_v57 = vadd.f32 %v1519_v37, %v522_v53 }
  0xe1   :  { %v1167_v58 = vpack.c.bf16 %v648_v48, %v648_v48  ;;  %v1199_v59 = vpack.c.bf16 %v680_v49, %v680_v49  ;;  %v649_v60 = vmax.f32 %v403_v50, 0.0  ;;  %v681_v61 = vmax.f32 %v531_v51, 0.0 }
  0xe2   :  { %v1165_v62 = vpack.c.bf16 %v646_v54, %v646_v54  ;;  %v1197_v63 = vpack.c.bf16 %v678_v55, %v678_v55  ;;  %v647_v0 = vmax.f32 %v395_v56, 0.0  ;;  %v679_v1 = vmax.f32 %v523_v57, 0.0 }
  0xe3   :  { %969 = vst.msk [vmem:[%s1844_s3 + $0x8] sm:$0xf] %vm966_vm3, %v1167_v58  ;;  %1001 = vst.msk [vmem:[%s1844_s3 + $0x88] sm:$0xf] %vm966_vm3, %v1199_v59  ;;  %v1168_v2 = vpack.c.bf16 %v649_v60, %v649_v60  ;;  %v1200_v3 = vpack.c.bf16 %v681_v61, %v681_v61 }
  0xe4   :  { %967 = vst.msk [vmem:[%s1844_s3] sm:$0xf] %vm966_vm3, %v1165_v62  ;;  %999 = vst.msk [vmem:[%s1844_s3 + $0x80] sm:$0xf] %vm966_vm3, %v1197_v63  ;;  %v1166_v4 = vpack.c.bf16 %v647_v0, %v647_v0  ;;  %v1198_v5 = vpack.c.bf16 %v679_v1, %v679_v1  ;;  %v1270_v6 = vpop.f32.mrb[4].mxu0  ;;  %v1302_v7 = vpop.f32.mrb[4].mxu1 }
  0xe5   :  { %970 = vst.msk [vmem:[%s1844_s3 + $0xc] sm:$0xf] %vm966_vm3, %v1168_v2  ;;  %1002 = vst.msk [vmem:[%s1844_s3 + $0x8c] sm:$0xf] %vm966_vm3, %v1200_v3  ;;  %v416_v8 = vadd.f32 %v1270_v6, %v1519_v37  ;;  %v544_v9 = vadd.f32 %v1302_v7, %v1519_v37  ;;  %v407_v10 = vpop.f32.mrb[5].mxu0  ;;  %v535_v11 = vpop.f32.mrb[5].mxu1 }
  0xe6   :  { %968 = vst.msk [vmem:[%s1844_s3 + $0x4] sm:$0xf] %vm966_vm3, %v1166_v4  ;;  %1000 = vst.msk [vmem:[%s1844_s3 + $0x84] sm:$0xf] %vm966_vm3, %v1198_v5  ;;  %v408_v12 = vadd.f32 %v1519_v37, %v407_v10  ;;  %v536_v13 = vadd.f32 %v1519_v37, %v535_v11  ;;  %v1271_v14 = vpop.f32.mrb[6].mxu0  ;;  %v1303_v15 = vpop.f32.mrb[6].mxu1 }
  0xe7   :  { %v652_v16 = vmax.f32 %v416_v8, 0.0  ;;  %v684_v17 = vmax.f32 %v544_v9, 0.0  ;;  %v419_v18 = vadd.f32 %v1271_v14, %v1519_v37  ;;  %v547_v19 = vadd.f32 %v1303_v15, %v1519_v37  ;;  %v410_v20 = vpop.f32.mrb[7].mxu0  ;;  %v538_v21 = vpop.f32.mrb[7].mxu1 }
  0xe8   :  { %v650_v22 = vmax.f32 %v408_v12, 0.0  ;;  %v682_v23 = vmax.f32 %v536_v13, 0.0  ;;  %v411_v24 = vadd.f32 %v1519_v37, %v410_v20  ;;  %v539_v25 = vadd.f32 %v1519_v37, %v538_v21 }
  0xe9   :  { %v1171_v26 = vpack.c.bf16 %v652_v16, %v652_v16  ;;  %v1203_v27 = vpack.c.bf16 %v684_v17, %v684_v17  ;;  %v653_v28 = vmax.f32 %v419_v18, 0.0  ;;  %v685_v29 = vmax.f32 %v547_v19, 0.0 }
  0xea   :  { %v1169_v30 = vpack.c.bf16 %v650_v22, %v650_v22  ;;  %v1201_v31 = vpack.c.bf16 %v682_v23, %v682_v23  ;;  %v651_v32 = vmax.f32 %v411_v24, 0.0  ;;  %v683_v33 = vmax.f32 %v539_v25, 0.0 }
  0xeb   :  { %973 = vst.msk [vmem:[%s1844_s3 + $0x18] sm:$0xf] %vm966_vm3, %v1171_v26  ;;  %1005 = vst.msk [vmem:[%s1844_s3 + $0x98] sm:$0xf] %vm966_vm3, %v1203_v27  ;;  %v1172_v34 = vpack.c.bf16 %v653_v28, %v653_v28  ;;  %v1204_v35 = vpack.c.bf16 %v685_v29, %v685_v29 }
  0xec   :  { %971 = vst.msk [vmem:[%s1844_s3 + $0x10] sm:$0xf] %vm966_vm3, %v1169_v30  ;;  %1003 = vst.msk [vmem:[%s1844_s3 + $0x90] sm:$0xf] %vm966_vm3, %v1201_v31  ;;  %v1170_v36 = vpack.c.bf16 %v651_v32, %v651_v32  ;;  %v1202_v38 = vpack.c.bf16 %v683_v33, %v683_v33  ;;  %v1274_v39 = vpop.f32.mrb[8].mxu0  ;;  %v1306_v40 = vpop.f32.mrb[8].mxu1 }
  0xed   :  { %974 = vst.msk [vmem:[%s1844_s3 + $0x1c] sm:$0xf] %vm966_vm3, %v1172_v34  ;;  %1006 = vst.msk [vmem:[%s1844_s3 + $0x9c] sm:$0xf] %vm966_vm3, %v1204_v35  ;;  %v432_v41 = vadd.f32 %v1274_v39, %v1519_v37  ;;  %v560_v42 = vadd.f32 %v1306_v40, %v1519_v37  ;;  %v423_v43 = vpop.f32.mrb[9].mxu0  ;;  %v551_v44 = vpop.f32.mrb[9].mxu1 }
  0xee   :  { %972 = vst.msk [vmem:[%s1844_s3 + $0x14] sm:$0xf] %vm966_vm3, %v1170_v36  ;;  %1004 = vst.msk [vmem:[%s1844_s3 + $0x94] sm:$0xf] %vm966_vm3, %v1202_v38  ;;  %v424_v45 = vadd.f32 %v1519_v37, %v423_v43  ;;  %v552_v46 = vadd.f32 %v1519_v37, %v551_v44  ;;  %v1275_v47 = vpop.f32.mrb[10].mxu0  ;;  %v1307_v48 = vpop.f32.mrb[10].mxu1 }
  0xef   :  { %v656_v49 = vmax.f32 %v432_v41, 0.0  ;;  %v688_v50 = vmax.f32 %v560_v42, 0.0  ;;  %v435_v51 = vadd.f32 %v1275_v47, %v1519_v37  ;;  %v563_v52 = vadd.f32 %v1307_v48, %v1519_v37  ;;  %v426_v53 = vpop.f32.mrb[11].mxu0  ;;  %v554_v54 = vpop.f32.mrb[11].mxu1 }
  0xf0   :  { %v654_v55 = vmax.f32 %v424_v45, 0.0  ;;  %v686_v56 = vmax.f32 %v552_v46, 0.0  ;;  %v427_v57 = vadd.f32 %v1519_v37, %v426_v53  ;;  %v555_v58 = vadd.f32 %v1519_v37, %v554_v54 }
  0xf1   :  { %v1175_v59 = vpack.c.bf16 %v656_v49, %v656_v49  ;;  %v1207_v60 = vpack.c.bf16 %v688_v50, %v688_v50  ;;  %v657_v61 = vmax.f32 %v435_v51, 0.0  ;;  %v689_v62 = vmax.f32 %v563_v52, 0.0 }
  0xf2   :  { %v1173_v63 = vpack.c.bf16 %v654_v55, %v654_v55  ;;  %v1205_v0 = vpack.c.bf16 %v686_v56, %v686_v56  ;;  %v655_v1 = vmax.f32 %v427_v57, 0.0  ;;  %v687_v2 = vmax.f32 %v555_v58, 0.0 }
  0xf3   :  { %977 = vst.msk [vmem:[%s1844_s3 + $0x28] sm:$0xf] %vm966_vm3, %v1175_v59  ;;  %1009 = vst.msk [vmem:[%s1844_s3 + $0xa8] sm:$0xf] %vm966_vm3, %v1207_v60  ;;  %v1176_v3 = vpack.c.bf16 %v657_v61, %v657_v61  ;;  %v1208_v4 = vpack.c.bf16 %v689_v62, %v689_v62 }
  0xf4   :  { %975 = vst.msk [vmem:[%s1844_s3 + $0x20] sm:$0xf] %vm966_vm3, %v1173_v63  ;;  %1007 = vst.msk [vmem:[%s1844_s3 + $0xa0] sm:$0xf] %vm966_vm3, %v1205_v0  ;;  %v1174_v5 = vpack.c.bf16 %v655_v1, %v655_v1  ;;  %v1206_v6 = vpack.c.bf16 %v687_v2, %v687_v2  ;;  %v1278_v7 = vpop.f32.mrb[12].mxu0  ;;  %v1310_v8 = vpop.f32.mrb[12].mxu1 }
  0xf5   :  { %978 = vst.msk [vmem:[%s1844_s3 + $0x2c] sm:$0xf] %vm966_vm3, %v1176_v3  ;;  %1010 = vst.msk [vmem:[%s1844_s3 + $0xac] sm:$0xf] %vm966_vm3, %v1208_v4  ;;  %v448_v9 = vadd.f32 %v1278_v7, %v1519_v37  ;;  %v576_v10 = vadd.f32 %v1310_v8, %v1519_v37  ;;  %v439_v11 = vpop.f32.mrb[13].mxu0  ;;  %v567_v12 = vpop.f32.mrb[13].mxu1 }
  0xf6   :  { %976 = vst.msk [vmem:[%s1844_s3 + $0x24] sm:$0xf] %vm966_vm3, %v1174_v5  ;;  %1008 = vst.msk [vmem:[%s1844_s3 + $0xa4] sm:$0xf] %vm966_vm3, %v1206_v6  ;;  %v440_v13 = vadd.f32 %v1519_v37, %v439_v11  ;;  %v568_v14 = vadd.f32 %v1519_v37, %v567_v12  ;;  %v1279_v15 = vpop.f32.mrb[14].mxu0  ;;  %v1311_v16 = vpop.f32.mrb[14].mxu1 }
  0xf7   :  { %v660_v17 = vmax.f32 %v448_v9, 0.0  ;;  %v692_v18 = vmax.f32 %v576_v10, 0.0  ;;  %v451_v19 = vadd.f32 %v1279_v15, %v1519_v37  ;;  %v579_v20 = vadd.f32 %v1311_v16, %v1519_v37  ;;  %v442_v21 = vpop.f32.mrb[15].mxu0  ;;  %v570_v22 = vpop.f32.mrb[15].mxu1 }
  0xf8   :  { %v658_v23 = vmax.f32 %v440_v13, 0.0  ;;  %v690_v24 = vmax.f32 %v568_v14, 0.0  ;;  %v443_v25 = vadd.f32 %v1519_v37, %v442_v21  ;;  %v571_v26 = vadd.f32 %v1519_v37, %v570_v22 }
  0xf9   :  { %v1179_v27 = vpack.c.bf16 %v660_v17, %v660_v17  ;;  %v1211_v28 = vpack.c.bf16 %v692_v18, %v692_v18  ;;  %v661_v29 = vmax.f32 %v451_v19, 0.0  ;;  %v693_v30 = vmax.f32 %v579_v20, 0.0 }
  0xfa   :  { %v1177_v31 = vpack.c.bf16 %v658_v23, %v658_v23  ;;  %v1209_v32 = vpack.c.bf16 %v690_v24, %v690_v24  ;;  %v659_v33 = vmax.f32 %v443_v25, 0.0  ;;  %v691_v34 = vmax.f32 %v571_v26, 0.0 }
  0xfb   :  { %981 = vst.msk [vmem:[%s1844_s3 + $0x38] sm:$0xf] %vm966_vm3, %v1179_v27  ;;  %1013 = vst.msk [vmem:[%s1844_s3 + $0xb8] sm:$0xf] %vm966_vm3, %v1211_v28  ;;  %v1180_v35 = vpack.c.bf16 %v661_v29, %v661_v29  ;;  %v1212_v36 = vpack.c.bf16 %v693_v30, %v693_v30 }
  0xfc   :  { %979 = vst.msk [vmem:[%s1844_s3 + $0x30] sm:$0xf] %vm966_vm3, %v1177_v31  ;;  %1011 = vst.msk [vmem:[%s1844_s3 + $0xb0] sm:$0xf] %vm966_vm3, %v1209_v32  ;;  %v1178_v38 = vpack.c.bf16 %v659_v33, %v659_v33  ;;  %v1210_v39 = vpack.c.bf16 %v691_v34, %v691_v34  ;;  %v1282_v40 = vpop.f32.mrb[16].mxu0  ;;  %v1314_v41 = vpop.f32.mrb[16].mxu1 }
  0xfd   :  { %982 = vst.msk [vmem:[%s1844_s3 + $0x3c] sm:$0xf] %vm966_vm3, %v1180_v35  ;;  %1014 = vst.msk [vmem:[%s1844_s3 + $0xbc] sm:$0xf] %vm966_vm3, %v1212_v36  ;;  %v464_v42 = vadd.f32 %v1282_v40, %v1519_v37  ;;  %v592_v43 = vadd.f32 %v1314_v41, %v1519_v37  ;;  %v455_v44 = vpop.f32.mrb[17].mxu0  ;;  %v583_v45 = vpop.f32.mrb[17].mxu1 }
  0xfe   :  { %980 = vst.msk [vmem:[%s1844_s3 + $0x34] sm:$0xf] %vm966_vm3, %v1178_v38  ;;  %1012 = vst.msk [vmem:[%s1844_s3 + $0xb4] sm:$0xf] %vm966_vm3, %v1210_v39  ;;  %v456_v46 = vadd.f32 %v1519_v37, %v455_v44  ;;  %v584_v47 = vadd.f32 %v1519_v37, %v583_v45  ;;  %v1283_v48 = vpop.f32.mrb[18].mxu0  ;;  %v1315_v49 = vpop.f32.mrb[18].mxu1 }
  0xff   :  { %v664_v50 = vmax.f32 %v464_v42, 0.0  ;;  %v696_v51 = vmax.f32 %v592_v43, 0.0  ;;  %v467_v52 = vadd.f32 %v1283_v48, %v1519_v37  ;;  %v595_v53 = vadd.f32 %v1315_v49, %v1519_v37  ;;  %v458_v54 = vpop.f32.mrb[19].mxu0  ;;  %v586_v55 = vpop.f32.mrb[19].mxu1 }
 0x100   :  { %v662_v56 = vmax.f32 %v456_v46, 0.0  ;;  %v694_v57 = vmax.f32 %v584_v47, 0.0  ;;  %v459_v58 = vadd.f32 %v1519_v37, %v458_v54  ;;  %v587_v59 = vadd.f32 %v1519_v37, %v586_v55 }
 0x101   :  { %v1183_v60 = vpack.c.bf16 %v664_v50, %v664_v50  ;;  %v1215_v61 = vpack.c.bf16 %v696_v51, %v696_v51  ;;  %v665_v62 = vmax.f32 %v467_v52, 0.0  ;;  %v697_v63 = vmax.f32 %v595_v53, 0.0 }
 0x102   :  { %v1181_v0 = vpack.c.bf16 %v662_v56, %v662_v56  ;;  %v1213_v1 = vpack.c.bf16 %v694_v57, %v694_v57  ;;  %v663_v2 = vmax.f32 %v459_v58, 0.0  ;;  %v695_v3 = vmax.f32 %v587_v59, 0.0 }
 0x103   :  { %985 = vst.msk [vmem:[%s1844_s3 + $0x48] sm:$0xf] %vm966_vm3, %v1183_v60  ;;  %1017 = vst.msk [vmem:[%s1844_s3 + $0xc8] sm:$0xf] %vm966_vm3, %v1215_v61  ;;  %v1184_v4 = vpack.c.bf16 %v665_v62, %v665_v62  ;;  %v1216_v5 = vpack.c.bf16 %v697_v63, %v697_v63 }
 0x104   :  { %983 = vst.msk [vmem:[%s1844_s3 + $0x40] sm:$0xf] %vm966_vm3, %v1181_v0  ;;  %1015 = vst.msk [vmem:[%s1844_s3 + $0xc0] sm:$0xf] %vm966_vm3, %v1213_v1  ;;  %v1182_v6 = vpack.c.bf16 %v663_v2, %v663_v2  ;;  %v1214_v7 = vpack.c.bf16 %v695_v3, %v695_v3  ;;  %v1286_v8 = vpop.f32.mrb[20].mxu0  ;;  %v1318_v9 = vpop.f32.mrb[20].mxu1 }
 0x105   :  { %986 = vst.msk [vmem:[%s1844_s3 + $0x4c] sm:$0xf] %vm966_vm3, %v1184_v4  ;;  %1018 = vst.msk [vmem:[%s1844_s3 + $0xcc] sm:$0xf] %vm966_vm3, %v1216_v5  ;;  %v480_v10 = vadd.f32 %v1286_v8, %v1519_v37  ;;  %v608_v11 = vadd.f32 %v1318_v9, %v1519_v37  ;;  %v471_v12 = vpop.f32.mrb[21].mxu0  ;;  %v599_v13 = vpop.f32.mrb[21].mxu1 }
 0x106   :  { %984 = vst.msk [vmem:[%s1844_s3 + $0x44] sm:$0xf] %vm966_vm3, %v1182_v6  ;;  %1016 = vst.msk [vmem:[%s1844_s3 + $0xc4] sm:$0xf] %vm966_vm3, %v1214_v7  ;;  %v472_v14 = vadd.f32 %v1519_v37, %v471_v12  ;;  %v600_v15 = vadd.f32 %v1519_v37, %v599_v13  ;;  %v1287_v16 = vpop.f32.mrb[22].mxu0  ;;  %v1319_v17 = vpop.f32.mrb[22].mxu1 }
 0x107   :  { %v668_v18 = vmax.f32 %v480_v10, 0.0  ;;  %v700_v19 = vmax.f32 %v608_v11, 0.0  ;;  %v483_v20 = vadd.f32 %v1287_v16, %v1519_v37  ;;  %v611_v21 = vadd.f32 %v1319_v17, %v1519_v37  ;;  %v474_v22 = vpop.f32.mrb[23].mxu0  ;;  %v602_v23 = vpop.f32.mrb[23].mxu1 }
 0x108   :  { %v666_v24 = vmax.f32 %v472_v14, 0.0  ;;  %v698_v25 = vmax.f32 %v600_v15, 0.0  ;;  %v475_v26 = vadd.f32 %v1519_v37, %v474_v22  ;;  %v603_v27 = vadd.f32 %v1519_v37, %v602_v23 }
 0x109   :  { %v1187_v28 = vpack.c.bf16 %v668_v18, %v668_v18  ;;  %v1219_v29 = vpack.c.bf16 %v700_v19, %v700_v19  ;;  %v669_v30 = vmax.f32 %v483_v20, 0.0  ;;  %v701_v31 = vmax.f32 %v611_v21, 0.0 }
 0x10a   :  { %v1185_v32 = vpack.c.bf16 %v666_v24, %v666_v24  ;;  %v1217_v33 = vpack.c.bf16 %v698_v25, %v698_v25  ;;  %v667_v34 = vmax.f32 %v475_v26, 0.0  ;;  %v699_v35 = vmax.f32 %v603_v27, 0.0 }
 0x10b   :  { %989 = vst.msk [vmem:[%s1844_s3 + $0x58] sm:$0xf] %vm966_vm3, %v1187_v28  ;;  %1021 = vst.msk [vmem:[%s1844_s3 + $0xd8] sm:$0xf] %vm966_vm3, %v1219_v29  ;;  %v1188_v36 = vpack.c.bf16 %v669_v30, %v669_v30  ;;  %v1220_v38 = vpack.c.bf16 %v701_v31, %v701_v31 }
 0x10c   :  { %987 = vst.msk [vmem:[%s1844_s3 + $0x50] sm:$0xf] %vm966_vm3, %v1185_v32  ;;  %1019 = vst.msk [vmem:[%s1844_s3 + $0xd0] sm:$0xf] %vm966_vm3, %v1217_v33  ;;  %v1186_v39 = vpack.c.bf16 %v667_v34, %v667_v34  ;;  %v1218_v40 = vpack.c.bf16 %v699_v35, %v699_v35  ;;  %v1290_v41 = vpop.f32.mrb[24].mxu0  ;;  %v1322_v42 = vpop.f32.mrb[24].mxu1 }
 0x10d   :  { %990 = vst.msk [vmem:[%s1844_s3 + $0x5c] sm:$0xf] %vm966_vm3, %v1188_v36  ;;  %1022 = vst.msk [vmem:[%s1844_s3 + $0xdc] sm:$0xf] %vm966_vm3, %v1220_v38  ;;  %v496_v43 = vadd.f32 %v1290_v41, %v1519_v37  ;;  %v624_v44 = vadd.f32 %v1322_v42, %v1519_v37  ;;  %v487_v45 = vpop.f32.mrb[25].mxu0  ;;  %v615_v46 = vpop.f32.mrb[25].mxu1 }
 0x10e   :  { %988 = vst.msk [vmem:[%s1844_s3 + $0x54] sm:$0xf] %vm966_vm3, %v1186_v39  ;;  %1020 = vst.msk [vmem:[%s1844_s3 + $0xd4] sm:$0xf] %vm966_vm3, %v1218_v40  ;;  %v488_v47 = vadd.f32 %v1519_v37, %v487_v45  ;;  %v616_v48 = vadd.f32 %v1519_v37, %v615_v46  ;;  %v1291_v49 = vpop.f32.mrb[26].mxu0  ;;  %v1323_v50 = vpop.f32.mrb[26].mxu1 }
 0x10f   :  { %v672_v51 = vmax.f32 %v496_v43, 0.0  ;;  %v704_v52 = vmax.f32 %v624_v44, 0.0  ;;  %v499_v53 = vadd.f32 %v1291_v49, %v1519_v37  ;;  %v627_v54 = vadd.f32 %v1323_v50, %v1519_v37  ;;  %v490_v55 = vpop.f32.mrb[27].mxu0  ;;  %v618_v56 = vpop.f32.mrb[27].mxu1 }
 0x110   :  { %v670_v57 = vmax.f32 %v488_v47, 0.0  ;;  %v702_v58 = vmax.f32 %v616_v48, 0.0  ;;  %v491_v59 = vadd.f32 %v1519_v37, %v490_v55  ;;  %v619_v60 = vadd.f32 %v1519_v37, %v618_v56 }
 0x111   :  { %v1191_v61 = vpack.c.bf16 %v672_v51, %v672_v51  ;;  %v1223_v62 = vpack.c.bf16 %v704_v52, %v704_v52  ;;  %v673_v63 = vmax.f32 %v499_v53, 0.0  ;;  %v705_v0 = vmax.f32 %v627_v54, 0.0 }
 0x112   :  { %v1189_v1 = vpack.c.bf16 %v670_v57, %v670_v57  ;;  %v1221_v2 = vpack.c.bf16 %v702_v58, %v702_v58  ;;  %v671_v3 = vmax.f32 %v491_v59, 0.0  ;;  %v703_v4 = vmax.f32 %v619_v60, 0.0 }
 0x113   :  { %993 = vst.msk [vmem:[%s1844_s3 + $0x68] sm:$0xf] %vm966_vm3, %v1191_v61  ;;  %1025 = vst.msk [vmem:[%s1844_s3 + $0xe8] sm:$0xf] %vm966_vm3, %v1223_v62  ;;  %v1192_v5 = vpack.c.bf16 %v673_v63, %v673_v63  ;;  %v1224_v6 = vpack.c.bf16 %v705_v0, %v705_v0 }
 0x114   :  { %991 = vst.msk [vmem:[%s1844_s3 + $0x60] sm:$0xf] %vm966_vm3, %v1189_v1  ;;  %1023 = vst.msk [vmem:[%s1844_s3 + $0xe0] sm:$0xf] %vm966_vm3, %v1221_v2  ;;  %v1190_v7 = vpack.c.bf16 %v671_v3, %v671_v3  ;;  %v1222_v8 = vpack.c.bf16 %v703_v4, %v703_v4  ;;  %v1294_v9 = vpop.f32.mrb[28].mxu0  ;;  %v1326_v10 = vpop.f32.mrb[28].mxu1 }
 0x115   :  { %994 = vst.msk [vmem:[%s1844_s3 + $0x6c] sm:$0xf] %vm966_vm3, %v1192_v5  ;;  %1026 = vst.msk [vmem:[%s1844_s3 + $0xec] sm:$0xf] %vm966_vm3, %v1224_v6  ;;  %v512_v11 = vadd.f32 %v1294_v9, %v1519_v37  ;;  %v640_v12 = vadd.f32 %v1326_v10, %v1519_v37  ;;  %v503_v13 = vpop.f32.mrb[29].mxu0  ;;  %v631_v14 = vpop.f32.mrb[29].mxu1 }
 0x116   :  { %992 = vst.msk [vmem:[%s1844_s3 + $0x64] sm:$0xf] %vm966_vm3, %v1190_v7  ;;  %1024 = vst.msk [vmem:[%s1844_s3 + $0xe4] sm:$0xf] %vm966_vm3, %v1222_v8  ;;  %v504_v15 = vadd.f32 %v1519_v37, %v503_v13  ;;  %v632_v16 = vadd.f32 %v1519_v37, %v631_v14  ;;  %v1295_v17 = vpop.f32.mrb[30].mxu0  ;;  %v1327_v18 = vpop.f32.mrb[30].mxu1 }
 0x117   :  { %v676_v19 = vmax.f32 %v512_v11, 0.0  ;;  %v708_v20 = vmax.f32 %v640_v12, 0.0  ;;  %v515_v21 = vadd.f32 %v1295_v17, %v1519_v37  ;;  %v643_v22 = vadd.f32 %v1327_v18, %v1519_v37  ;;  %v506_v23 = vpop.f32.mrb[31].mxu0  ;;  %v634_v24 = vpop.f32.mrb[31].mxu1 }
 0x118   :  { %v674_v25 = vmax.f32 %v504_v15, 0.0  ;;  %v706_v26 = vmax.f32 %v632_v16, 0.0  ;;  %v507_v27 = vadd.f32 %v1519_v37, %v506_v23  ;;  %v635_v28 = vadd.f32 %v1519_v37, %v634_v24 }
 0x119   :  { %v1195_v29 = vpack.c.bf16 %v676_v19, %v676_v19  ;;  %v1227_v30 = vpack.c.bf16 %v708_v20, %v708_v20  ;;  %v677_v31 = vmax.f32 %v515_v21, 0.0  ;;  %v709_v32 = vmax.f32 %v643_v22, 0.0 }
 0x11a   :  { %v1193_v33 = vpack.c.bf16 %v674_v25, %v674_v25  ;;  %v1225_v34 = vpack.c.bf16 %v706_v26, %v706_v26  ;;  %v675_v35 = vmax.f32 %v507_v27, 0.0  ;;  %v707_v36 = vmax.f32 %v635_v28, 0.0 }
 0x11b   :  { %997 = vst.msk [vmem:[%s1844_s3 + $0x78] sm:$0xf] %vm966_vm3, %v1195_v29  ;;  %1029 = vst.msk [vmem:[%s1844_s3 + $0xf8] sm:$0xf] %vm966_vm3, %v1227_v30  ;;  %v1196_v38 = vpack.c.bf16 %v677_v31, %v677_v31  ;;  %v1228_v37 = vpack.c.bf16 %v709_v32, %v709_v32 }
 0x11c   :  { %995 = vst.msk [vmem:[%s1844_s3 + $0x70] sm:$0xf] %vm966_vm3, %v1193_v33  ;;  %1027 = vst.msk [vmem:[%s1844_s3 + $0xf0] sm:$0xf] %vm966_vm3, %v1225_v34  ;;  %v1194_v39 = vpack.c.bf16 %v675_v35, %v675_v35  ;;  %v1226_v40 = vpack.c.bf16 %v707_v36, %v707_v36 }
 0x11d   :  { %998 = vst.msk [vmem:[%s1844_s3 + $0x7c] sm:$0xf] %vm966_vm3, %v1196_v38  ;;  %1030 = vst.msk [vmem:[%s1844_s3 + $0xfc] sm:$0xf] %vm966_vm3, %v1228_v37 }
 0x11e   :  { %996 = vst.msk [vmem:[%s1844_s3 + $0x74] sm:$0xf] %vm966_vm3, %v1194_v39  ;;  %1028 = vst.msk [vmem:[%s1844_s3 + $0xf4] sm:$0xf] %vm966_vm3, %v1226_v40 }

// kernel: _lambda_.8
= control target key start
LH: loop header
LB: loop body
LE: loop exit
PB: predicated region body
PF: predicated region fallthrough
CT: control target
= control target key end

     0   :  { %vm1520_vm0 = vmmov 0   ;;  %vm858_vm1 = vcmask 261120   ;;  %vm1144_vm2 = vcmask 519168   ;;  %s1862_s1 = inlined_call_operand.vmem [shape: bf16[1568,64], index: 1, kind: input, shape index: {}]   ;;  %s1863_s0 = inlined_call_operand.vmem [shape: bf16[8,1568], index: 0, kind: input, shape index: {}]   ;;  %s1864_s2 = inlined_call_operand.vmem [shape: f32[1,64], index: 2, kind: input, shape index: {}]   ;;  %s1865_s3 = inlined_call_operand.vmem [shape: bf16[8,64], index: 3, kind: output, shape index: {}]  }
   0x1   :  { %v1408_v0 = vld [vmem:[%s1862_s1 + $0x40] sm:$0xff]   ;;  %v1412_v4 = vld [vmem:[%s1862_s1 + $0x48] sm:$0xff]   ;;  %v1416_v8 = vld [vmem:[%s1862_s1 + $0x50] sm:$0xff]  }
   0x2   :  { %v1409_v1 = vld [vmem:[%s1862_s1] sm:$0xff]   ;;  %1263 = vmatprep.subr.bf16.mxu0 %v1408_v0  ;;  %v1413_v5 = vld [vmem:[%s1862_s1 + $0x8] sm:$0xff]   ;;  %v1417_v9 = vld [vmem:[%s1862_s1 + $0x10] sm:$0xff]  }
   0x3   :  { %v1410_v2 = vld [vmem:[%s1862_s1 + $0xc0] sm:$0xff]   ;;  %1264 = vmatpush3.bf16.msra.mxu0 %v1409_v1  ;;  %v1414_v6 = vld [vmem:[%s1862_s1 + $0xc8] sm:$0xff]   ;;  %v1418_v10 = vld [vmem:[%s1862_s1 + $0xd0] sm:$0xff]  }
   0x4   :  { %v1411_v3 = vld [vmem:[%s1862_s1 + $0x80] sm:$0xff]   ;;  %1285 = vmatprep.subr.bf16.mxu1 %v1410_v2  ;;  %1265 = vmatprep.subr.bf16.mxu0 %v1412_v4  ;;  %v1415_v7 = vld [vmem:[%s1862_s1 + $0x88] sm:$0xff]   ;;  %v1419_v11 = vld [vmem:[%s1862_s1 + $0x90] sm:$0xff]  }
   0x5   :  { %1286 = vmatpush3.bf16.msra.mxu1 %v1411_v3  ;;  %v1420_v12 = vld [vmem:[%s1862_s1 + $0x58] sm:$0xff]   ;;  %v1424_v16 = vld [vmem:[%s1862_s1 + $0x60] sm:$0xff]   ;;  %v1428_v20 = vld [vmem:[%s1862_s1 + $0x68] sm:$0xff]  }
   0x6   :  { %1287 = vmatprep.subr.bf16.mxu1 %v1414_v6  ;;  %v1421_v13 = vld [vmem:[%s1862_s1 + $0x18] sm:$0xff]   ;;  %v1425_v17 = vld [vmem:[%s1862_s1 + $0x20] sm:$0xff]   ;;  %v1429_v21 = vld [vmem:[%s1862_s1 + $0x28] sm:$0xff]  }
   0x7   :  { %1266 = vmatpush3.bf16.msra.mxu0 %v1413_v5  ;;  %v1422_v14 = vld [vmem:[%s1862_s1 + $0xd8] sm:$0xff]   ;;  %v1426_v18 = vld [vmem:[%s1862_s1 + $0xe0] sm:$0xff]   ;;  %v1430_v22 = vld [vmem:[%s1862_s1 + $0xe8] sm:$0xff]  }
   0x8   :  { %1267 = vmatprep.subr.bf16.mxu0 %v1416_v8  ;;  %v1423_v15 = vld [vmem:[%s1862_s1 + $0x98] sm:$0xff]   ;;  %v1427_v19 = vld [vmem:[%s1862_s1 + $0xa0] sm:$0xff]   ;;  %v1431_v23 = vld [vmem:[%s1862_s1 + $0xa8] sm:$0xff]  }
   0x9   :  { %1288 = vmatpush3.bf16.msra.mxu1 %v1415_v7  ;;  %v1432_v24 = vld [vmem:[%s1862_s1 + $0x70] sm:$0xff]   ;;  %v1436_v28 = vld [vmem:[%s1862_s1 + $0x78] sm:$0xff]   ;;  %v15_v32 = vld [vmem:[%s1863_s0] sm:$0xff] }
   0xa   :  { %1289 = vmatprep.subr.bf16.mxu1 %v1418_v10  ;;  %v1433_v25 = vld [vmem:[%s1862_s1 + $0x30] sm:$0xff]   ;;  %v1437_v29 = vld [vmem:[%s1862_s1 + $0x38] sm:$0xff]   ;;  %v1151_v33 = vcombine.low %v15_v32, %v15_v32  ;;  %v1152_v34 = vcombine.high %v15_v32, %v15_v32  ;;  %v1442_v35 = vld [vmem:[%s1862_s1 + $0x140] sm:$0xff]  }
   0xb   :  { %1268 = vmatpush3.bf16.msra.mxu0 %v1417_v9  ;;  %v1434_v26 = vld [vmem:[%s1862_s1 + $0xf0] sm:$0xff]   ;;  %v1438_v30 = vld [vmem:[%s1862_s1 + $0xf8] sm:$0xff]   ;;  %v16_v36 = vld [vmem:[%s1863_s0 + $0x8] sm:$0xff] }
   0xc   :  { %1269 = vmatprep.subr.bf16.mxu0 %v1420_v12  ;;  %v1435_v27 = vld [vmem:[%s1862_s1 + $0xb0] sm:$0xff]   ;;  %v1439_v31 = vld [vmem:[%s1862_s1 + $0xb8] sm:$0xff]   ;;  %v1153_v37 = vcombine.low %v16_v36, %v16_v36  ;;  %v1154_v38 = vcombine.high %v16_v36, %v16_v36  ;;  %v1445_v39 = vld [vmem:[%s1862_s1 + $0x100] sm:$0xff]   ;;  %894 = vmatprep.mubr.bf16.mxu0 %v1152_v34 }
   0xd   :  { %1290 = vmatpush3.bf16.msra.mxu1 %v1419_v11  ;;  %v1446_v40 = vld [vmem:[%s1862_s1 + $0x1c0] sm:$0xff]   ;;  %v1448_v42 = vld [vmem:[%s1862_s1 + $0x148] sm:$0xff]   ;;  %v1452_v46 = vld [vmem:[%s1862_s1 + $0x150] sm:$0xff]  }
   0xe   :  { %1291 = vmatprep.subr.bf16.mxu1 %v1422_v14  ;;  %934 = vmatprep.mubr.bf16.mxu1 %v1154_v38  ;;  %v1447_v41 = vld [vmem:[%s1862_s1 + $0x180] sm:$0xff]   ;;  %v1449_v43 = vld [vmem:[%s1862_s1 + $0x108] sm:$0xff]   ;;  %v1453_v47 = vld [vmem:[%s1862_s1 + $0x110] sm:$0xff]  }
   0xf   :  { %1270 = vmatpush3.bf16.msra.mxu0 %v1421_v13  ;;  %v1450_v44 = vld [vmem:[%s1862_s1 + $0x1c8] sm:$0xff]   ;;  %v1454_v48 = vld [vmem:[%s1862_s1 + $0x1d0] sm:$0xff]   ;;  %v1456_v50 = vld [vmem:[%s1862_s1 + $0x158] sm:$0xff]  }
  0x10   :  { %1271 = vmatprep.subr.bf16.mxu0 %v1424_v16  ;;  %v1451_v45 = vld [vmem:[%s1862_s1 + $0x188] sm:$0xff]   ;;  %v1455_v49 = vld [vmem:[%s1862_s1 + $0x190] sm:$0xff]   ;;  %v1457_v51 = vld [vmem:[%s1862_s1 + $0x118] sm:$0xff]  }
  0x11   :  { %1292 = vmatpush3.bf16.msra.mxu1 %v1423_v15  ;;  %v1458_v52 = vld [vmem:[%s1862_s1 + $0x1d8] sm:$0xff]   ;;  %v1460_v54 = vld [vmem:[%s1862_s1 + $0x160] sm:$0xff]   ;;  %v1464_v58 = vld [vmem:[%s1862_s1 + $0x168] sm:$0xff]  }
  0x12   :  { %1293 = vmatprep.subr.bf16.mxu1 %v1426_v18  ;;  %v1459_v53 = vld [vmem:[%s1862_s1 + $0x198] sm:$0xff]   ;;  %v1461_v55 = vld [vmem:[%s1862_s1 + $0x120] sm:$0xff]   ;;  %v1465_v59 = vld [vmem:[%s1862_s1 + $0x128] sm:$0xff]  }
  0x13   :  { %1272 = vmatpush3.bf16.msra.mxu0 %v1425_v17  ;;  %v1462_v56 = vld [vmem:[%s1862_s1 + $0x1e0] sm:$0xff]   ;;  %v1466_v60 = vld [vmem:[%s1862_s1 + $0x1e8] sm:$0xff]   ;;  %v1468_v62 = vld [vmem:[%s1862_s1 + $0x170] sm:$0xff]  }
  0x14   :  { %1273 = vmatprep.subr.bf16.mxu0 %v1428_v20  ;;  %v1463_v57 = vld [vmem:[%s1862_s1 + $0x1a0] sm:$0xff]   ;;  %v1467_v61 = vld [vmem:[%s1862_s1 + $0x1a8] sm:$0xff]   ;;  %v1469_v63 = vld [vmem:[%s1862_s1 + $0x130] sm:$0xff]  }
  0x15   :  { %1294 = vmatpush3.bf16.msra.mxu1 %v1427_v19  ;;  %v1470_v0 = vld [vmem:[%s1862_s1 + $0x1f0] sm:$0xff]   ;;  %v1472_v2 = vld [vmem:[%s1862_s1 + $0x178] sm:$0xff]   ;;  %v1478_v9 = vld [vmem:[%s1862_s1 + $0x240] sm:$0xff]  }
  0x16   :  { %1295 = vmatprep.subr.bf16.mxu1 %v1430_v22  ;;  %v1471_v1 = vld [vmem:[%s1862_s1 + $0x1b0] sm:$0xff]   ;;  %v1473_v3 = vld [vmem:[%s1862_s1 + $0x138] sm:$0xff]   ;;  %v1481_v13 = vld [vmem:[%s1862_s1 + $0x200] sm:$0xff]  }
  0x17   :  { %1274 = vmatpush3.bf16.msra.mxu0 %v1429_v21  ;;  %v1474_v4 = vld [vmem:[%s1862_s1 + $0x1f8] sm:$0xff]   ;;  %v17_v6 = vld [vmem:[%s1863_s0 + $0x10] sm:$0xff]  ;;  %v1482_v14 = vld [vmem:[%s1862_s1 + $0x2c0] sm:$0xff]  }
  0x18   :  { %1275 = vmatprep.subr.bf16.mxu0 %v1432_v24  ;;  %v1475_v5 = vld [vmem:[%s1862_s1 + $0x1b8] sm:$0xff]   ;;  %v1155_v7 = vcombine.low %v17_v6, %v17_v6  ;;  %v1156_v8 = vcombine.high %v17_v6, %v17_v6  ;;  %v1483_v15 = vld [vmem:[%s1862_s1 + $0x280] sm:$0xff]   ;;  %v1484_v16 = vld [vmem:[%s1862_s1 + $0x248] sm:$0xff]  }
  0x19   :  { %1296 = vmatpush3.bf16.msra.mxu1 %v1431_v23  ;;  %v18_v10 = vld [vmem:[%s1863_s0 + $0x18] sm:$0xff]  ;;  %v1485_v17 = vld [vmem:[%s1862_s1 + $0x208] sm:$0xff]   ;;  %v1488_v20 = vld [vmem:[%s1862_s1 + $0x250] sm:$0xff]  }
  0x1a   :  { %1297 = vmatprep.subr.bf16.mxu1 %v1434_v26  ;;  %v1157_v11 = vcombine.low %v18_v10, %v18_v10  ;;  %v1158_v12 = vcombine.high %v18_v10, %v18_v10  ;;  %v1486_v18 = vld [vmem:[%s1862_s1 + $0x2c8] sm:$0xff]   ;;  %v1489_v21 = vld [vmem:[%s1862_s1 + $0x210] sm:$0xff]   ;;  %v1492_v24 = vld [vmem:[%s1862_s1 + $0x258] sm:$0xff]  }
  0x1b   :  { %1276 = vmatpush3.bf16.msra.mxu0 %v1433_v25  ;;  %v1487_v19 = vld [vmem:[%s1862_s1 + $0x288] sm:$0xff]   ;;  %v1490_v22 = vld [vmem:[%s1862_s1 + $0x2d0] sm:$0xff]   ;;  %v1493_v25 = vld [vmem:[%s1862_s1 + $0x218] sm:$0xff]  }
  0x1c   :  { %1277 = vmatprep.subr.bf16.mxu0 %v1436_v28  ;;  %v1491_v23 = vld [vmem:[%s1862_s1 + $0x290] sm:$0xff]   ;;  %v1494_v26 = vld [vmem:[%s1862_s1 + $0x2d8] sm:$0xff]   ;;  %v1496_v28 = vld [vmem:[%s1862_s1 + $0x260] sm:$0xff]  }
  0x1d   :  { %1298 = vmatpush3.bf16.msra.mxu1 %v1435_v27  ;;  %v1495_v27 = vld [vmem:[%s1862_s1 + $0x298] sm:$0xff]   ;;  %v1500_v32 = vld [vmem:[%s1862_s1 + $0x268] sm:$0xff]   ;;  %v1504_v36 = vld [vmem:[%s1862_s1 + $0x270] sm:$0xff]  }
  0x1e   :  { %1299 = vmatprep.subr.bf16.mxu1 %v1438_v30  ;;  %v1498_v30 = vld [vmem:[%s1862_s1 + $0x2e0] sm:$0xff]   ;;  %v1502_v34 = vld [vmem:[%s1862_s1 + $0x2e8] sm:$0xff]   ;;  %v1506_v38 = vld [vmem:[%s1862_s1 + $0x2f0] sm:$0xff]  }
  0x1f   :  { %1278 = vmatpush3.bf16.msra.mxu0 %v1437_v29  ;;  %v1497_v29 = vld [vmem:[%s1862_s1 + $0x220] sm:$0xff]  }
  0x20   :  { %1307 = vmatprep.subr.bf16.mxu0 %v1442_v35  ;;  %v1503_v35 = vld [vmem:[%s1862_s1 + $0x2a8] sm:$0xff]  }
  0x21   :  { %1300 = vmatpush3.bf16.msra.mxu1 %v1439_v31  ;;  %v1499_v31 = vld [vmem:[%s1862_s1 + $0x2a0] sm:$0xff]  }
  0x22   :  { %895 = vmatmul.mubr.bf16.vlgmr.msra.gmra.mrb[0].mxu0 %v1151_v33  ;;  %1329 = vmatprep.subr.bf16.mxu1 %v1446_v40  ;;  %v1501_v33 = vld [vmem:[%s1862_s1 + $0x228] sm:$0xff]   ;;  %v1508_v40 = vld [vmem:[%s1862_s1 + $0x278] sm:$0xff]  }
  0x23   :  { %1308 = vmatpush3.bf16.msra.mxu0 %v1445_v39  ;;  %974 = vmatprep.mubr.bf16.mxu0 %v1156_v8  ;;  %v1507_v39 = vld [vmem:[%s1862_s1 + $0x2b0] sm:$0xff]  }
  0x24   :  { %935 = vmatmul.mubr.bf16.vlgmr.msra.gmra.mrb[0].mxu1 %v1153_v37  ;;  %1309 = vmatprep.subr.bf16.mxu0 %v1448_v42  ;;  %v1505_v37 = vld [vmem:[%s1862_s1 + $0x230] sm:$0xff]   ;;  %v1510_v42 = vld [vmem:[%s1862_s1 + $0x2f8] sm:$0xff]  }
  0x25   :  { %1330 = vmatpush3.bf16.msra.mxu1 %v1447_v41  ;;  %1014 = vmatprep.mubr.bf16.mxu1 %v1158_v12  ;;  %v1509_v41 = vld [vmem:[%s1862_s1 + $0x238] sm:$0xff]  }
  0x26   :  { %1331 = vmatprep.subr.bf16.mxu1 %v1450_v44  ;;  %v19_v44 = vld [vmem:[%s1863_s0 + $0x20] sm:$0xff] }
  0x27   :  { %1310 = vmatpush3.bf16.msra.mxu0 %v1449_v43  ;;  %v1511_v43 = vld [vmem:[%s1862_s1 + $0x2b8] sm:$0xff]  }
  0x28   :  { %1311 = vmatprep.subr.bf16.mxu0 %v1452_v46  ;;  %v1159_v46 = vcombine.low %v19_v44, %v19_v44 }
  0x29   :  { %1332 = vmatpush3.bf16.msra.mxu1 %v1451_v45  ;;  %v20_v45 = vld [vmem:[%s1863_s0 + $0x28] sm:$0xff] }
  0x2a   :  { %1333 = vmatprep.subr.bf16.mxu1 %v1454_v48  ;;  %v1161_v48 = vcombine.low %v20_v45, %v20_v45 }
  0x2b   :  { %1312 = vmatpush3.bf16.msra.mxu0 %v1453_v47  ;;  %v1160_v47 = vcombine.high %v19_v44, %v19_v44 }
  0x2c   :  { %1313 = vmatprep.subr.bf16.mxu0 %v1456_v50  ;;  %v1516_v50 = vld [vmem:[%s1862_s1 + $0x300] sm:$0xff]  }
  0x2d   :  { %1334 = vmatpush3.bf16.msra.mxu1 %v1455_v49  ;;  %v1162_v49 = vcombine.high %v20_v45, %v20_v45 }
  0x2e   :  { %1335 = vmatprep.subr.bf16.mxu1 %v1458_v52  ;;  %v1517_v52 = vld [vmem:[%s1862_s1 + $0x308] sm:$0xff]  }
  0x2f   :  { %1314 = vmatpush3.bf16.msra.mxu0 %v1457_v51  ;;  %v1519_v51 = vmov 0.0  }
  0x30   :  { %1315 = vmatprep.subr.bf16.mxu0 %v1460_v54 }
  0x31   :  { %1336 = vmatpush3.bf16.msra.mxu1 %v1459_v53  ;;  %v1518_v53 = vld [vmem:[%s1863_s0 + $0x30] ss:$0 sps:$4 sm:$0xff]  }
  0x32   :  { %1337 = vmatprep.subr.bf16.mxu1 %v1462_v56 }
  0x33   :  { %1316 = vmatpush3.bf16.msra.mxu0 %v1461_v55  ;;  %v1150_v55 = vld [vmem:[%s1864_s2] ss:$0 sm:$0xff] }
  0x34   :  { %1317 = vmatprep.subr.bf16.mxu0 %v1464_v58 }
  0x35   :  { %1338 = vmatpush3.bf16.msra.mxu1 %v1463_v57 }
  0x36   :  { %1339 = vmatprep.subr.bf16.mxu1 %v1466_v60 }
  0x37   :  { %1318 = vmatpush3.bf16.msra.mxu0 %v1465_v59 }
  0x38   :  { %1319 = vmatprep.subr.bf16.mxu0 %v1468_v62 }
  0x39   :  { %1340 = vmatpush3.bf16.msra.mxu1 %v1467_v61 }
  0x3a   :  { %1341 = vmatprep.subr.bf16.mxu1 %v1470_v0 }
  0x3b   :  { %1320 = vmatpush3.bf16.msra.mxu0 %v1469_v63 }
  0x3c   :  { %1321 = vmatprep.subr.bf16.mxu0 %v1472_v2 }
  0x3d   :  { %1342 = vmatpush3.bf16.msra.mxu1 %v1471_v1 }
  0x3e   :  { %1343 = vmatprep.subr.bf16.mxu1 %v1474_v4 }
  0x3f   :  { %1322 = vmatpush3.bf16.msra.mxu0 %v1473_v3 }
  0x40   :  { %1351 = vmatprep.subr.bf16.mxu0 %v1478_v9 }
  0x41   :  { %1344 = vmatpush3.bf16.msra.mxu1 %v1475_v5 }
  0x42   :  { %975 = vmatmul.mubr.bf16.vlgmr.msra.gmra.mrb[4].mxu0 %v1155_v7  ;;  %1373 = vmatprep.subr.bf16.mxu1 %v1482_v14 }
  0x43   :  { %1352 = vmatpush3.bf16.msra.mxu0 %v1481_v13  ;;  %1054 = vmatprep.mubr.bf16.mxu0 %v1160_v47 }
  0x44   :  { %1015 = vmatmul.mubr.bf16.vlgmr.msra.gmra.mrb[4].mxu1 %v1157_v11  ;;  %1353 = vmatprep.subr.bf16.mxu0 %v1484_v16 }
  0x45   :  { %1374 = vmatpush3.bf16.msra.mxu1 %v1483_v15  ;;  %1094 = vmatprep.mubr.bf16.mxu1 %v1162_v49 }
  0x46   :  { %1375 = vmatprep.subr.bf16.mxu1 %v1486_v18 }
  0x47   :  { %1354 = vmatpush3.bf16.msra.mxu0 %v1485_v17 }
  0x48   :  { %1355 = vmatprep.subr.bf16.mxu0 %v1488_v20 }
  0x49   :  { %1376 = vmatpush3.bf16.msra.mxu1 %v1487_v19 }
  0x4a   :  { %1377 = vmatprep.subr.bf16.mxu1 %v1490_v22 }
  0x4b   :  { %1356 = vmatpush3.bf16.msra.mxu0 %v1489_v21 }
  0x4c   :  { %1357 = vmatprep.subr.bf16.mxu0 %v1492_v24 }
  0x4d   :  { %1378 = vmatpush3.bf16.msra.mxu1 %v1491_v23 }
  0x4e   :  { %1379 = vmatprep.subr.bf16.mxu1 %v1494_v26 }
  0x4f   :  { %1358 = vmatpush3.bf16.msra.mxu0 %v1493_v25 }
  0x50   :  { %1359 = vmatprep.subr.bf16.mxu0 %v1496_v28 }
  0x51   :  { %1380 = vmatpush3.bf16.msra.mxu1 %v1495_v27 }
  0x52   :  { %1381 = vmatprep.subr.bf16.mxu1 %v1498_v30 }
  0x53   :  { %1360 = vmatpush3.bf16.msra.mxu0 %v1497_v29 }
  0x54   :  { %1361 = vmatprep.subr.bf16.mxu0 %v1500_v32 }
  0x55   :  { %1382 = vmatpush3.bf16.msra.mxu1 %v1499_v31 }
  0x56   :  { %1383 = vmatprep.subr.bf16.mxu1 %v1502_v34 }
  0x57   :  { %1362 = vmatpush3.bf16.msra.mxu0 %v1501_v33 }
  0x58   :  { %1363 = vmatprep.subr.bf16.mxu0 %v1504_v36 }
  0x59   :  { %1384 = vmatpush3.bf16.msra.mxu1 %v1503_v35 }
  0x5a   :  { %1385 = vmatprep.subr.bf16.mxu1 %v1506_v38 }
  0x5b   :  { %1364 = vmatpush3.bf16.msra.mxu0 %v1505_v37 }
  0x5c   :  { %1365 = vmatprep.subr.bf16.mxu0 %v1508_v40 }
  0x5d   :  { %1386 = vmatpush3.bf16.msra.mxu1 %v1507_v39 }
  0x5e   :  { %1387 = vmatprep.subr.bf16.mxu1 %v1510_v42 }
  0x5f   :  { %1366 = vmatpush3.bf16.msra.mxu0 %v1509_v41 }
  0x60   :  { %1398 = vmatprep.subr.bf16.mxu0 %v1519_v51 }
  0x61   :  { %1388 = vmatpush3.bf16.msra.mxu1 %v1511_v43 }
  0x62   :  { %1055 = vmatmul.mubr.bf16.vlgmr.msra.gmra.mrb[8].mxu0 %v1159_v46 }
  0x63   :  { %1399 = vmatpush3.bf16.msra.mxu0 %v1516_v50  ;;  %1402 = vmatprep.mubr.msk.bf16.mxu0 %vm1520_vm0, %v1519_v51 }
  0x64   :  { %1095 = vmatmul.mubr.bf16.vlgmr.msra.gmra.mrb[8].mxu1 %v1161_v48  ;;  %1400 = vmatprep.subr.bf16.mxu0 %v1519_v51 }
  0x67   :  { %1401 = vmatpush3.bf16.msra.mxu0 %v1517_v52 }
  0x6a   :  { %1403 = vmatmul.mubr.msk.bf16.vlgmr.msra.gmra.mrb[12].mxu0 %vm858_vm1, %v1518_v53 }
  0xf5   :  { %v1279_v54 = vpop.f32.mrb[0].mxu0 }
  0xf6   :  { %v1280_v56 = vpop.f32.mrb[1].mxu0 }
  0xf7   :  { %v1281_v57 = vadd.f32 %v1280_v56, %v1279_v54  ;;  %v1282_v58 = vpop.f32.mrb[2].mxu0  ;;  %v1301_v59 = vpop.f32.mrb[0].mxu1 }
  0xf8   :  { %v1283_v60 = vpop.f32.mrb[3].mxu0  ;;  %v1302_v61 = vpop.f32.mrb[1].mxu1 }
  0xf9   :  { %v897_v62 = vadd.f32 %v1281_v57, %v1150_v55  ;;  %v1303_v63 = vadd.f32 %v1302_v61, %v1301_v59  ;;  %v1304_v0 = vpop.f32.mrb[2].mxu1 }
  0xfa   :  { %v1305_v1 = vpop.f32.mrb[3].mxu1 }
  0xfb   :  { %v937_v2 = vadd.f32 %v1303_v63, %v897_v62 }
 0x115   :  { %v1323_v3 = vpop.f32.mrb[4].mxu0 }
 0x116   :  { %v1324_v4 = vpop.f32.mrb[5].mxu0 }
 0x117   :  { %v1325_v5 = vadd.f32 %v1324_v4, %v1323_v3  ;;  %v1326_v6 = vpop.f32.mrb[6].mxu0  ;;  %v1345_v7 = vpop.f32.mrb[4].mxu1 }
 0x118   :  { %v1327_v8 = vpop.f32.mrb[7].mxu0  ;;  %v1346_v9 = vpop.f32.mrb[5].mxu1 }
 0x119   :  { %v977_v10 = vadd.f32 %v1325_v5, %v937_v2  ;;  %v1347_v11 = vadd.f32 %v1346_v9, %v1345_v7  ;;  %v1348_v12 = vpop.f32.mrb[6].mxu1 }
 0x11a   :  { %v1349_v13 = vpop.f32.mrb[7].mxu1 }
 0x11b   :  { %v1017_v14 = vadd.f32 %v1347_v11, %v977_v10 }
 0x135   :  { %v1367_v15 = vpop.f32.mrb[8].mxu0 }
 0x136   :  { %v1368_v16 = vpop.f32.mrb[9].mxu0 }
 0x137   :  { %v1389_v17 = vpop.f32.mrb[8].mxu1  ;;  %v1369_v18 = vadd.f32 %v1368_v16, %v1367_v15  ;;  %v1370_v19 = vpop.f32.mrb[10].mxu0 }
 0x138   :  { %v1390_v20 = vpop.f32.mrb[9].mxu1  ;;  %v1371_v22 = vpop.f32.mrb[11].mxu0 }
 0x139   :  { %v1391_v21 = vadd.f32 %v1390_v20, %v1389_v17  ;;  %v1392_v23 = vpop.f32.mrb[10].mxu1  ;;  %v1057_v24 = vadd.f32 %v1369_v18, %v1017_v14 }
 0x13a   :  { %v1393_v25 = vpop.f32.mrb[11].mxu1 }
 0x13b   :  { %v1097_v26 = vadd.f32 %v1391_v21, %v1057_v24 }
 0x13d   :  { %v1136_v27 = vpop.f32.mrb[12].mxu0 }
 0x13e   :  { %v1137_v28 = vadd.f32 %v1136_v27, %v1097_v26  ;;  %v1404_v29 = vpop.f32.mrb[13].mxu0 }
 0x13f   :  { %v1139_v30 = vpop.f32.mrb[14].mxu0 }
 0x140   :  { %v1142_v31 = vmax.f32 %v1137_v28, 0.0  ;;  %v1405_v32 = vpop.f32.mrb[15].mxu0 }
 0x142   :  { %v1143_v33 = vpack.c.bf16 %v1142_v31, %v1142_v31 }
 0x144   :  { %1145 = vst.msk [vmem:[%s1865_s3] sm:$0xf] %vm1144_vm2, %v1143_v33 }

// kernel: _lambda_.9
= control target key start
LH: loop header
LB: loop body
LE: loop exit
PB: predicated region body
PF: predicated region fallthrough
CT: control target
= control target key end

     0   :  { %vm5457_vm0 = vmmov 0   ;;  %vm2596_vm1 = vcmask 523264   ;;  %vm3828_vm2 = vcmask 257024   ;;  %vm3841_vm3 = vcmask 253952   ;;  %s6883_s1 = inlined_call_operand.vmem [shape: bf16[3136,32], index: 1, kind: input, shape index: {}]   ;;  %s6884_s0 = inlined_call_operand.vmem [shape: bf16[98,3136], index: 0, kind: input, shape index: {}]   ;;  %s6885_s2 = inlined_call_operand.vmem [shape: f32[1,32], index: 2, kind: input, shape index: {}]   ;;  %s6886_s3 = inlined_call_operand.vmem [shape: bf16[98,32], index: 3, kind: output, shape index: {}]  }
   0x1   :  { %v5013_v0 = vld [vmem:[%s6883_s1 + $0x40] sm:$0xff]   ;;  %v5015_v2 = vld [vmem:[%s6883_s1 + $0x48] sm:$0xff]   ;;  %v5017_v4 = vld [vmem:[%s6883_s1 + $0x50] sm:$0xff]  }
   0x2   :  { %v5014_v1 = vld [vmem:[%s6883_s1] sm:$0xff]   ;;  %4995 = vmatprep.subr.bf16.mxu1 %v5013_v0  ;;  %4252 = vmatprep.subr.bf16.mxu0 %v5013_v0  ;;  %v5016_v3 = vld [vmem:[%s6883_s1 + $0x8] sm:$0xff]   ;;  %v5018_v5 = vld [vmem:[%s6883_s1 + $0x10] sm:$0xff]  }
   0x3   :  { %5003 = vmatpush3.bf16.msra.mxu1 %v5014_v1  ;;  %4253 = vmatpush3.bf16.msra.mxu0 %v5014_v1  ;;  %v5019_v6 = vld [vmem:[%s6883_s1 + $0x58] sm:$0xff]   ;;  %v5021_v8 = vld [vmem:[%s6883_s1 + $0x60] sm:$0xff]   ;;  %v5023_v10 = vld [vmem:[%s6883_s1 + $0x68] sm:$0xff]  }
   0x4   :  { %4996 = vmatprep.subr.bf16.mxu1 %v5015_v2  ;;  %4254 = vmatprep.subr.bf16.mxu0 %v5015_v2  ;;  %v5020_v7 = vld [vmem:[%s6883_s1 + $0x18] sm:$0xff]   ;;  %v5022_v9 = vld [vmem:[%s6883_s1 + $0x20] sm:$0xff]   ;;  %v5024_v12 = vld [vmem:[%s6883_s1 + $0x28] sm:$0xff]  }
   0x5   :  { %v5031_v11 = vld [vmem:[%s6884_s0 + $0x324] ss:$100 sps:$4 sm:$0xff]   ;;  %v5025_v14 = vld [vmem:[%s6883_s1 + $0x70] sm:$0xff]   ;;  %v5027_v16 = vld [vmem:[%s6883_s1 + $0x78] sm:$0xff]  }
   0x6   :  { %v5035_v13 = vld [vmem:[%s6884_s0 + $0x4] ss:$100 sps:$4 sm:$0xff]   ;;  %2682 = vmatprep.mubr.bf16.mxu1 %v5031_v11  ;;  %v5026_v15 = vld [vmem:[%s6883_s1 + $0x30] sm:$0xff]   ;;  %v5028_v17 = vld [vmem:[%s6883_s1 + $0x38] sm:$0xff]  }
   0x7   :  { %5004 = vmatpush3.bf16.msra.mxu1 %v5016_v3  ;;  %4255 = vmatpush3.bf16.msra.mxu0 %v5016_v3  ;;  %v5032_v18 = vld [vmem:[%s6883_s1 + $0xc0] sm:$0xff]   ;;  %v5039_v24 = vld [vmem:[%s6883_s1 + $0xc8] sm:$0xff]   ;;  %v5043_v30 = vld [vmem:[%s6883_s1 + $0xd0] sm:$0xff]  }
   0x8   :  { %4997 = vmatprep.subr.bf16.mxu1 %v5017_v4  ;;  %4256 = vmatprep.subr.bf16.mxu0 %v5017_v4  ;;  %v5029_v19 = vld [vmem:[%s6884_s0 + $0x320] ss:$100 sps:$4 sm:$0xff]   ;;  %v5041_v25 = vld [vmem:[%s6883_s1 + $0x148] sm:$0xff]   ;;  %v5048_v31 = vld [vmem:[%s6883_s1 + $0x150] sm:$0xff]  }
   0x9   :  { %2650 = vmatprep.mubr.bf16.mxu0 %v5035_v13  ;;  %v5033_v20 = vld [vmem:[%s6884_s0] ss:$100 sps:$4 sm:$0xff]   ;;  %v5044_v26 = vld [vmem:[%s6884_s0 + $0xcc] ss:$100 sps:$4 sm:$0xff]   ;;  %v5050_v36 = vld [vmem:[%s6883_s1 + $0xd8] sm:$0xff]  }
   0xa   :  { %v5037_v21 = vld [vmem:[%s6883_s1 + $0x140] sm:$0xff]   ;;  %v5040_v27 = vld [vmem:[%s6883_s1 + $0x88] sm:$0xff]   ;;  %v5046_v32 = vld [vmem:[%s6883_s1 + $0x90] sm:$0xff]  }
   0xb   :  { %5005 = vmatpush3.bf16.msra.mxu1 %v5018_v5  ;;  %4257 = vmatpush3.bf16.msra.mxu0 %v5018_v5  ;;  %v5036_v22 = vld [vmem:[%s6883_s1 + $0x80] sm:$0xff]   ;;  %v5051_v28 = vld [vmem:[%s6884_s0 + $0x3ec] ss:$100 sps:$4 sm:$0xff]   ;;  %v5055_v37 = vld [vmem:[%s6883_s1 + $0x158] sm:$0xff]  }
   0xc   :  { %4998 = vmatprep.subr.bf16.mxu1 %v5019_v6  ;;  %4258 = vmatprep.subr.bf16.mxu0 %v5019_v6  ;;  %v5038_v23 = vld [vmem:[%s6883_s1 + $0x100] sm:$0xff]   ;;  %v5042_v29 = vld [vmem:[%s6883_s1 + $0x108] sm:$0xff]   ;;  %v5049_v35 = vld [vmem:[%s6883_s1 + $0x110] sm:$0xff]  }
   0xd   :  { %v5047_v33 = vld [vmem:[%s6884_s0 + $0xc8] ss:$100 sps:$4 sm:$0xff]   ;;  %v5053_v38 = vld [vmem:[%s6883_s1 + $0x98] sm:$0xff]   ;;  %v5057_v41 = vld [vmem:[%s6883_s1 + $0xe0] sm:$0xff]  }
   0xe   :  { %v5054_v34 = vld [vmem:[%s6884_s0 + $0x3e8] ss:$100 sps:$4 sm:$0xff]   ;;  %v5058_v39 = vld [vmem:[%s6884_s0 + $0x194] ss:$100 sps:$4 sm:$0xff]   ;;  %v5062_v43 = vld [vmem:[%s6883_s1 + $0x160] sm:$0xff]  }
   0xf   :  { %5006 = vmatpush3.bf16.msra.mxu1 %v5020_v7  ;;  %4259 = vmatpush3.bf16.msra.mxu0 %v5020_v7  ;;  %v5056_v40 = vld [vmem:[%s6883_s1 + $0x118] sm:$0xff]   ;;  %v171_v42 = vld [vmem:[%s6884_s0 + $0x4b0] sm:$0x11]  ;;  %v5060_v45 = vld [vmem:[%s6883_s1 + $0xa0] sm:$0xff]  }
  0x10   :  { %4999 = vmatprep.subr.bf16.mxu1 %v5021_v8  ;;  %4260 = vmatprep.subr.bf16.mxu0 %v5021_v8  ;;  %v3999_v44 = vcombine.high %v171_v42, %v171_v42  ;;  %v5061_v46 = vld [vmem:[%s6884_s0 + $0x190] ss:$100 sps:$4 sm:$0xff]   ;;  %v5063_v47 = vld [vmem:[%s6883_s1 + $0x120] sm:$0xff]   ;;  %v3998_v48 = vcombine.low %v171_v42, %v171_v42  ;;  %v5064_v49 = vld [vmem:[%s6883_s1 + $0xe8] sm:$0xff]  }
  0x11   :  { %v5068_v50 = vld [vmem:[%s6883_s1 + $0x168] sm:$0xff]   ;;  %v5071_v52 = vld [vmem:[%s6884_s0 + $0x25c] ss:$100 sps:$4 sm:$0xff]   ;;  %v5070_v54 = vld [vmem:[%s6883_s1 + $0xf0] sm:$0xff]  }
  0x12   :  { %v5066_v51 = vld [vmem:[%s6883_s1 + $0xa8] sm:$0xff]   ;;  %v5075_v55 = vld [vmem:[%s6883_s1 + $0x170] sm:$0xff]   ;;  %v5074_v57 = vld [vmem:[%s6884_s0 + $0x258] ss:$100 sps:$4 sm:$0xff]  }
  0x13   :  { %5007 = vmatpush3.bf16.msra.mxu1 %v5022_v9  ;;  %4261 = vmatpush3.bf16.msra.mxu0 %v5022_v9  ;;  %v5069_v53 = vld [vmem:[%s6883_s1 + $0x128] sm:$0xff]   ;;  %v5073_v56 = vld [vmem:[%s6883_s1 + $0xb0] sm:$0xff]   ;;  %v5077_v59 = vld [vmem:[%s6883_s1 + $0xf8] sm:$0xff]  }
  0x14   :  { %5000 = vmatprep.subr.bf16.mxu1 %v5023_v10  ;;  %4262 = vmatprep.subr.bf16.mxu0 %v5023_v10  ;;  %v5076_v58 = vld [vmem:[%s6883_s1 + $0x130] sm:$0xff]   ;;  %v5079_v60 = vld [vmem:[%s6883_s1 + $0x178] sm:$0xff]   ;;  %v5084_v0 = vld [vmem:[%s6883_s1 + $0x1c0] sm:$0xff]  }
  0x15   :  { %v5082_v61 = vld [vmem:[%s6884_s0 + $0xc] ss:$100 sps:$4 sm:$0xff]   ;;  %v5078_v62 = vld [vmem:[%s6883_s1 + $0xb8] sm:$0xff]   ;;  %v5088_v4 = vld [vmem:[%s6883_s1 + $0x180] sm:$0xff]  }
  0x16   :  { %v5083_v63 = vld [vmem:[%s6883_s1 + $0x138] sm:$0xff]   ;;  %v5080_v2 = vld [vmem:[%s6884_s0 + $0x8] ss:$100 sps:$4 sm:$0xff]   ;;  %v5085_v3 = vld [vmem:[%s6884_s0 + $0x10] ss:$100 sps:$4 sm:$0xff]  }
  0x17   :  { %5008 = vmatpush3.bf16.msra.mxu1 %v5024_v12  ;;  %4263 = vmatpush3.bf16.msra.mxu0 %v5024_v12  ;;  %v5087_v1 = vld [vmem:[%s6884_s0 + $0x14] ss:$100 sps:$4 sm:$0xff]   ;;  %v5089_v5 = vld [vmem:[%s6883_s1 + $0x240] sm:$0xff]   ;;  %v5093_v8 = vld [vmem:[%s6883_s1 + $0x1c8] sm:$0xff]  }
  0x18   :  { %5001 = vmatprep.subr.bf16.mxu1 %v5025_v14  ;;  %4264 = vmatprep.subr.bf16.mxu0 %v5025_v14  ;;  %v5090_v6 = vld [vmem:[%s6883_s1 + $0x200] sm:$0xff]   ;;  %v5091_v7 = vld [vmem:[%s6884_s0 + $0xd4] ss:$100 sps:$4 sm:$0xff]   ;;  %v5095_v9 = vld [vmem:[%s6883_s1 + $0x188] sm:$0xff]  }
  0x19   :  { %v5096_v10 = vld [vmem:[%s6884_s0 + $0xdc] ss:$100 sps:$4 sm:$0xff]   ;;  %v5094_v11 = vld [vmem:[%s6884_s0 + $0xd0] ss:$100 sps:$4 sm:$0xff]   ;;  %v5099_v13 = vld [vmem:[%s6883_s1 + $0x248] sm:$0xff]  }
  0x1a   :  { %v5098_v12 = vld [vmem:[%s6884_s0 + $0xd8] ss:$100 sps:$4 sm:$0xff]   ;;  %v5100_v14 = vld [vmem:[%s6883_s1 + $0x208] sm:$0xff]  }
  0x1b   :  { %5009 = vmatpush3.bf16.msra.mxu1 %v5026_v15  ;;  %4265 = vmatpush3.bf16.msra.mxu0 %v5026_v15  ;;  %v5101_v15 = vld [vmem:[%s6883_s1 + $0x1d0] sm:$0xff]   ;;  %v5136_v42 = vld [vmem:[%s6883_s1 + $0x268] sm:$0xff]  }
  0x1c   :  { %5002 = vmatprep.subr.bf16.mxu1 %v5027_v16  ;;  %4266 = vmatprep.subr.bf16.mxu0 %v5027_v16  ;;  %v5102_v16 = vld [vmem:[%s6884_s0 + $0x19c] ss:$100 sps:$4 sm:$0xff]  }
  0x1f   :  { %5010 = vmatpush3.bf16.msra.mxu1 %v5028_v17  ;;  %4267 = vmatpush3.bf16.msra.mxu0 %v5028_v17  ;;  %v5104_v17 = vld [vmem:[%s6883_s1 + $0x190] sm:$0xff]  }
  0x20   :  { %4310 = vmatprep.subr.bf16.mxu1 %v5032_v18  ;;  %4368 = vmatprep.subr.bf16.mxu0 %v5037_v21  ;;  %v5106_v18 = vld [vmem:[%s6884_s0 + $0x1a4] ss:$100 sps:$4 sm:$0xff]  }
  0x21   :  { %v5108_v21 = vld [vmem:[%s6884_s0 + $0x1a0] ss:$100 sps:$4 sm:$0xff]  }
  0x22   :  { %2683 = vmatmul.mubr.bf16.vlgmr.msra.gmra.mrb[0].mxu1 %v5029_v19  ;;  %2651 = vmatmul.mubr.bf16.vlgmr.msra.gmra.mrb[0].mxu0 %v5033_v20  ;;  %v5109_v19 = vld [vmem:[%s6883_s1 + $0x250] sm:$0xff]   ;;  %v5105_v20 = vld [vmem:[%s6884_s0 + $0x198] ss:$100 sps:$4 sm:$0xff]  }
  0x23   :  { %4311 = vmatpush3.bf16.msra.mxu1 %v5036_v22  ;;  %4369 = vmatpush3.bf16.msra.mxu0 %v5038_v23  ;;  %v5110_v22 = vld [vmem:[%s6883_s1 + $0x210] sm:$0xff]   ;;  %v5111_v23 = vld [vmem:[%s6883_s1 + $0x1d8] sm:$0xff]  }
  0x24   :  { %4312 = vmatprep.subr.bf16.mxu1 %v5039_v24  ;;  %4370 = vmatprep.subr.bf16.mxu0 %v5041_v25  ;;  %v5112_v24 = vld [vmem:[%s6883_s1 + $0x198] sm:$0xff]   ;;  %v5113_v25 = vld [vmem:[%s6884_s0 + $0x264] ss:$100 sps:$4 sm:$0xff]  }
  0x25   :  { %2658 = vmatprep.mubr.bf16.mxu0 %v5044_v26  ;;  %2690 = vmatprep.mubr.bf16.mxu1 %v5051_v28  ;;  %v5116_v26 = vld [vmem:[%s6884_s0 + $0x26c] ss:$100 sps:$4 sm:$0xff]   ;;  %v5120_v28 = vld [vmem:[%s6883_s1 + $0x218] sm:$0xff]  }
  0x27   :  { %4313 = vmatpush3.bf16.msra.mxu1 %v5040_v27  ;;  %4371 = vmatpush3.bf16.msra.mxu0 %v5042_v29  ;;  %v5119_v27 = vld [vmem:[%s6883_s1 + $0x258] sm:$0xff]   ;;  %v5121_v29 = vld [vmem:[%s6883_s1 + $0x1e0] sm:$0xff]  }
  0x28   :  { %4314 = vmatprep.subr.bf16.mxu1 %v5043_v30  ;;  %4372 = vmatprep.subr.bf16.mxu0 %v5048_v31  ;;  %v5115_v30 = vld [vmem:[%s6884_s0 + $0x260] ss:$100 sps:$4 sm:$0xff]  }
  0x29   :  { %v5122_v31 = vld [vmem:[%s6883_s1 + $0x1a0] sm:$0xff]  }
  0x2a   :  { %2659 = vmatmul.mubr.bf16.gmra.mrb[4].mxu0 %v5047_v33  ;;  %2691 = vmatmul.mubr.bf16.gmra.mrb[4].mxu1 %v5054_v34  ;;  %v5123_v33 = vld [vmem:[%s6884_s0 + $0x32c] ss:$100 sps:$4 sm:$0xff]   ;;  %v5126_v34 = vld [vmem:[%s6884_s0 + $0x334] ss:$100 sps:$4 sm:$0xff]  }
  0x2b   :  { %4315 = vmatpush3.bf16.msra.mxu1 %v5046_v32  ;;  %4373 = vmatpush3.bf16.msra.mxu0 %v5049_v35  ;;  %v5118_v32 = vld [vmem:[%s6884_s0 + $0x268] ss:$100 sps:$4 sm:$0xff]   ;;  %v5128_v35 = vld [vmem:[%s6883_s1 + $0x260] sm:$0xff]  }
  0x2c   :  { %4316 = vmatprep.subr.bf16.mxu1 %v5050_v36  ;;  %4374 = vmatprep.subr.bf16.mxu0 %v5055_v37  ;;  %v5130_v36 = vld [vmem:[%s6883_s1 + $0x220] sm:$0xff]   ;;  %v5131_v37 = vld [vmem:[%s6883_s1 + $0x1e8] sm:$0xff]  }
  0x2d   :  { %2666 = vmatprep.mubr.bf16.mxu0 %v5058_v39  ;;  %2698 = vmatprep.mubr.bf16.mxu1 %v3999_v44  ;;  %v5125_v39 = vld [vmem:[%s6884_s0 + $0x328] ss:$100 sps:$4 sm:$0xff]  }
  0x2e   :  { %v5139_v44 = vld [vmem:[%s6883_s1 + $0x228] sm:$0xff]  }
  0x2f   :  { %4317 = vmatpush3.bf16.msra.mxu1 %v5053_v38  ;;  %4375 = vmatpush3.bf16.msra.mxu0 %v5056_v40  ;;  %v5132_v38 = vld [vmem:[%s6883_s1 + $0x1a8] sm:$0xff]   ;;  %v5129_v40 = vld [vmem:[%s6884_s0 + $0x330] ss:$100 sps:$4 sm:$0xff]  }
  0x30   :  { %4318 = vmatprep.subr.bf16.mxu1 %v5057_v41  ;;  %4376 = vmatprep.subr.bf16.mxu0 %v5062_v43  ;;  %v5133_v41 = vld [vmem:[%s6884_s0 + $0x3f4] ss:$100 sps:$4 sm:$0xff]   ;;  %v5137_v43 = vld [vmem:[%s6884_s0 + $0x3fc] ss:$100 sps:$4 sm:$0xff]  }
  0x32   :  { %2667 = vmatmul.mubr.bf16.gmra.mrb[8].mxu0 %v5061_v46  ;;  %2699 = vmatmul.mubr.bf16.gmra.mrb[8].mxu1 %v3998_v48  ;;  %v5142_v46 = vld [vmem:[%s6883_s1 + $0x1b0] sm:$0xff]  }
  0x33   :  { %4319 = vmatpush3.bf16.msra.mxu1 %v5060_v45  ;;  %4377 = vmatpush3.bf16.msra.mxu0 %v5063_v47  ;;  %v5141_v45 = vld [vmem:[%s6883_s1 + $0x1f0] sm:$0xff]   ;;  %v172_v47 = vld [vmem:[%s6884_s0 + $0x4b8] sm:$0x11] }
  0x34   :  { %4320 = vmatprep.subr.bf16.mxu1 %v5064_v49  ;;  %4378 = vmatprep.subr.bf16.mxu0 %v5068_v50  ;;  %v5144_v48 = vld [vmem:[%s6883_s1 + $0x270] sm:$0xff]   ;;  %v5140_v50 = vld [vmem:[%s6884_s0 + $0x3f8] ss:$100 sps:$4 sm:$0xff]  }
  0x35   :  { %2674 = vmatprep.mubr.bf16.mxu0 %v5071_v52  ;;  %2738 = vmatprep.mubr.bf16.mxu1 %v5082_v61  ;;  %v5135_v49 = vld [vmem:[%s6884_s0 + $0x3f0] ss:$100 sps:$4 sm:$0xff]   ;;  %v173_v52 = vld [vmem:[%s6884_s0 + $0x4c0] sm:$0x11]  ;;  %v4000_v61 = vcombine.low %v172_v47, %v172_v47 }
  0x37   :  { %4321 = vmatpush3.bf16.msra.mxu1 %v5066_v51  ;;  %4379 = vmatpush3.bf16.msra.mxu0 %v5069_v53  ;;  %v5146_v51 = vld [vmem:[%s6883_s1 + $0x230] sm:$0xff]   ;;  %v5148_v53 = vld [vmem:[%s6883_s1 + $0x1f8] sm:$0xff]  }
  0x38   :  { %4322 = vmatprep.subr.bf16.mxu1 %v5070_v54  ;;  %4380 = vmatprep.subr.bf16.mxu0 %v5075_v55  ;;  %v5150_v54 = vld [vmem:[%s6883_s1 + $0x1b8] sm:$0xff]   ;;  %v4001_v55 = vcombine.high %v172_v47, %v172_v47 }
  0x39   :  { %v5220_v47 = vld [vmem:[%s6883_s1 + $0x2f8] sm:$0xff]  }
  0x3a   :  { %2675 = vmatmul.mubr.bf16.gmra.mrb[12].mxu0 %v5074_v57  ;;  %v5151_v57 = vld [vmem:[%s6883_s1 + $0x278] sm:$0xff]  }
  0x3b   :  { %4323 = vmatpush3.bf16.msra.mxu1 %v5073_v56  ;;  %4381 = vmatpush3.bf16.msra.mxu0 %v5076_v58  ;;  %v4003_v56 = vcombine.high %v173_v52, %v173_v52  ;;  %v5155_v58 = vld [vmem:[%s6883_s1 + $0x238] sm:$0xff]  }
  0x3c   :  { %4324 = vmatprep.subr.bf16.mxu1 %v5077_v59  ;;  %4382 = vmatprep.subr.bf16.mxu0 %v5079_v60  ;;  %v5156_v59 = vld [vmem:[%s6883_s1 + $0x2c0] sm:$0xff]  }
  0x3d   :  { %2826 = vmatprep.mubr.bf16.mxu0 %v5087_v1  ;;  %v5154_v60 = vld [vmem:[%s6884_s0 + $0x1c] ss:$100 sps:$4 sm:$0xff]  }
  0x3e   :  { %v5152_v1 = vld [vmem:[%s6884_s0 + $0x18] ss:$100 sps:$4 sm:$0xff]  }
  0x3f   :  { %4325 = vmatpush3.bf16.msra.mxu1 %v5078_v62  ;;  %4383 = vmatpush3.bf16.msra.mxu0 %v5083_v63  ;;  %v4002_v62 = vcombine.low %v173_v52, %v173_v52  ;;  %v5161_v63 = vld [vmem:[%s6883_s1 + $0x340] sm:$0xff]  }
  0x40   :  { %4426 = vmatprep.subr.bf16.mxu1 %v5084_v0  ;;  %4484 = vmatprep.subr.bf16.mxu0 %v5089_v5  ;;  %v5159_v0 = vld [vmem:[%s6884_s0 + $0x24] ss:$100 sps:$4 sm:$0xff]  }
  0x41   :  { %v5163_v5 = vld [vmem:[%s6884_s0 + $0xe4] ss:$100 sps:$4 sm:$0xff]  }
  0x42   :  { %2739 = vmatmul.mubr.bf16.vlgmr.msra.gmra.mrb[12].mxu1 %v5080_v2  ;;  %2827 = vmatmul.mubr.bf16.vlgmr.msra.gmra.mrb[16].mxu0 %v5085_v3  ;;  %v5157_v2 = vld [vmem:[%s6884_s0 + $0x20] ss:$100 sps:$4 sm:$0xff]  }
  0x43   :  { %4427 = vmatpush3.bf16.msra.mxu1 %v5088_v4  ;;  %4485 = vmatpush3.bf16.msra.mxu0 %v5090_v6  ;;  %v5160_v3 = vld [vmem:[%s6883_s1 + $0x280] sm:$0xff]   ;;  %v5165_v6 = vld [vmem:[%s6883_s1 + $0x2c8] sm:$0xff]  }
  0x44   :  { %2746 = vmatprep.mubr.bf16.mxu1 %v5091_v7  ;;  %4428 = vmatprep.subr.bf16.mxu1 %v5093_v8  ;;  %v5162_v4 = vld [vmem:[%s6883_s1 + $0x300] sm:$0xff]   ;;  %v5168_v7 = vld [vmem:[%s6884_s0 + $0xec] ss:$100 sps:$4 sm:$0xff]  }
  0x45   :  { %2834 = vmatprep.mubr.bf16.mxu0 %v5096_v10  ;;  %4486 = vmatprep.subr.bf16.mxu0 %v5099_v13  ;;  %v5171_v8 = vld [vmem:[%s6883_s1 + $0x348] sm:$0xff]   ;;  %v5228_v52 = vld [vmem:[%s6883_s1 + $0x3c0] sm:$0xff]  }
  0x46   :  { %v5172_v10 = vld [vmem:[%s6883_s1 + $0x308] sm:$0xff]  }
  0x47   :  { %4429 = vmatpush3.bf16.msra.mxu1 %v5095_v9  ;;  %4487 = vmatpush3.bf16.msra.mxu0 %v5100_v14  ;;  %v5167_v9 = vld [vmem:[%s6883_s1 + $0x288] sm:$0xff]   ;;  %v5181_v14 = vld [vmem:[%s6883_s1 + $0x350] sm:$0xff]  }
  0x48   :  { %4430 = vmatprep.subr.bf16.mxu1 %v5101_v15  ;;  %4488 = vmatprep.subr.bf16.mxu0 %v5109_v19  ;;  %v5170_v13 = vld [vmem:[%s6884_s0 + $0xe8] ss:$100 sps:$4 sm:$0xff]   ;;  %v5183_v19 = vld [vmem:[%s6883_s1 + $0x2d8] sm:$0xff]  }
  0x49   :  { %v5174_v15 = vld [vmem:[%s6884_s0 + $0x1ac] ss:$100 sps:$4 sm:$0xff]  }
  0x4a   :  { %2747 = vmatmul.mubr.bf16.gmra.mrb[16].mxu1 %v5094_v11  ;;  %2835 = vmatmul.mubr.bf16.gmra.mrb[20].mxu0 %v5098_v12  ;;  %v5173_v11 = vld [vmem:[%s6883_s1 + $0x2d0] sm:$0xff]   ;;  %v5166_v12 = vld [vmem:[%s6884_s0 + $0xe0] ss:$100 sps:$4 sm:$0xff]  }
  0x4b   :  { %2754 = vmatprep.mubr.bf16.mxu1 %v5102_v16  ;;  %4431 = vmatpush3.bf16.msra.mxu1 %v5104_v17  ;;  %v5176_v16 = vld [vmem:[%s6883_s1 + $0x290] sm:$0xff]  }
  0x4c   :  { %2842 = vmatprep.mubr.bf16.mxu0 %v5106_v18  ;;  %4489 = vmatpush3.bf16.msra.mxu0 %v5110_v22  ;;  %v5178_v17 = vld [vmem:[%s6884_s0 + $0x1b4] ss:$100 sps:$4 sm:$0xff]  }
  0x4d   :  { %4432 = vmatprep.subr.bf16.mxu1 %v5111_v23  ;;  %4490 = vmatprep.subr.bf16.mxu0 %v5119_v27  ;;  %v5182_v18 = vld [vmem:[%s6883_s1 + $0x310] sm:$0xff]   ;;  %v5192_v22 = vld [vmem:[%s6883_s1 + $0x318] sm:$0xff]   ;;  %v5177_v23 = vld [vmem:[%s6884_s0 + $0x1a8] ss:$100 sps:$4 sm:$0xff]  }
  0x4e   :  { %v5188_v27 = vld [vmem:[%s6884_s0 + $0x27c] ss:$100 sps:$4 sm:$0xff]  }
  0x4f   :  { %4433 = vmatpush3.bf16.msra.mxu1 %v5112_v24  ;;  %v5193_v24 = vld [vmem:[%s6883_s1 + $0x2e0] sm:$0xff]  }
  0x50   :  { %4491 = vmatpush3.bf16.msra.mxu0 %v5120_v28  ;;  %4434 = vmatprep.subr.bf16.mxu1 %v5121_v29  ;;  %v5194_v28 = vld [vmem:[%s6883_s1 + $0x2a0] sm:$0xff]  }
  0x51   :  { %4492 = vmatprep.subr.bf16.mxu0 %v5128_v35  ;;  %v5200_v29 = vld [vmem:[%s6883_s1 + $0x360] sm:$0xff]  }
  0x52   :  { %2755 = vmatmul.mubr.bf16.gmra.mrb[20].mxu1 %v5105_v20  ;;  %2843 = vmatmul.mubr.bf16.gmra.mrb[24].mxu0 %v5108_v21  ;;  %v5184_v20 = vld [vmem:[%s6883_s1 + $0x298] sm:$0xff]  }
  0x53   :  { %2762 = vmatprep.mubr.bf16.mxu1 %v5113_v25  ;;  %2850 = vmatprep.mubr.bf16.mxu0 %v5116_v26  ;;  %v5191_v21 = vld [vmem:[%s6883_s1 + $0x358] sm:$0xff]   ;;  %v5180_v25 = vld [vmem:[%s6884_s0 + $0x1b0] ss:$100 sps:$4 sm:$0xff]  }
  0x54   :  { %4435 = vmatpush3.bf16.msra.mxu1 %v5122_v31  ;;  %4493 = vmatpush3.bf16.msra.mxu0 %v5130_v36  ;;  %v5185_v26 = vld [vmem:[%s6884_s0 + $0x274] ss:$100 sps:$4 sm:$0xff]   ;;  %v5203_v31 = vld [vmem:[%s6883_s1 + $0x2e8] sm:$0xff]   ;;  %v5195_v35 = vld [vmem:[%s6884_s0 + $0x33c] ss:$100 sps:$4 sm:$0xff]  }
  0x55   :  { %4436 = vmatprep.subr.bf16.mxu1 %v5131_v37  ;;  %4494 = vmatprep.subr.bf16.mxu0 %v5136_v42  ;;  %v5208_v36 = vld [vmem:[%s6883_s1 + $0x368] sm:$0xff]   ;;  %v5201_v42 = vld [vmem:[%s6884_s0 + $0x340] ss:$100 sps:$4 sm:$0xff]  }
  0x56   :  { %v5198_v37 = vld [vmem:[%s6884_s0 + $0x344] ss:$100 sps:$4 sm:$0xff]  }
  0x58   :  { %4437 = vmatpush3.bf16.msra.mxu1 %v5132_v38  ;;  %4495 = vmatpush3.bf16.msra.mxu0 %v5139_v44  ;;  %v5211_v38 = vld [vmem:[%s6883_s1 + $0x328] sm:$0xff]  }
  0x59   :  { %4438 = vmatprep.subr.bf16.mxu1 %v5141_v45  ;;  %4496 = vmatprep.subr.bf16.mxu0 %v5144_v48  ;;  %v5205_v44 = vld [vmem:[%s6884_s0 + $0x404] ss:$100 sps:$4 sm:$0xff]   ;;  %v5209_v45 = vld [vmem:[%s6884_s0 + $0x40c] ss:$100 sps:$4 sm:$0xff]   ;;  %v5222_v48 = vld [vmem:[%s6883_s1 + $0x2b8] sm:$0xff]  }
  0x5a   :  { %2763 = vmatmul.mubr.bf16.gmra.mrb[24].mxu1 %v5115_v30  ;;  %2851 = vmatmul.mubr.bf16.gmra.mrb[28].mxu0 %v5118_v32  ;;  %v5202_v30 = vld [vmem:[%s6883_s1 + $0x320] sm:$0xff]   ;;  %v5187_v32 = vld [vmem:[%s6884_s0 + $0x270] ss:$100 sps:$4 sm:$0xff]  }
  0x5b   :  { %2770 = vmatprep.mubr.bf16.mxu1 %v5123_v33  ;;  %2858 = vmatprep.mubr.bf16.mxu0 %v5126_v34  ;;  %v5204_v33 = vld [vmem:[%s6883_s1 + $0x2a8] sm:$0xff]   ;;  %v5190_v34 = vld [vmem:[%s6884_s0 + $0x278] ss:$100 sps:$4 sm:$0xff]  }
  0x5c   :  { %4439 = vmatpush3.bf16.msra.mxu1 %v5142_v46  ;;  %4497 = vmatpush3.bf16.msra.mxu0 %v5146_v51  ;;  %v5218_v46 = vld [vmem:[%s6883_s1 + $0x330] sm:$0xff]   ;;  %v5227_v51 = vld [vmem:[%s6883_s1 + $0x338] sm:$0xff]  }
  0x5d   :  { %4440 = vmatprep.subr.bf16.mxu1 %v5148_v53  ;;  %4498 = vmatprep.subr.bf16.mxu0 %v5151_v57  ;;  %v175_v53 = vld [vmem:[%s6884_s0 + $0x4d0] sm:$0x11] }
  0x5e   :  { %v4007_v57 = vcombine.high %v175_v53, %v175_v53 }
  0x60   :  { %4441 = vmatpush3.bf16.msra.mxu1 %v5150_v54  ;;  %4499 = vmatpush3.bf16.msra.mxu0 %v5155_v58  ;;  %v5207_v54 = vld [vmem:[%s6884_s0 + $0x400] ss:$100 sps:$4 sm:$0xff]  }
  0x61   :  { %4542 = vmatprep.subr.bf16.mxu1 %v5156_v59  ;;  %4600 = vmatprep.subr.bf16.mxu0 %v5161_v63  ;;  %v5233_v58 = vld [vmem:[%s6883_s1 + $0x440] sm:$0xff]   ;;  %v5224_v63 = vld [vmem:[%s6884_s0 + $0x28] ss:$100 sps:$4 sm:$0xff]  }
  0x62   :  { %2771 = vmatmul.mubr.bf16.gmra.mrb[28].mxu1 %v5125_v39  ;;  %2859 = vmatmul.mubr.bf16.gmra.mrb[32].mxu0 %v5129_v40  ;;  %v5213_v39 = vld [vmem:[%s6883_s1 + $0x2f0] sm:$0xff]  }
  0x63   :  { %2778 = vmatprep.mubr.bf16.mxu1 %v5133_v41  ;;  %2866 = vmatprep.mubr.bf16.mxu0 %v5137_v43  ;;  %v5214_v40 = vld [vmem:[%s6883_s1 + $0x2b0] sm:$0xff]   ;;  %v5197_v41 = vld [vmem:[%s6884_s0 + $0x338] ss:$100 sps:$4 sm:$0xff]  }
  0x64   :  { %v5216_v43 = vld [vmem:[%s6883_s1 + $0x370] sm:$0xff]  }
  0x6a   :  { %2779 = vmatmul.mubr.bf16.gmra.mrb[32].mxu1 %v5135_v49  ;;  %2867 = vmatmul.mubr.bf16.gmra.mrb[36].mxu0 %v5140_v50  ;;  %v5223_v49 = vld [vmem:[%s6883_s1 + $0x378] sm:$0xff]   ;;  %v174_v50 = vld [vmem:[%s6884_s0 + $0x4c8] sm:$0x11] }
  0x6b   :  { %2786 = vmatprep.mubr.bf16.mxu1 %v4001_v55  ;;  %2874 = vmatprep.mubr.bf16.mxu0 %v4003_v56  ;;  %v5212_v55 = vld [vmem:[%s6884_s0 + $0x408] ss:$100 sps:$4 sm:$0xff]   ;;  %v4005_v56 = vcombine.high %v174_v50, %v174_v50  ;;  %v4004_v59 = vcombine.low %v174_v50, %v174_v50  ;;  %v5305_v50 = vld [vmem:[%s6883_s1 + $0x540] sm:$0xff]  }
  0x72   :  { %2787 = vmatmul.mubr.bf16.gmra.mrb[36].mxu1 %v4000_v61  ;;  %2875 = vmatmul.mubr.bf16.gmra.mrb[40].mxu0 %v4002_v62  ;;  %v5226_v61 = vld [vmem:[%s6884_s0 + $0x2c] ss:$100 sps:$4 sm:$0xff]   ;;  %v5231_v62 = vld [vmem:[%s6884_s0 + $0x34] ss:$100 sps:$4 sm:$0xff]  }
  0x73   :  { %2914 = vmatprep.mubr.bf16.mxu1 %v5154_v60  ;;  %3002 = vmatprep.mubr.bf16.mxu0 %v5159_v0  ;;  %v4006_v60 = vcombine.low %v175_v53, %v175_v53  ;;  %v5229_v0 = vld [vmem:[%s6884_s0 + $0x30] ss:$100 sps:$4 sm:$0xff]  }
  0x74   :  { %v5279_v53 = vld [vmem:[%s6884_s0 + $0x410] ss:$100 sps:$4 sm:$0xff]  }
  0x7a   :  { %2915 = vmatmul.mubr.bf16.vlgmr.msra.gmra.mrb[40].mxu1 %v5152_v1  ;;  %3003 = vmatmul.mubr.bf16.vlgmr.msra.gmra.mrb[44].mxu0 %v5157_v2  ;;  %v5232_v1 = vld [vmem:[%s6883_s1 + $0x380] sm:$0xff]  }
  0x7b   :  { %4543 = vmatpush3.bf16.msra.mxu1 %v5160_v3  ;;  %4601 = vmatpush3.bf16.msra.mxu0 %v5162_v4  ;;  %v5234_v2 = vld [vmem:[%s6883_s1 + $0x400] sm:$0xff]   ;;  %v5235_v3 = vld [vmem:[%s6884_s0 + $0xf4] ss:$100 sps:$4 sm:$0xff]   ;;  %v5237_v4 = vld [vmem:[%s6883_s1 + $0x3c8] sm:$0xff]  }
  0x7c   :  { %2922 = vmatprep.mubr.bf16.mxu1 %v5163_v5  ;;  %4544 = vmatprep.subr.bf16.mxu1 %v5165_v6  ;;  %v5240_v5 = vld [vmem:[%s6884_s0 + $0xfc] ss:$100 sps:$4 sm:$0xff]   ;;  %v5239_v6 = vld [vmem:[%s6883_s1 + $0x388] sm:$0xff]  }
  0x7d   :  { %3010 = vmatprep.mubr.bf16.mxu0 %v5168_v7  ;;  %4602 = vmatprep.subr.bf16.mxu0 %v5171_v8  ;;  %v5243_v7 = vld [vmem:[%s6883_s1 + $0x448] sm:$0xff]  }
  0x7e   :  { %v5244_v8 = vld [vmem:[%s6883_s1 + $0x408] sm:$0xff]  }
  0x7f   :  { %4545 = vmatpush3.bf16.msra.mxu1 %v5167_v9  ;;  %4603 = vmatpush3.bf16.msra.mxu0 %v5172_v10  ;;  %v5245_v9 = vld [vmem:[%s6883_s1 + $0x3d0] sm:$0xff]  }
  0x80   :  { %4546 = vmatprep.subr.bf16.mxu1 %v5173_v11  ;;  %4604 = vmatprep.subr.bf16.mxu0 %v5181_v14  ;;  %v5238_v10 = vld [vmem:[%s6884_s0 + $0xf0] ss:$100 sps:$4 sm:$0xff]  }
  0x81   :  { %v5253_v11 = vld [vmem:[%s6883_s1 + $0x450] sm:$0xff]  }
  0x82   :  { %2923 = vmatmul.mubr.bf16.gmra.mrb[44].mxu1 %v5166_v12  ;;  %3011 = vmatmul.mubr.bf16.gmra.mrb[48].mxu0 %v5170_v13  ;;  %v5242_v12 = vld [vmem:[%s6884_s0 + $0xf8] ss:$100 sps:$4 sm:$0xff]   ;;  %v5248_v14 = vld [vmem:[%s6883_s1 + $0x390] sm:$0xff]  }
  0x83   :  { %2930 = vmatprep.mubr.bf16.mxu1 %v5174_v15  ;;  %4547 = vmatpush3.bf16.msra.mxu1 %v5176_v16  ;;  %v5246_v13 = vld [vmem:[%s6884_s0 + $0x1bc] ss:$100 sps:$4 sm:$0xff]   ;;  %v5250_v15 = vld [vmem:[%s6884_s0 + $0x1c4] ss:$100 sps:$4 sm:$0xff]   ;;  %v5254_v16 = vld [vmem:[%s6883_s1 + $0x410] sm:$0xff]  }
  0x84   :  { %3018 = vmatprep.mubr.bf16.mxu0 %v5178_v17  ;;  %4605 = vmatpush3.bf16.msra.mxu0 %v5182_v18  ;;  %v5255_v17 = vld [vmem:[%s6883_s1 + $0x3d8] sm:$0xff]  }
  0x85   :  { %4548 = vmatprep.subr.bf16.mxu1 %v5183_v19  ;;  %4606 = vmatprep.subr.bf16.mxu0 %v5191_v21  ;;  %v5263_v18 = vld [vmem:[%s6883_s1 + $0x458] sm:$0xff]  }
  0x86   :  { %v5256_v19 = vld [vmem:[%s6883_s1 + $0x398] sm:$0xff]  }
  0x87   :  { %4549 = vmatpush3.bf16.msra.mxu1 %v5184_v20  ;;  %v5264_v20 = vld [vmem:[%s6883_s1 + $0x418] sm:$0xff]  }
  0x88   :  { %4607 = vmatpush3.bf16.msra.mxu0 %v5192_v22  ;;  %4550 = vmatprep.subr.bf16.mxu1 %v5193_v24  ;;  %v5249_v21 = vld [vmem:[%s6884_s0 + $0x1b8] ss:$100 sps:$4 sm:$0xff]   ;;  %v5252_v22 = vld [vmem:[%s6884_s0 + $0x1c0] ss:$100 sps:$4 sm:$0xff]  }
  0x89   :  { %4608 = vmatprep.subr.bf16.mxu0 %v5200_v29  ;;  %v5257_v24 = vld [vmem:[%s6884_s0 + $0x284] ss:$100 sps:$4 sm:$0xff]  }
  0x8a   :  { %2931 = vmatmul.mubr.bf16.gmra.mrb[48].mxu1 %v5177_v23  ;;  %3019 = vmatmul.mubr.bf16.gmra.mrb[52].mxu0 %v5180_v25  ;;  %v5265_v23 = vld [vmem:[%s6883_s1 + $0x3e0] sm:$0xff]   ;;  %v5275_v29 = vld [vmem:[%s6883_s1 + $0x3e8] sm:$0xff]  }
  0x8b   :  { %2938 = vmatprep.mubr.bf16.mxu1 %v5185_v26  ;;  %3026 = vmatprep.mubr.bf16.mxu0 %v5188_v27  ;;  %v5272_v25 = vld [vmem:[%s6883_s1 + $0x460] sm:$0xff]   ;;  %v5260_v26 = vld [vmem:[%s6884_s0 + $0x28c] ss:$100 sps:$4 sm:$0xff]  }
  0x8c   :  { %4551 = vmatpush3.bf16.msra.mxu1 %v5194_v28  ;;  %4609 = vmatpush3.bf16.msra.mxu0 %v5202_v30  ;;  %v5266_v27 = vld [vmem:[%s6883_s1 + $0x3a0] sm:$0xff]   ;;  %v5280_v30 = vld [vmem:[%s6883_s1 + $0x468] sm:$0xff]  }
  0x8d   :  { %4552 = vmatprep.subr.bf16.mxu1 %v5203_v31  ;;  %4610 = vmatprep.subr.bf16.mxu0 %v5208_v36  ;;  %v5274_v28 = vld [vmem:[%s6883_s1 + $0x420] sm:$0xff]   ;;  %v5276_v31 = vld [vmem:[%s6883_s1 + $0x3a8] sm:$0xff]  }
  0x8e   :  { %v5267_v36 = vld [vmem:[%s6884_s0 + $0x34c] ss:$100 sps:$4 sm:$0xff]  }
  0x90   :  { %4553 = vmatpush3.bf16.msra.mxu1 %v5204_v33  ;;  %4611 = vmatpush3.bf16.msra.mxu0 %v5211_v38  ;;  %v5259_v33 = vld [vmem:[%s6884_s0 + $0x280] ss:$100 sps:$4 sm:$0xff]   ;;  %v5288_v38 = vld [vmem:[%s6883_s1 + $0x470] sm:$0xff]  }
  0x91   :  { %4554 = vmatprep.subr.bf16.mxu1 %v5213_v39  ;;  %4612 = vmatprep.subr.bf16.mxu0 %v5216_v43  ;;  %v5286_v39 = vld [vmem:[%s6883_s1 + $0x3b0] sm:$0xff]   ;;  %v5294_v43 = vld [vmem:[%s6883_s1 + $0x3b8] sm:$0xff]  }
  0x92   :  { %2939 = vmatmul.mubr.bf16.gmra.mrb[52].mxu1 %v5187_v32  ;;  %3027 = vmatmul.mubr.bf16.gmra.mrb[56].mxu0 %v5190_v34  ;;  %v5283_v32 = vld [vmem:[%s6883_s1 + $0x428] sm:$0xff]  }
  0x93   :  { %2946 = vmatprep.mubr.bf16.mxu1 %v5195_v35  ;;  %3034 = vmatprep.mubr.bf16.mxu0 %v5198_v37  ;;  %v5262_v34 = vld [vmem:[%s6884_s0 + $0x288] ss:$100 sps:$4 sm:$0xff]   ;;  %v5285_v35 = vld [vmem:[%s6883_s1 + $0x3f0] sm:$0xff]  }
  0x94   :  { %4555 = vmatpush3.bf16.msra.mxu1 %v5214_v40  ;;  %4613 = vmatpush3.bf16.msra.mxu0 %v5218_v46  ;;  %v5270_v37 = vld [vmem:[%s6884_s0 + $0x354] ss:$100 sps:$4 sm:$0xff]  }
  0x95   :  { %4556 = vmatprep.subr.bf16.mxu1 %v5220_v47  ;;  %4614 = vmatprep.subr.bf16.mxu0 %v5223_v49  ;;  %v5290_v40 = vld [vmem:[%s6883_s1 + $0x430] sm:$0xff]   ;;  %v5299_v46 = vld [vmem:[%s6883_s1 + $0x438] sm:$0xff]  }
  0x96   :  { %v5277_v47 = vld [vmem:[%s6884_s0 + $0x414] ss:$100 sps:$4 sm:$0xff]   ;;  %v5281_v49 = vld [vmem:[%s6884_s0 + $0x41c] ss:$100 sps:$4 sm:$0xff]  }
  0x98   :  { %4557 = vmatpush3.bf16.msra.mxu1 %v5222_v48  ;;  %4615 = vmatpush3.bf16.msra.mxu0 %v5227_v51  ;;  %v5300_v48 = vld [vmem:[%s6883_s1 + $0x4c0] sm:$0xff]   ;;  %v176_v51 = vld [vmem:[%s6884_s0 + $0x4d8] sm:$0x11] }
  0x99   :  { %4658 = vmatprep.subr.bf16.mxu1 %v5228_v52  ;;  %4716 = vmatprep.subr.bf16.mxu0 %v5233_v58  ;;  %v177_v52 = vld [vmem:[%s6884_s0 + $0x4e0] sm:$0x11] }
  0x9a   :  { %2947 = vmatmul.mubr.bf16.gmra.mrb[56].mxu1 %v5197_v41  ;;  %3035 = vmatmul.mubr.bf16.gmra.mrb[60].mxu0 %v5201_v42  ;;  %v5292_v41 = vld [vmem:[%s6883_s1 + $0x3f8] sm:$0xff]   ;;  %v4010_v58 = vcombine.low %v177_v52, %v177_v52 }
  0x9b   :  { %2954 = vmatprep.mubr.bf16.mxu1 %v5205_v44  ;;  %3042 = vmatprep.mubr.bf16.mxu0 %v5209_v45  ;;  %v5295_v42 = vld [vmem:[%s6883_s1 + $0x478] sm:$0xff]   ;;  %v5269_v44 = vld [vmem:[%s6884_s0 + $0x348] ss:$100 sps:$4 sm:$0xff]   ;;  %v5273_v45 = vld [vmem:[%s6884_s0 + $0x350] ss:$100 sps:$4 sm:$0xff]  }
  0xa2   :  { %2955 = vmatmul.mubr.bf16.gmra.mrb[60].mxu1 %v5207_v54  ;;  %3043 = vmatmul.mubr.bf16.gmra.mrb[64].mxu0 %v5212_v55  ;;  %v5284_v54 = vld [vmem:[%s6884_s0 + $0x418] ss:$100 sps:$4 sm:$0xff]   ;;  %v4009_v55 = vcombine.high %v176_v51, %v176_v51 }
  0xa3   :  { %2962 = vmatprep.mubr.bf16.mxu1 %v4005_v56  ;;  %3050 = vmatprep.mubr.bf16.mxu0 %v4007_v57  ;;  %v4011_v56 = vcombine.high %v177_v52, %v177_v52  ;;  %v4008_v57 = vcombine.low %v176_v51, %v176_v51 }
  0xaa   :  { %2963 = vmatmul.mubr.bf16.gmra.mrb[64].mxu1 %v4004_v59  ;;  %3051 = vmatmul.mubr.bf16.gmra.mrb[68].mxu0 %v4006_v60  ;;  %v5298_v59 = vld [vmem:[%s6884_s0 + $0x3c] ss:$100 sps:$4 sm:$0xff]   ;;  %v5303_v60 = vld [vmem:[%s6884_s0 + $0x44] ss:$100 sps:$4 sm:$0xff]  }
  0xab   :  { %3090 = vmatprep.mubr.bf16.mxu1 %v5226_v61  ;;  %3178 = vmatprep.mubr.bf16.mxu0 %v5231_v62  ;;  %v5296_v61 = vld [vmem:[%s6884_s0 + $0x38] ss:$100 sps:$4 sm:$0xff]   ;;  %v5301_v62 = vld [vmem:[%s6884_s0 + $0x40] ss:$100 sps:$4 sm:$0xff]  }
  0xb2   :  { %3091 = vmatmul.mubr.bf16.vlgmr.msra.gmra.mrb[68].mxu1 %v5224_v63  ;;  %3179 = vmatmul.mubr.bf16.vlgmr.msra.gmra.mrb[72].mxu0 %v5229_v0  ;;  %v5304_v63 = vld [vmem:[%s6883_s1 + $0x480] sm:$0xff]  }
  0xb3   :  { %4659 = vmatpush3.bf16.msra.mxu1 %v5232_v1  ;;  %4717 = vmatpush3.bf16.msra.mxu0 %v5234_v2  ;;  %v5306_v0 = vld [vmem:[%s6883_s1 + $0x500] sm:$0xff]   ;;  %v5309_v2 = vld [vmem:[%s6883_s1 + $0x4c8] sm:$0xff]  }
  0xb4   :  { %3098 = vmatprep.mubr.bf16.mxu1 %v5235_v3  ;;  %4660 = vmatprep.subr.bf16.mxu1 %v5237_v4  ;;  %v5307_v1 = vld [vmem:[%s6884_s0 + $0x104] ss:$100 sps:$4 sm:$0xff]   ;;  %v5312_v3 = vld [vmem:[%s6884_s0 + $0x10c] ss:$100 sps:$4 sm:$0xff]  }
  0xb5   :  { %3186 = vmatprep.mubr.bf16.mxu0 %v5240_v5  ;;  %4718 = vmatprep.subr.bf16.mxu0 %v5243_v7  ;;  %v5315_v4 = vld [vmem:[%s6883_s1 + $0x548] sm:$0xff]   ;;  %v5317_v7 = vld [vmem:[%s6883_s1 + $0x4d0] sm:$0xff]  }
  0xb6   :  { %v5311_v5 = vld [vmem:[%s6883_s1 + $0x488] sm:$0xff]  }
  0xb7   :  { %4661 = vmatpush3.bf16.msra.mxu1 %v5239_v6  ;;  %4719 = vmatpush3.bf16.msra.mxu0 %v5244_v8  ;;  %v5316_v6 = vld [vmem:[%s6883_s1 + $0x508] sm:$0xff]   ;;  %v5310_v8 = vld [vmem:[%s6884_s0 + $0x100] ss:$100 sps:$4 sm:$0xff]  }
  0xb8   :  { %4662 = vmatprep.subr.bf16.mxu1 %v5245_v9  ;;  %4720 = vmatprep.subr.bf16.mxu0 %v5253_v11  ;;  %v5314_v9 = vld [vmem:[%s6884_s0 + $0x108] ss:$100 sps:$4 sm:$0xff]  }
  0xb9   :  { %v5318_v11 = vld [vmem:[%s6884_s0 + $0x1cc] ss:$100 sps:$4 sm:$0xff]  }
  0xba   :  { %3099 = vmatmul.mubr.bf16.gmra.mrb[72].mxu1 %v5238_v10  ;;  %3187 = vmatmul.mubr.bf16.gmra.mrb[76].mxu0 %v5242_v12  ;;  %v5325_v10 = vld [vmem:[%s6883_s1 + $0x550] sm:$0xff]  }
  0xbb   :  { %3106 = vmatprep.mubr.bf16.mxu1 %v5246_v13  ;;  %4663 = vmatpush3.bf16.msra.mxu1 %v5248_v14  ;;  %v5320_v12 = vld [vmem:[%s6883_s1 + $0x490] sm:$0xff]  }
  0xbc   :  { %3194 = vmatprep.mubr.bf16.mxu0 %v5250_v15  ;;  %4721 = vmatpush3.bf16.msra.mxu0 %v5254_v16  ;;  %v5322_v13 = vld [vmem:[%s6884_s0 + $0x1d4] ss:$100 sps:$4 sm:$0xff]  }
  0xbd   :  { %4664 = vmatprep.subr.bf16.mxu1 %v5255_v17  ;;  %4722 = vmatprep.subr.bf16.mxu0 %v5263_v18  ;;  %v5326_v14 = vld [vmem:[%s6883_s1 + $0x510] sm:$0xff]   ;;  %v5327_v15 = vld [vmem:[%s6883_s1 + $0x4d8] sm:$0xff]  }
  0xbe   :  { %v5335_v16 = vld [vmem:[%s6883_s1 + $0x558] sm:$0xff]  }
  0xbf   :  { %4665 = vmatpush3.bf16.msra.mxu1 %v5256_v19  ;;  %v5328_v17 = vld [vmem:[%s6883_s1 + $0x498] sm:$0xff]   ;;  %v5321_v19 = vld [vmem:[%s6884_s0 + $0x1c8] ss:$100 sps:$4 sm:$0xff]  }
  0xc0   :  { %4723 = vmatpush3.bf16.msra.mxu0 %v5264_v20  ;;  %4666 = vmatprep.subr.bf16.mxu1 %v5265_v23  ;;  %v5336_v18 = vld [vmem:[%s6883_s1 + $0x518] sm:$0xff]   ;;  %v5324_v20 = vld [vmem:[%s6884_s0 + $0x1d0] ss:$100 sps:$4 sm:$0xff]  }
  0xc1   :  { %4724 = vmatprep.subr.bf16.mxu0 %v5272_v25  ;;  %v5329_v25 = vld [vmem:[%s6884_s0 + $0x294] ss:$100 sps:$4 sm:$0xff]  }
  0xc2   :  { %3107 = vmatmul.mubr.bf16.gmra.mrb[76].mxu1 %v5249_v21  ;;  %3195 = vmatmul.mubr.bf16.gmra.mrb[80].mxu0 %v5252_v22  ;;  %v5337_v21 = vld [vmem:[%s6883_s1 + $0x4e0] sm:$0xff]  }
  0xc3   :  { %3114 = vmatprep.mubr.bf16.mxu1 %v5257_v24  ;;  %3202 = vmatprep.mubr.bf16.mxu0 %v5260_v26  ;;  %v5344_v22 = vld [vmem:[%s6883_s1 + $0x560] sm:$0xff]  }
  0xc4   :  { %4667 = vmatpush3.bf16.msra.mxu1 %v5266_v27  ;;  %4725 = vmatpush3.bf16.msra.mxu0 %v5274_v28  ;;  %v5332_v26 = vld [vmem:[%s6884_s0 + $0x29c] ss:$100 sps:$4 sm:$0xff]  }
  0xc5   :  { %4668 = vmatprep.subr.bf16.mxu1 %v5275_v29  ;;  %4726 = vmatprep.subr.bf16.mxu0 %v5280_v30  ;;  %v5338_v29 = vld [vmem:[%s6883_s1 + $0x4a0] sm:$0xff]  }
  0xc8   :  { %4669 = vmatpush3.bf16.msra.mxu1 %v5276_v31  ;;  %4727 = vmatpush3.bf16.msra.mxu0 %v5283_v32 }
  0xc9   :  { %4670 = vmatprep.subr.bf16.mxu1 %v5285_v35  ;;  %4728 = vmatprep.subr.bf16.mxu0 %v5288_v38  ;;  %v5347_v35 = vld [vmem:[%s6883_s1 + $0x4e8] sm:$0xff]  }
  0xca   :  { %3115 = vmatmul.mubr.bf16.gmra.mrb[80].mxu1 %v5259_v33  ;;  %3203 = vmatmul.mubr.bf16.gmra.mrb[84].mxu0 %v5262_v34  ;;  %v5346_v34 = vld [vmem:[%s6883_s1 + $0x520] sm:$0xff]  }
  0xcb   :  { %3122 = vmatprep.mubr.bf16.mxu1 %v5267_v36  ;;  %3210 = vmatprep.mubr.bf16.mxu0 %v5270_v37 }
  0xcc   :  { %4671 = vmatpush3.bf16.msra.mxu1 %v5286_v39  ;;  %4729 = vmatpush3.bf16.msra.mxu0 %v5290_v40  ;;  %v5352_v40 = vld [vmem:[%s6883_s1 + $0x568] sm:$0xff]  }
  0xcd   :  { %4672 = vmatprep.subr.bf16.mxu1 %v5292_v41  ;;  %4730 = vmatprep.subr.bf16.mxu0 %v5295_v42  ;;  %v5331_v41 = vld [vmem:[%s6884_s0 + $0x290] ss:$100 sps:$4 sm:$0xff]   ;;  %v5334_v42 = vld [vmem:[%s6884_s0 + $0x298] ss:$100 sps:$4 sm:$0xff]  }
  0xd0   :  { %4673 = vmatpush3.bf16.msra.mxu1 %v5294_v43  ;;  %4731 = vmatpush3.bf16.msra.mxu0 %v5299_v46  ;;  %v5348_v43 = vld [vmem:[%s6883_s1 + $0x4a8] sm:$0xff]  }
  0xd1   :  { %4774 = vmatprep.subr.bf16.mxu1 %v5300_v48  ;;  %4832 = vmatprep.subr.bf16.mxu0 %v5305_v50  ;;  %v5342_v48 = vld [vmem:[%s6884_s0 + $0x364] ss:$100 sps:$4 sm:$0xff]  }
  0xd2   :  { %3123 = vmatmul.mubr.bf16.gmra.mrb[84].mxu1 %v5269_v44  ;;  %3211 = vmatmul.mubr.bf16.gmra.mrb[88].mxu0 %v5273_v45  ;;  %v5355_v44 = vld [vmem:[%s6883_s1 + $0x528] sm:$0xff]  }
  0xd3   :  { %3130 = vmatprep.mubr.bf16.mxu1 %v5277_v47  ;;  %3218 = vmatprep.mubr.bf16.mxu0 %v5281_v49  ;;  %v5339_v47 = vld [vmem:[%s6884_s0 + $0x35c] ss:$100 sps:$4 sm:$0xff]   ;;  %v5357_v49 = vld [vmem:[%s6883_s1 + $0x4f0] sm:$0xff]  }
  0xda   :  { %3131 = vmatmul.mubr.bf16.gmra.mrb[88].mxu1 %v5279_v53  ;;  %3219 = vmatmul.mubr.bf16.gmra.mrb[92].mxu0 %v5284_v54 }
  0xdb   :  { %3138 = vmatprep.mubr.bf16.mxu1 %v4009_v55  ;;  %3226 = vmatprep.mubr.bf16.mxu0 %v4011_v56  ;;  %v5358_v56 = vld [vmem:[%s6883_s1 + $0x4b0] sm:$0xff]  }
  0xe2   :  { %3139 = vmatmul.mubr.bf16.gmra.mrb[92].mxu1 %v4008_v57  ;;  %3227 = vmatmul.mubr.bf16.gmra.mrb[96].mxu0 %v4010_v58 }
  0xe3   :  { %3266 = vmatprep.mubr.bf16.mxu1 %v5298_v59  ;;  %3354 = vmatprep.mubr.bf16.mxu0 %v5303_v60  ;;  %v5360_v59 = vld [vmem:[%s6883_s1 + $0x570] sm:$0xff]  }
  0xe4   :  { %v5362_v60 = vld [vmem:[%s6883_s1 + $0x530] sm:$0xff]  }
  0xea   :  { %3267 = vmatmul.mubr.bf16.vlgmr.msra.gmra.mrb[96].mxu1 %v5296_v61  ;;  %3355 = vmatmul.mubr.bf16.vlgmr.msra.gmra.mrb[100].mxu0 %v5301_v62 }
  0xeb   :  { %4775 = vmatpush3.bf16.msra.mxu1 %v5304_v63  ;;  %4833 = vmatpush3.bf16.msra.mxu0 %v5306_v0  ;;  %v5364_v63 = vld [vmem:[%s6883_s1 + $0x4f8] sm:$0xff]  }
  0xec   :  { %3274 = vmatprep.mubr.bf16.mxu1 %v5307_v1  ;;  %4776 = vmatprep.subr.bf16.mxu1 %v5309_v2  ;;  %v5367_v0 = vld [vmem:[%s6883_s1 + $0x578] sm:$0xff]  }
  0xed   :  { %3362 = vmatprep.mubr.bf16.mxu0 %v5312_v3  ;;  %4834 = vmatprep.subr.bf16.mxu0 %v5315_v4  ;;  %v5366_v1 = vld [vmem:[%s6883_s1 + $0x4b8] sm:$0xff]   ;;  %v5372_v4 = vld [vmem:[%s6883_s1 + $0x5c0] sm:$0xff]  }
  0xee   :  { %v5341_v2 = vld [vmem:[%s6884_s0 + $0x358] ss:$100 sps:$4 sm:$0xff]  }
  0xef   :  { %4777 = vmatpush3.bf16.msra.mxu1 %v5311_v5  ;;  %4835 = vmatpush3.bf16.msra.mxu0 %v5316_v6  ;;  %v5371_v3 = vld [vmem:[%s6883_s1 + $0x538] sm:$0xff]  }
  0xf0   :  { %4778 = vmatprep.subr.bf16.mxu1 %v5317_v7  ;;  %4836 = vmatprep.subr.bf16.mxu0 %v5325_v10 }
  0xf2   :  { %3275 = vmatmul.mubr.bf16.gmra.mrb[100].mxu1 %v5310_v8  ;;  %3363 = vmatmul.mubr.bf16.gmra.mrb[104].mxu0 %v5314_v9  ;;  %v5345_v9 = vld [vmem:[%s6884_s0 + $0x360] ss:$100 sps:$4 sm:$0xff]  }
  0xf3   :  { %3282 = vmatprep.mubr.bf16.mxu1 %v5318_v11  ;;  %4779 = vmatpush3.bf16.msra.mxu1 %v5320_v12 }
  0xf4   :  { %3370 = vmatprep.mubr.bf16.mxu0 %v5322_v13  ;;  %4837 = vmatpush3.bf16.msra.mxu0 %v5326_v14  ;;  %v5349_v14 = vld [vmem:[%s6884_s0 + $0x424] ss:$100 sps:$4 sm:$0xff]  }
  0xf5   :  { %v4292_v23 = vpop.f32.mrb[0].mxu1  ;;  %v4268_v24 = vpop.f32.mrb[0].mxu0  ;;  %4780 = vmatprep.subr.bf16.mxu1 %v5327_v15  ;;  %4838 = vmatprep.subr.bf16.mxu0 %v5335_v16  ;;  %v5353_v15 = vld [vmem:[%s6884_s0 + $0x42c] ss:$100 sps:$4 sm:$0xff]  }
  0xf6   :  { %v4293_v27 = vpop.f32.mrb[1].mxu1  ;;  %v4269_v28 = vpop.f32.mrb[1].mxu0 }
  0xf7   :  { %v6282_v30 = vadd.f32 %v4293_v27, %v4292_v23  ;;  %v4295_v31 = vpop.f32.mrb[2].mxu1  ;;  %v6284_v32 = vadd.f32 %v4269_v28, %v4268_v24  ;;  %v4271_v33 = vpop.f32.mrb[2].mxu0  ;;  %4781 = vmatpush3.bf16.msra.mxu1 %v5328_v17  ;;  %v5456_v23 = vmov 0.0  }
  0xf8   :  { %v4296_v36 = vpop.f32.mrb[3].mxu1  ;;  %v4272_v37 = vpop.f32.mrb[3].mxu0  ;;  %4839 = vmatpush3.bf16.msra.mxu0 %v5336_v18  ;;  %4782 = vmatprep.subr.bf16.mxu1 %v5337_v21  ;;  %v178_v21 = vld [vmem:[%s6884_s0 + $0x4e8] sm:$0x11] }
  0xf9   :  { %v6292_v38 = vadd.f32 %v4296_v36, %v4295_v31  ;;  %v6294_v39 = vadd.f32 %v4272_v37, %v4271_v33  ;;  %4840 = vmatprep.subr.bf16.mxu0 %v5344_v22  ;;  %v179_v22 = vld [vmem:[%s6884_s0 + $0x4f0] sm:$0x11]  ;;  %v4013_v28 = vcombine.high %v178_v21, %v178_v21  ;;  %v6390_v36 = vld [vmem:[%s6885_s2] ss:$0 sm:$0xff] }
  0xfa   :  { %3283 = vmatmul.mubr.bf16.gmra.mrb[104].mxu1 %v5321_v19  ;;  %3371 = vmatmul.mubr.bf16.gmra.mrb[108].mxu0 %v5324_v20  ;;  %v5351_v19 = vld [vmem:[%s6884_s0 + $0x420] ss:$100 sps:$4 sm:$0xff]   ;;  %v5356_v20 = vld [vmem:[%s6884_s0 + $0x428] ss:$100 sps:$4 sm:$0xff]  }
  0xfb   :  { %3290 = vmatprep.mubr.bf16.mxu1 %v5329_v25  ;;  %3378 = vmatprep.mubr.bf16.mxu0 %v5332_v26 }
  0xfc   :  { %4783 = vmatpush3.bf16.msra.mxu1 %v5338_v29  ;;  %4841 = vmatpush3.bf16.msra.mxu0 %v5346_v34  ;;  %v4015_v29 = vcombine.high %v179_v22, %v179_v22 }
  0xfd   :  { %v4274_v45 = vpop.f32.mrb[4].mxu0  ;;  %v4298_v46 = vpop.f32.mrb[4].mxu1  ;;  %4784 = vmatprep.subr.bf16.mxu1 %v5347_v35  ;;  %4842 = vmatprep.subr.bf16.mxu0 %v5352_v40 }
  0xfe   :  { %v4275_v50 = vpop.f32.mrb[5].mxu0  ;;  %v4299_v51 = vpop.f32.mrb[5].mxu1 }
  0xff   :  { %v6320_v52 = vadd.f32 %v4275_v50, %v4274_v45  ;;  %v4277_v53 = vpop.f32.mrb[6].mxu0  ;;  %v6322_v54 = vadd.f32 %v4299_v51, %v4298_v46  ;;  %v4301_v55 = vpop.f32.mrb[6].mxu1 }
 0x100   :  { %v4278_v57 = vpop.f32.mrb[7].mxu0  ;;  %v4302_v58 = vpop.f32.mrb[7].mxu1  ;;  %4785 = vmatpush3.bf16.msra.mxu1 %v5348_v43  ;;  %4843 = vmatpush3.bf16.msra.mxu0 %v5355_v44  ;;  %v2653_v43 = vadd.f32 %v6284_v32, %v6390_v36 }
 0x101   :  { %v6333_v61 = vadd.f32 %v4278_v57, %v4277_v53  ;;  %v6335_v62 = vadd.f32 %v4302_v58, %v4301_v55  ;;  %4786 = vmatprep.subr.bf16.mxu1 %v5357_v49  ;;  %4844 = vmatprep.subr.bf16.mxu0 %v5360_v59  ;;  %v5375_v49 = vld [vmem:[%s6884_s0 + $0x54] ss:$100 sps:$4 sm:$0xff]   ;;  %v2656_v53 = vadd.f32 %v6294_v39, %v6390_v36  ;;  %v5368_v59 = vld [vmem:[%s6884_s0 + $0x48] ss:$100 sps:$4 sm:$0xff]  }
 0x102   :  { %3291 = vmatmul.mubr.bf16.gmra.mrb[108].mxu1 %v5331_v41  ;;  %3379 = vmatmul.mubr.bf16.gmra.mrb[112].mxu0 %v5334_v42  ;;  %v4012_v41 = vcombine.low %v178_v21, %v178_v21  ;;  %v4014_v42 = vcombine.low %v179_v22, %v179_v22  ;;  %v5373_v39 = vld [vmem:[%s6884_s0 + $0x50] ss:$100 sps:$4 sm:$0xff]   ;;  %v5382_v21 = vld [vmem:[%s6883_s1 + $0x588] sm:$0xff]  }
 0x103   :  { %3298 = vmatprep.mubr.bf16.mxu1 %v5339_v47  ;;  %3386 = vmatprep.mubr.bf16.mxu0 %v5342_v48  ;;  %v5370_v48 = vld [vmem:[%s6884_s0 + $0x4c] ss:$100 sps:$4 sm:$0xff]  }
 0x104   :  { %4787 = vmatpush3.bf16.msra.mxu1 %v5358_v56  ;;  %4845 = vmatpush3.bf16.msra.mxu0 %v5362_v60 }
 0x105   :  { %v4280_v5 = vpop.f32.mrb[8].mxu0  ;;  %v4304_v6 = vpop.f32.mrb[8].mxu1  ;;  %4788 = vmatprep.subr.bf16.mxu1 %v5364_v63  ;;  %4846 = vmatprep.subr.bf16.mxu0 %v5367_v0 }
 0x106   :  { %v4281_v7 = vpop.f32.mrb[9].mxu0  ;;  %v4305_v8 = vpop.f32.mrb[9].mxu1 }
 0x107   :  { %v6358_v10 = vadd.f32 %v4281_v7, %v4280_v5  ;;  %v4283_v11 = vpop.f32.mrb[10].mxu0  ;;  %v6360_v12 = vadd.f32 %v4305_v8, %v4304_v6  ;;  %v4307_v13 = vpop.f32.mrb[10].mxu1  ;;  %v2661_v5 = vadd.f32 %v6320_v52, %v6390_v36 }
 0x108   :  { %v4284_v16 = vpop.f32.mrb[11].mxu0  ;;  %v4308_v17 = vpop.f32.mrb[11].mxu1  ;;  %4789 = vmatpush3.bf16.msra.mxu1 %v5366_v1  ;;  %4847 = vmatpush3.bf16.msra.mxu0 %v5371_v3  ;;  %v5376_v1 = vld [vmem:[%s6883_s1 + $0x580] sm:$0xff]  }
 0x109   :  { %v6368_v18 = vadd.f32 %v4284_v16, %v4283_v11  ;;  %4890 = vmatprep.subr.bf16.mxu1 %v5372_v4  ;;  %4959 = vmatprep.subr.bf16.mxu0 %v5456_v23  ;;  %v5378_v11 = vld [vmem:[%s6884_s0 + $0x114] ss:$100 sps:$4 sm:$0xff]   ;;  %v2664_v16 = vadd.f32 %v6333_v61, %v6390_v36  ;;  %v5394_v61 = vld [vmem:[%s6883_s1 + $0x608] sm:$0xff]  }
 0x10a   :  { %3299 = vmatmul.mubr.bf16.gmra.mrb[112].mxu1 %v5341_v2  ;;  %3387 = vmatmul.mubr.bf16.gmra.mrb[116].mxu0 %v5345_v9  ;;  %v5377_v2 = vld [vmem:[%s6883_s1 + $0x600] sm:$0xff]  }
 0x10b   :  { %3306 = vmatprep.mubr.bf16.mxu1 %v5349_v14  ;;  %3394 = vmatprep.mubr.bf16.mxu0 %v5353_v15  ;;  %v5380_v15 = vld [vmem:[%s6883_s1 + $0x5c8] sm:$0xff]  }
 0x10d   :  { %v4286_v24 = vpop.f32.mrb[12].mxu0 }
 0x10e   :  { %v4287_v25 = vpop.f32.mrb[13].mxu0 }
 0x10f   :  { %v6383_v26 = vadd.f32 %v4287_v25, %v4286_v24  ;;  %v4289_v27 = vpop.f32.mrb[14].mxu0  ;;  %v5381_v25 = vld [vmem:[%s6884_s0 + $0x110] ss:$100 sps:$4 sm:$0xff]  }
 0x110   :  { %v4290_v31 = vpop.f32.mrb[15].mxu0 }
 0x111   :  { %v6385_v33 = vadd.f32 %v4290_v31, %v4289_v27  ;;  %v5386_v27 = vld [vmem:[%s6883_s1 + $0x5d0] sm:$0xff]  }
 0x112   :  { %3307 = vmatmul.mubr.bf16.gmra.mrb[116].mxu1 %v5351_v19  ;;  %3395 = vmatmul.mubr.bf16.gmra.mrb[120].mxu0 %v5356_v20  ;;  %v5383_v20 = vld [vmem:[%s6884_s0 + $0x11c] ss:$100 sps:$4 sm:$0xff]  }
 0x113   :  { %3314 = vmatprep.mubr.bf16.mxu1 %v4013_v28  ;;  %3402 = vmatprep.mubr.bf16.mxu0 %v4015_v29 }
 0x115   :  { %v4326_v34 = vpop.f32.mrb[12].mxu1  ;;  %v4384_v35 = vpop.f32.mrb[16].mxu0 }
 0x116   :  { %v4327_v37 = vpop.f32.mrb[13].mxu1  ;;  %v4385_v40 = vpop.f32.mrb[17].mxu0 }
 0x117   :  { %v4328_v44 = vadd.f32 %v4327_v37, %v4326_v34  ;;  %v4329_v45 = vpop.f32.mrb[14].mxu1  ;;  %v4386_v46 = vadd.f32 %v4385_v40, %v4384_v35  ;;  %v4387_v47 = vpop.f32.mrb[18].mxu0  ;;  %v5385_v34 = vld [vmem:[%s6884_s0 + $0x118] ss:$100 sps:$4 sm:$0xff]  }
 0x118   :  { %v4330_v50 = vpop.f32.mrb[15].mxu1  ;;  %v4388_v51 = vpop.f32.mrb[19].mxu0  ;;  %v5387_v35 = vld [vmem:[%s6884_s0 + $0x1dc] ss:$100 sps:$4 sm:$0xff]  }
 0x119   :  { %v2741_v55 = vadd.f32 %v4328_v44, %v2653_v43  ;;  %v4331_v56 = vadd.f32 %v4330_v50, %v4329_v45  ;;  %v4389_v32 = vadd.f32 %v4388_v51, %v4387_v47  ;;  %v2672_v50 = vadd.f32 %v6368_v18, %v6390_v36  ;;  %v5390_v18 = vld [vmem:[%s6884_s0 + $0x1d8] ss:$100 sps:$4 sm:$0xff]  }
 0x11a   :  { %3315 = vmatmul.mubr.bf16.gmra.mrb[120].mxu1 %v4012_v41  ;;  %3403 = vmatmul.mubr.bf16.gmra.mrb[124].mxu0 %v4014_v42  ;;  %v2669_v41 = vadd.f32 %v6358_v10, %v6390_v36  ;;  %v5395_v10 = vld [vmem:[%s6883_s1 + $0x5d8] sm:$0xff]  }
 0x11b   :  { %v2744_v57 = vadd.f32 %v4331_v56, %v2656_v53  ;;  %v6402_v58 = vadd.f32 %v4386_v46, %v2741_v55  ;;  %3442 = vmatprep.mubr.bf16.mxu1 %v5370_v48  ;;  %3530 = vmatprep.mubr.bf16.mxu0 %v5375_v49  ;;  %v5389_v46 = vld [vmem:[%s6883_s1 + $0x590] sm:$0xff]   ;;  %v5391_v49 = vld [vmem:[%s6884_s0 + $0x1e4] ss:$100 sps:$4 sm:$0xff]  }
 0x11c   :  { %v5411_v56 = vld [vmem:[%s6883_s1 + $0x610] sm:$0xff]  }
 0x11d   :  { %v6407_v60 = vadd.f32 %v4389_v32, %v2744_v57  ;;  %v4332_v63 = vpop.f32.mrb[16].mxu1  ;;  %v4390_v0 = vpop.f32.mrb[20].mxu0 }
 0x11e   :  { %v4333_v3 = vpop.f32.mrb[17].mxu1  ;;  %v4391_v4 = vpop.f32.mrb[21].mxu0 }
 0x11f   :  { %v4334_v6 = vadd.f32 %v4333_v3, %v4332_v63  ;;  %v4335_v7 = vpop.f32.mrb[18].mxu1  ;;  %v4392_v8 = vadd.f32 %v4391_v4, %v4390_v0  ;;  %v4393_v9 = vpop.f32.mrb[22].mxu0  ;;  %v5393_v63 = vld [vmem:[%s6884_s0 + $0x1e0] ss:$100 sps:$4 sm:$0xff]   ;;  %v5424_v4 = vld [vmem:[%s6883_s1 + $0x618] sm:$0xff]  }
 0x120   :  { %v4336_v13 = vpop.f32.mrb[19].mxu1  ;;  %v4394_v14 = vpop.f32.mrb[23].mxu0  ;;  %v5403_v0 = vld [vmem:[%s6883_s1 + $0x5e0] sm:$0xff]  }
 0x121   :  { %v2749_v17 = vadd.f32 %v4334_v6, %v2661_v5  ;;  %v4337_v19 = vadd.f32 %v4336_v13, %v4335_v7  ;;  %v4395_v52 = vadd.f32 %v4394_v14, %v4393_v9  ;;  %v5397_v3 = vld [vmem:[%s6884_s0 + $0x2a4] ss:$100 sps:$4 sm:$0xff]   ;;  %v2677_v7 = vadd.f32 %v6383_v26, %v6390_v36  ;;  %v5400_v14 = vld [vmem:[%s6884_s0 + $0x2ac] ss:$100 sps:$4 sm:$0xff]  }
 0x122   :  { %3443 = vmatmul.mubr.bf16.vlgmr.msra.gmra.mrb[124].mxu1 %v5368_v59  ;;  %3531 = vmatmul.mubr.bf16.vlgmr.msra.gmra.mrb[128].mxu0 %v5373_v39  ;;  %v5396_v59 = vld [vmem:[%s6883_s1 + $0x598] sm:$0xff]  }
 0x123   :  { %v2752_v22 = vadd.f32 %v4337_v19, %v2664_v16  ;;  %v6434_v24 = vadd.f32 %v4392_v8, %v2749_v17  ;;  %4891 = vmatpush3.bf16.msra.mxu1 %v5376_v1  ;;  %4960 = vmatpush3.bf16.msra.mxu0 %v5377_v2  ;;  %v5404_v17 = vld [vmem:[%s6883_s1 + $0x5a0] sm:$0xff]   ;;  %v2680_v19 = vadd.f32 %v6385_v33, %v6390_v36  ;;  %v5413_v33 = vld [vmem:[%s6883_s1 + $0x5a8] sm:$0xff]  }
 0x124   :  { %3450 = vmatprep.mubr.bf16.mxu1 %v5378_v11  ;;  %4892 = vmatprep.subr.bf16.mxu1 %v5380_v15 }
 0x125   :  { %v6445_v28 = vadd.f32 %v4395_v52, %v2752_v22  ;;  %v4338_v29 = vpop.f32.mrb[20].mxu1  ;;  %v4396_v31 = vpop.f32.mrb[24].mxu0  ;;  %3538 = vmatprep.mubr.bf16.mxu0 %v5383_v20  ;;  %4961 = vmatprep.subr.bf16.mxu0 %v5456_v23 }
 0x126   :  { %v4339_v37 = vpop.f32.mrb[21].mxu1  ;;  %v4397_v40 = vpop.f32.mrb[25].mxu0 }
 0x127   :  { %v4340_v42 = vadd.f32 %v4339_v37, %v4338_v29  ;;  %v4341_v43 = vpop.f32.mrb[22].mxu1  ;;  %v4398_v44 = vadd.f32 %v4397_v40, %v4396_v31  ;;  %v4399_v45 = vpop.f32.mrb[26].mxu0  ;;  %4893 = vmatpush3.bf16.msra.mxu1 %v5382_v21  ;;  %4962 = vmatpush3.bf16.msra.mxu0 %v5394_v61  ;;  %v5412_v21 = vld [vmem:[%s6883_s1 + $0x5e8] sm:$0xff]   ;;  %v5420_v31 = vld [vmem:[%s6883_s1 + $0x5f0] sm:$0xff]   ;;  %v5399_v37 = vld [vmem:[%s6884_s0 + $0x2a0] ss:$100 sps:$4 sm:$0xff]  }
 0x128   :  { %v4342_v47 = vpop.f32.mrb[23].mxu1  ;;  %v4400_v48 = vpop.f32.mrb[27].mxu0  ;;  %4894 = vmatprep.subr.bf16.mxu1 %v5386_v27  ;;  %4963 = vmatprep.subr.bf16.mxu0 %v5456_v23  ;;  %v5402_v40 = vld [vmem:[%s6884_s0 + $0x2a8] ss:$100 sps:$4 sm:$0xff]  }
 0x129   :  { %v2757_v51 = vadd.f32 %v4340_v42, %v2669_v41  ;;  %v4343_v53 = vadd.f32 %v4342_v47, %v4341_v43  ;;  %v4401_v55 = vadd.f32 %v4400_v48, %v4399_v45  ;;  %v2685_v41 = vadd.f32 %v6282_v30, %v6390_v36  ;;  %v5408_v47 = vld [vmem:[%s6884_s0 + $0x374] ss:$100 sps:$4 sm:$0xff]  }
 0x12a   :  { %3451 = vmatmul.mubr.bf16.gmra.mrb[128].mxu1 %v5381_v25  ;;  %3539 = vmatmul.mubr.bf16.gmra.mrb[132].mxu0 %v5385_v34  ;;  %v2688_v30 = vadd.f32 %v6292_v38, %v6390_v36  ;;  %v5428_v38 = vld [vmem:[%s6883_s1 + $0x5b8] sm:$0xff]  }
 0x12b   :  { %v2760_v32 = vadd.f32 %v4343_v53, %v2672_v50  ;;  %v6471_v57 = vadd.f32 %v4398_v44, %v2757_v51  ;;  %3458 = vmatprep.mubr.bf16.mxu1 %v5387_v35  ;;  %4895 = vmatpush3.bf16.msra.mxu1 %v5389_v46  ;;  %v5405_v46 = vld [vmem:[%s6884_s0 + $0x36c] ss:$100 sps:$4 sm:$0xff]  }
 0x12c   :  { %3546 = vmatprep.mubr.bf16.mxu0 %v5391_v49  ;;  %4896 = vmatprep.subr.bf16.mxu1 %v5395_v10  ;;  %v5421_v10 = vld [vmem:[%s6883_s1 + $0x5b0] sm:$0xff]  }
 0x12d   :  { %v6485_v39 = vadd.f32 %v4401_v55, %v2760_v32  ;;  %v4344_v1 = vpop.f32.mrb[24].mxu1  ;;  %v4402_v2 = vpop.f32.mrb[28].mxu0  ;;  %4964 = vmatpush3.bf16.msra.mxu0 %v5411_v56  ;;  %v5426_v55 = vld [vmem:[%s6883_s1 + $0x5f8] sm:$0xff]  }
 0x12e   :  { %v4345_v5 = vpop.f32.mrb[25].mxu1  ;;  %v4403_v6 = vpop.f32.mrb[29].mxu0  ;;  %4965 = vmatprep.subr.bf16.mxu0 %v5456_v23 }
 0x12f   :  { %v4346_v8 = vadd.f32 %v4345_v5, %v4344_v1  ;;  %v4347_v9 = vpop.f32.mrb[26].mxu1  ;;  %v4404_v11 = vadd.f32 %v4403_v6, %v4402_v2  ;;  %v4405_v13 = vpop.f32.mrb[30].mxu0  ;;  %4897 = vmatpush3.bf16.msra.mxu1 %v5396_v59  ;;  %v5407_v2 = vld [vmem:[%s6884_s0 + $0x368] ss:$100 sps:$4 sm:$0xff]  }
 0x130   :  { %v4348_v15 = vpop.f32.mrb[27].mxu1  ;;  %v4406_v16 = vpop.f32.mrb[31].mxu0  ;;  %4898 = vmatprep.subr.bf16.mxu1 %v5403_v0 }
 0x131   :  { %v2765_v26 = vadd.f32 %v4346_v8, %v2677_v7  ;;  %v4349_v52 = vadd.f32 %v4348_v15, %v4347_v9  ;;  %v4407_v20 = vadd.f32 %v4406_v16, %v4405_v13  ;;  %4966 = vmatpush3.bf16.msra.mxu0 %v5424_v4  ;;  %v2693_v4 = vadd.f32 %v6322_v54, %v6390_v36  ;;  %v5414_v9 = vld [vmem:[%s6884_s0 + $0x434] ss:$100 sps:$4 sm:$0xff]  }
 0x132   :  { %3459 = vmatmul.mubr.bf16.gmra.mrb[132].mxu1 %v5390_v18  ;;  %3547 = vmatmul.mubr.bf16.gmra.mrb[136].mxu0 %v5393_v63  ;;  %v2696_v15 = vadd.f32 %v6335_v62, %v6390_v36 }
 0x133   :  { %v2768_v22 = vadd.f32 %v4349_v52, %v2680_v19  ;;  %v6507_v61 = vadd.f32 %v4404_v11, %v2765_v26  ;;  %3466 = vmatprep.mubr.bf16.mxu1 %v5397_v3  ;;  %3554 = vmatprep.mubr.bf16.mxu0 %v5400_v14  ;;  %v5410_v3 = vld [vmem:[%s6884_s0 + $0x370] ss:$100 sps:$4 sm:$0xff]   ;;  %v5417_v11 = vld [vmem:[%s6884_s0 + $0x43c] ss:$100 sps:$4 sm:$0xff]  }
 0x134   :  { %4899 = vmatpush3.bf16.msra.mxu1 %v5404_v17  ;;  %v180_v52 = vld [vmem:[%s6884_s0 + $0x4f8] sm:$0x11] }
 0x135   :  { %v6512_v25 = vadd.f32 %v4407_v20, %v2768_v22  ;;  %v4350_v27 = vpop.f32.mrb[28].mxu1  ;;  %v4408_v29 = vpop.f32.mrb[32].mxu0  ;;  %4900 = vmatprep.subr.bf16.mxu1 %v5412_v21  ;;  %v181_v20 = vld [vmem:[%s6884_s0 + $0x500] sm:$0x11] }
 0x136   :  { %v4351_v34 = vpop.f32.mrb[29].mxu1  ;;  %v4409_v35 = vpop.f32.mrb[33].mxu0 }
 0x137   :  { %v4352_v42 = vadd.f32 %v4351_v34, %v4350_v27  ;;  %v4353_v43 = vpop.f32.mrb[30].mxu1  ;;  %v4410_v44 = vadd.f32 %v4409_v35, %v4408_v29  ;;  %v4411_v45 = vpop.f32.mrb[34].mxu0  ;;  %v5419_v34 = vld [vmem:[%s6884_s0 + $0x438] ss:$100 sps:$4 sm:$0xff]  }
 0x138   :  { %v4354_v48 = vpop.f32.mrb[31].mxu1  ;;  %v4412_v49 = vpop.f32.mrb[35].mxu0  ;;  %4901 = vmatpush3.bf16.msra.mxu1 %v5413_v33  ;;  %v2701_v33 = vadd.f32 %v6360_v12, %v6390_v36 }
 0x139   :  { %v2773_v50 = vadd.f32 %v4352_v42, %v2685_v41  ;;  %v4355_v51 = vadd.f32 %v4354_v48, %v4353_v43  ;;  %v4413_v53 = vadd.f32 %v4412_v49, %v4411_v45  ;;  %4902 = vmatprep.subr.bf16.mxu1 %v5420_v31  ;;  %v5416_v31 = vld [vmem:[%s6884_s0 + $0x430] ss:$100 sps:$4 sm:$0xff]   ;;  %v4017_v42 = vcombine.high %v180_v52, %v180_v52 }
 0x13a   :  { %3467 = vmatmul.mubr.bf16.gmra.mrb[136].mxu1 %v5399_v37  ;;  %3555 = vmatmul.mubr.bf16.gmra.mrb[140].mxu0 %v5402_v40  ;;  %v4019_v43 = vcombine.high %v181_v20, %v181_v20 }
 0x13b   :  { %v2776_v56 = vadd.f32 %v4355_v51, %v2688_v30  ;;  %v6539_v32 = vadd.f32 %v4410_v44, %v2773_v50  ;;  %3474 = vmatprep.mubr.bf16.mxu1 %v5405_v46  ;;  %3562 = vmatprep.mubr.bf16.mxu0 %v5408_v47  ;;  %v4018_v30 = vcombine.low %v181_v20, %v181_v20 }
 0x13c   :  { %4903 = vmatpush3.bf16.msra.mxu1 %v5421_v10  ;;  %v4016_v10 = vcombine.low %v180_v52, %v180_v52 }
 0x13d   :  { %v6544_v59 = vadd.f32 %v4413_v53, %v2776_v56  ;;  %v4356_v18 = vpop.f32.mrb[32].mxu1  ;;  %v4414_v63 = vpop.f32.mrb[36].mxu0  ;;  %4904 = vmatprep.subr.bf16.mxu1 %v5426_v55  ;;  %v5431_v56 = vld [vmem:[%s6884_s0 + $0x5c] ss:$100 sps:$4 sm:$0xff]  }
 0x13e   :  { %v4357_v0 = vpop.f32.mrb[33].mxu1  ;;  %v4415_v1 = vpop.f32.mrb[37].mxu0 }
 0x13f   :  { %v4358_v5 = vadd.f32 %v4357_v0, %v4356_v18  ;;  %v4359_v6 = vpop.f32.mrb[34].mxu1  ;;  %v4416_v7 = vadd.f32 %v4415_v1, %v4414_v63  ;;  %v4417_v8 = vpop.f32.mrb[38].mxu0 }
 0x140   :  { %v4360_v13 = vpop.f32.mrb[35].mxu1  ;;  %v4418_v14 = vpop.f32.mrb[39].mxu0  ;;  %4905 = vmatpush3.bf16.msra.mxu1 %v5428_v38 }
 0x141   :  { %v2781_v16 = vadd.f32 %v4358_v5, %v2693_v4  ;;  %v4361_v54 = vadd.f32 %v4360_v13, %v4359_v6  ;;  %v4419_v17 = vadd.f32 %v4418_v14, %v4417_v8 }
 0x142   :  { %3475 = vmatmul.mubr.bf16.gmra.mrb[140].mxu1 %v5407_v2  ;;  %3563 = vmatmul.mubr.bf16.gmra.mrb[144].mxu0 %v5410_v3 }
 0x143   :  { %v2784_v19 = vadd.f32 %v4361_v54, %v2696_v15  ;;  %v6562_v26 = vadd.f32 %v4416_v7, %v2781_v16  ;;  %3482 = vmatprep.mubr.bf16.mxu1 %v5414_v9  ;;  %3570 = vmatprep.mubr.bf16.mxu0 %v5417_v11  ;;  %v5433_v15 = vld [vmem:[%s6884_s0 + $0x124] ss:$100 sps:$4 sm:$0xff]  }
 0x145   :  { %v6570_v21 = vadd.f32 %v4419_v17, %v2784_v19  ;;  %v4362_v62 = vpop.f32.mrb[36].mxu1  ;;  %v4420_v22 = vpop.f32.mrb[40].mxu0 }
 0x146   :  { %v4363_v27 = vpop.f32.mrb[37].mxu1  ;;  %v4421_v29 = vpop.f32.mrb[41].mxu0 }
 0x147   :  { %v4364_v35 = vadd.f32 %v4363_v27, %v4362_v62  ;;  %v4365_v37 = vpop.f32.mrb[38].mxu1  ;;  %v4422_v40 = vadd.f32 %v4421_v29, %v4420_v22  ;;  %v4423_v41 = vpop.f32.mrb[42].mxu0 }
 0x148   :  { %v4366_v44 = vpop.f32.mrb[39].mxu1  ;;  %v4424_v45 = vpop.f32.mrb[43].mxu0  ;;  %v5437_v41 = vld [vmem:[%s6884_s0 + $0x1ec] ss:$100 sps:$4 sm:$0xff]  }
 0x149   :  { %v2789_v46 = vadd.f32 %v4364_v35, %v2701_v33 }
 0x14a   :  { %3483 = vmatmul.mubr.bf16.gmra.mrb[144].mxu1 %v5416_v31  ;;  %3571 = vmatmul.mubr.bf16.gmra.mrb[148].mxu0 %v5419_v34 }
 0x14b   :  { %v6580_v12 = vadd.f32 %v4422_v40, %v2789_v46  ;;  %3490 = vmatprep.mubr.bf16.mxu1 %v4017_v42  ;;  %3578 = vmatprep.mubr.bf16.mxu0 %v4019_v43 }
 0x14d   :  { %v4442_v36 = vpop.f32.mrb[40].mxu1  ;;  %v4500_v47 = vpop.f32.mrb[44].mxu0 }
 0x14e   :  { %v4443_v48 = vpop.f32.mrb[41].mxu1  ;;  %v4501_v49 = vpop.f32.mrb[45].mxu0 }
 0x14f   :  { %v4444_v50 = vadd.f32 %v4443_v48, %v4442_v36  ;;  %v4445_v51 = vpop.f32.mrb[42].mxu1  ;;  %v4502_v53 = vadd.f32 %v4501_v49, %v4500_v47  ;;  %v4503_v55 = vpop.f32.mrb[46].mxu0 }
 0x150   :  { %v4446_v38 = vpop.f32.mrb[43].mxu1  ;;  %v4504_v18 = vpop.f32.mrb[47].mxu0 }
 0x151   :  { %v2917_v63 = vadd.f32 %v4444_v50, %v6402_v58  ;;  %v4447_v0 = vadd.f32 %v4446_v38, %v4445_v51  ;;  %v4505_v1 = vadd.f32 %v4504_v18, %v4503_v55  ;;  %v5429_v58 = vld [vmem:[%s6884_s0 + $0x58] ss:$100 sps:$4 sm:$0xff]  }
 0x152   :  { %3491 = vmatmul.mubr.bf16.gmra.mrb[148].mxu1 %v4016_v10  ;;  %3579 = vmatmul.mubr.bf16.gmra.mrb[152].mxu0 %v4018_v30  ;;  %v5441_v38 = vld [vmem:[%s6884_s0 + $0x2b4] ss:$100 sps:$4 sm:$0xff]  }
 0x153   :  { %v2920_v2 = vadd.f32 %v4447_v0, %v6407_v60  ;;  %v6587_v3 = vadd.f32 %v4502_v53, %v2917_v63  ;;  %3618 = vmatprep.mubr.bf16.mxu1 %v5431_v56  ;;  %4967 = vmatprep.mubr.msk.bf16.mxu0 %vm5457_vm0, %v5456_v23  ;;  %v5432_v60 = vld [vmem:[%s6884_s0 + $0x60] ss:$100 sps:$4 sm:$0xff]  }
 0x155   :  { %v6591_v4 = vadd.f32 %v4505_v1, %v2920_v2  ;;  %v4448_v5 = vpop.f32.mrb[44].mxu1  ;;  %v4506_v6 = vpop.f32.mrb[48].mxu0 }
 0x156   :  { %v4449_v7 = vpop.f32.mrb[45].mxu1  ;;  %v4507_v8 = vpop.f32.mrb[49].mxu0 }
 0x157   :  { %v4450_v9 = vadd.f32 %v4449_v7, %v4448_v5  ;;  %v4451_v11 = vpop.f32.mrb[46].mxu1  ;;  %v4508_v13 = vadd.f32 %v4507_v8, %v4506_v6  ;;  %v4509_v14 = vpop.f32.mrb[50].mxu0 }
 0x158   :  { %v4452_v16 = vpop.f32.mrb[47].mxu1  ;;  %v4510_v54 = vpop.f32.mrb[51].mxu0 }
 0x159   :  { %v2925_v17 = vadd.f32 %v4450_v9, %v6434_v24  ;;  %v4453_v19 = vadd.f32 %v4452_v16, %v4451_v11  ;;  %v4511_v52 = vadd.f32 %v4510_v54, %v4509_v14  ;;  %v5435_v24 = vld [vmem:[%s6884_s0 + $0x120] ss:$100 sps:$4 sm:$0xff]  }
 0x15a   :  { %3619 = vmatmul.mubr.bf16.vlgmr.msra.gmra.mrb[152].mxu1 %v5429_v58  ;;  %4968 = vmatmul.mubr.msk.bf16.vlgmr.msra.gmra.mrb[156].mxu0 %vm2596_vm1, %v5432_v60  ;;  %v5445_v16 = vld [vmem:[%s6884_s0 + $0x37c] ss:$100 sps:$4 sm:$0xff]  }
 0x15b   :  { %v2928_v20 = vadd.f32 %v4453_v19, %v6445_v28  ;;  %v6605_v62 = vadd.f32 %v4508_v13, %v2925_v17  ;;  %3626 = vmatprep.mubr.bf16.mxu1 %v5433_v15  ;;  %4971 = vmatprep.mubr.msk.bf16.mxu0 %vm5457_vm0, %v5456_v23  ;;  %v5436_v28 = vld [vmem:[%s6884_s0 + $0x128] ss:$100 sps:$4 sm:$0xff]  }
 0x15d   :  { %v6609_v22 = vadd.f32 %v4511_v52, %v2928_v20  ;;  %v4454_v33 = vpop.f32.mrb[48].mxu1  ;;  %v4512_v27 = vpop.f32.mrb[52].mxu0 }
 0x15e   :  { %v4455_v29 = vpop.f32.mrb[49].mxu1  ;;  %v4513_v31 = vpop.f32.mrb[53].mxu0 }
 0x15f   :  { %v4456_v34 = vadd.f32 %v4455_v29, %v4454_v33  ;;  %v4457_v35 = vpop.f32.mrb[50].mxu1  ;;  %v4514_v37 = vadd.f32 %v4513_v31, %v4512_v27  ;;  %v4515_v40 = vpop.f32.mrb[54].mxu0 }
 0x160   :  { %v4458_v42 = vpop.f32.mrb[51].mxu1  ;;  %v4516_v43 = vpop.f32.mrb[55].mxu0 }
 0x161   :  { %v2933_v44 = vadd.f32 %v4456_v34, %v6471_v57  ;;  %v4459_v45 = vadd.f32 %v4458_v42, %v4457_v35  ;;  %v4517_v46 = vadd.f32 %v4516_v43, %v4515_v40  ;;  %v5439_v57 = vld [vmem:[%s6884_s0 + $0x1e8] ss:$100 sps:$4 sm:$0xff]  }
 0x162   :  { %3627 = vmatmul.mubr.bf16.gmra.mrb[156].mxu1 %v5435_v24  ;;  %4972 = vmatmul.mubr.msk.bf16.gmra.mrb[160].mxu0 %vm2596_vm1, %v5436_v28  ;;  %v5449_v42 = vld [vmem:[%s6884_s0 + $0x444] ss:$100 sps:$4 sm:$0xff]  }
 0x163   :  { %v2936_v36 = vadd.f32 %v4459_v45, %v6485_v39  ;;  %v6623_v47 = vadd.f32 %v4514_v37, %v2933_v44  ;;  %3634 = vmatprep.mubr.bf16.mxu1 %v5437_v41  ;;  %4975 = vmatprep.mubr.msk.bf16.mxu0 %vm5457_vm0, %v5456_v23  ;;  %v5440_v39 = vld [vmem:[%s6884_s0 + $0x1f0] ss:$100 sps:$4 sm:$0xff]  }
 0x165   :  { %v6627_v48 = vadd.f32 %v4517_v46, %v2936_v36  ;;  %v4460_v49 = vpop.f32.mrb[52].mxu1  ;;  %v4518_v10 = vpop.f32.mrb[56].mxu0 }
 0x166   :  { %v4461_v30 = vpop.f32.mrb[53].mxu1  ;;  %v4519_v50 = vpop.f32.mrb[57].mxu0 }
 0x167   :  { %v4462_v51 = vadd.f32 %v4461_v30, %v4460_v49  ;;  %v4463_v53 = vpop.f32.mrb[54].mxu1  ;;  %v4520_v55 = vadd.f32 %v4519_v50, %v4518_v10  ;;  %v4521_v56 = vpop.f32.mrb[58].mxu0  ;;  %v182_v30 = vld [vmem:[%s6884_s0 + $0x508] sm:$0x11] }
 0x168   :  { %v4464_v18 = vpop.f32.mrb[55].mxu1  ;;  %v4522_v63 = vpop.f32.mrb[59].mxu0 }
 0x169   :  { %v2941_v0 = vadd.f32 %v4462_v51, %v6507_v61  ;;  %v4465_v1 = vadd.f32 %v4464_v18, %v4463_v53  ;;  %v4523_v2 = vadd.f32 %v4522_v63, %v4521_v56  ;;  %v5443_v61 = vld [vmem:[%s6884_s0 + $0x2b0] ss:$100 sps:$4 sm:$0xff]   ;;  %v5452_v53 = vld [vmem:[%s6884_s0 + $0x448] ss:$100 sps:$4 sm:$0xff]   ;;  %v4021_v63 = vcombine.high %v182_v30, %v182_v30 }
 0x16a   :  { %3635 = vmatmul.mubr.bf16.gmra.mrb[160].mxu1 %v5439_v57  ;;  %4976 = vmatmul.mubr.msk.bf16.gmra.mrb[164].mxu0 %vm2596_vm1, %v5440_v39 }
 0x16b   :  { %v2944_v5 = vadd.f32 %v4465_v1, %v6512_v25  ;;  %v6641_v6 = vadd.f32 %v4520_v55, %v2941_v0  ;;  %3642 = vmatprep.mubr.bf16.mxu1 %v5441_v38  ;;  %4979 = vmatprep.mubr.msk.bf16.mxu0 %vm5457_vm0, %v5456_v23  ;;  %v5444_v25 = vld [vmem:[%s6884_s0 + $0x2b8] ss:$100 sps:$4 sm:$0xff]  }
 0x16d   :  { %v6645_v7 = vadd.f32 %v4523_v2, %v2944_v5  ;;  %v4466_v8 = vpop.f32.mrb[56].mxu1  ;;  %v4524_v58 = vpop.f32.mrb[60].mxu0 }
 0x16e   :  { %v4467_v60 = vpop.f32.mrb[57].mxu1  ;;  %v4525_v9 = vpop.f32.mrb[61].mxu0 }
 0x16f   :  { %v4468_v11 = vadd.f32 %v4467_v60, %v4466_v8  ;;  %v4469_v13 = vpop.f32.mrb[58].mxu1  ;;  %v4526_v14 = vadd.f32 %v4525_v9, %v4524_v58  ;;  %v4527_v15 = vpop.f32.mrb[62].mxu0 }
 0x170   :  { %v4470_v54 = vpop.f32.mrb[59].mxu1  ;;  %v4528_v17 = vpop.f32.mrb[63].mxu0 }
 0x171   :  { %v2949_v19 = vadd.f32 %v4468_v11, %v6539_v32  ;;  %v4471_v52 = vadd.f32 %v4470_v54, %v4469_v13  ;;  %v4529_v20 = vadd.f32 %v4528_v17, %v4527_v15  ;;  %v5447_v32 = vld [vmem:[%s6884_s0 + $0x378] ss:$100 sps:$4 sm:$0xff]  }
 0x172   :  { %3643 = vmatmul.mubr.bf16.gmra.mrb[164].mxu1 %v5443_v61  ;;  %4980 = vmatmul.mubr.msk.bf16.gmra.mrb[168].mxu0 %vm2596_vm1, %v5444_v25  ;;  %v4020_v61 = vcombine.low %v182_v30, %v182_v30  ;;  %v5455_v25 = vld [vmem:[%s6884_s0 + $0x510] ss:$0 sps:$4 sm:$0x11]  }
 0x173   :  { %v2952_v33 = vadd.f32 %v4471_v52, %v6544_v59  ;;  %v6659_v27 = vadd.f32 %v4526_v14, %v2949_v19  ;;  %3650 = vmatprep.mubr.bf16.mxu1 %v5445_v16  ;;  %4983 = vmatprep.mubr.msk.bf16.mxu0 %vm5457_vm0, %v5456_v23  ;;  %v5448_v59 = vld [vmem:[%s6884_s0 + $0x380] ss:$100 sps:$4 sm:$0xff]  }
 0x175   :  { %v6663_v29 = vadd.f32 %v4529_v20, %v2952_v33  ;;  %v4472_v31 = vpop.f32.mrb[60].mxu1  ;;  %v4530_v24 = vpop.f32.mrb[64].mxu0 }
 0x176   :  { %v4473_v28 = vpop.f32.mrb[61].mxu1  ;;  %v4531_v34 = vpop.f32.mrb[65].mxu0 }
 0x177   :  { %v4474_v35 = vadd.f32 %v4473_v28, %v4472_v31  ;;  %v4475_v37 = vpop.f32.mrb[62].mxu1  ;;  %v4532_v40 = vadd.f32 %v4531_v34, %v4530_v24  ;;  %v4533_v41 = vpop.f32.mrb[66].mxu0 }
 0x178   :  { %v4476_v43 = vpop.f32.mrb[63].mxu1  ;;  %v4534_v44 = vpop.f32.mrb[67].mxu0 }
 0x179   :  { %v2957_v45 = vadd.f32 %v4474_v35, %v6562_v26  ;;  %v4477_v46 = vadd.f32 %v4476_v43, %v4475_v37  ;;  %v4535_v36 = vadd.f32 %v4534_v44, %v4533_v41 }
 0x17a   :  { %3651 = vmatmul.mubr.bf16.gmra.mrb[168].mxu1 %v5447_v32  ;;  %4984 = vmatmul.mubr.msk.bf16.gmra.mrb[172].mxu0 %vm2596_vm1, %v5448_v59 }
 0x17b   :  { %v2960_v49 = vadd.f32 %v4477_v46, %v6570_v21  ;;  %v6677_v10 = vadd.f32 %v4532_v40, %v2957_v45  ;;  %3658 = vmatprep.mubr.bf16.mxu1 %v5449_v42  ;;  %4987 = vmatprep.mubr.msk.bf16.mxu0 %vm5457_vm0, %v5456_v23  ;;  %v5451_v21 = vld [vmem:[%s6884_s0 + $0x440] ss:$100 sps:$4 sm:$0xff]  }
 0x17d   :  { %v6684_v50 = vadd.f32 %v4535_v36, %v2960_v49  ;;  %v4478_v26 = vpop.f32.mrb[64].mxu1  ;;  %v4536_v57 = vpop.f32.mrb[68].mxu0 }
 0x17e   :  { %v4479_v39 = vpop.f32.mrb[65].mxu1  ;;  %v4537_v51 = vpop.f32.mrb[69].mxu0 }
 0x17f   :  { %v4480_v55 = vadd.f32 %v4479_v39, %v4478_v26  ;;  %v4481_v56 = vpop.f32.mrb[66].mxu1  ;;  %v4538_v38 = vadd.f32 %v4537_v51, %v4536_v57  ;;  %v4539_v18 = vpop.f32.mrb[70].mxu0 }
 0x180   :  { %v4482_v0 = vpop.f32.mrb[67].mxu1  ;;  %v4540_v1 = vpop.f32.mrb[71].mxu0 }
 0x181   :  { %v2965_v2 = vadd.f32 %v4480_v55, %v6580_v12 }
 0x182   :  { %3659 = vmatmul.mubr.bf16.gmra.mrb[172].mxu1 %v5451_v21  ;;  %4988 = vmatmul.mubr.msk.bf16.gmra.mrb[176].mxu0 %vm2596_vm1, %v5452_v53 }
 0x183   :  { %v6694_v5 = vadd.f32 %v4538_v38, %v2965_v2  ;;  %3666 = vmatprep.mubr.bf16.mxu1 %v4021_v63  ;;  %4991 = vmatprep.mubr.msk.bf16.mxu0 %vm5457_vm0, %v5456_v23 }
 0x185   :  { %v4558_v8 = vpop.f32.mrb[68].mxu1  ;;  %v4616_v58 = vpop.f32.mrb[72].mxu0 }
 0x186   :  { %v4559_v60 = vpop.f32.mrb[69].mxu1  ;;  %v4617_v9 = vpop.f32.mrb[73].mxu0 }
 0x187   :  { %v4560_v11 = vadd.f32 %v4559_v60, %v4558_v8  ;;  %v4561_v12 = vpop.f32.mrb[70].mxu1  ;;  %v4618_v13 = vadd.f32 %v4617_v9, %v4616_v58  ;;  %v4619_v14 = vpop.f32.mrb[74].mxu0 }
 0x188   :  { %v4562_v15 = vpop.f32.mrb[71].mxu1  ;;  %v4620_v16 = vpop.f32.mrb[75].mxu0 }
 0x189   :  { %v3093_v54 = vadd.f32 %v4560_v11, %v6587_v3  ;;  %v4563_v17 = vadd.f32 %v4562_v15, %v4561_v12  ;;  %v4621_v19 = vadd.f32 %v4620_v16, %v4619_v14 }
 0x18a   :  { %3667 = vmatmul.mubr.bf16.gmra.mrb[176].mxu1 %v4020_v61  ;;  %4992 = vmatmul.mubr.msk.bf16.gmra.mrb[180].mxu0 %vm2596_vm1, %v5455_v25 }
 0x18b   :  { %v3096_v23 = vadd.f32 %v4563_v17, %v6591_v4  ;;  %v6704_v52 = vadd.f32 %v4618_v13, %v3093_v54 }
 0x18d   :  { %v6706_v20 = vadd.f32 %v4621_v19, %v3096_v23  ;;  %v4564_v33 = vpop.f32.mrb[72].mxu1  ;;  %v4622_v31 = vpop.f32.mrb[76].mxu0 }
 0x18e   :  { %v4565_v24 = vpop.f32.mrb[73].mxu1  ;;  %v4623_v28 = vpop.f32.mrb[77].mxu0 }
 0x18f   :  { %v4566_v34 = vadd.f32 %v4565_v24, %v4564_v33  ;;  %v4567_v32 = vpop.f32.mrb[74].mxu1  ;;  %v4624_v59 = vadd.f32 %v4623_v28, %v4622_v31  ;;  %v4625_v35 = vpop.f32.mrb[78].mxu0 }
 0x190   :  { %v4568_v3 = vpop.f32.mrb[75].mxu1  ;;  %v4626_v37 = vpop.f32.mrb[79].mxu0 }
 0x191   :  { %v3101_v40 = vadd.f32 %v4566_v34, %v6605_v62  ;;  %v4569_v41 = vadd.f32 %v4568_v3, %v4567_v32  ;;  %v4627_v42 = vadd.f32 %v4626_v37, %v4625_v35 }
 0x193   :  { %v3104_v4 = vadd.f32 %v4569_v41, %v6609_v22  ;;  %v6710_v43 = vadd.f32 %v4624_v59, %v3101_v40 }
 0x195   :  { %v6712_v44 = vadd.f32 %v4627_v42, %v3104_v4  ;;  %v4570_v45 = vpop.f32.mrb[76].mxu1  ;;  %v4628_v46 = vpop.f32.mrb[80].mxu0 }
 0x196   :  { %v4571_v36 = vpop.f32.mrb[77].mxu1  ;;  %v4629_v49 = vpop.f32.mrb[81].mxu0 }
 0x197   :  { %v4572_v30 = vadd.f32 %v4571_v36, %v4570_v45  ;;  %v4573_v26 = vpop.f32.mrb[78].mxu1  ;;  %v4630_v57 = vadd.f32 %v4629_v49, %v4628_v46  ;;  %v4631_v39 = vpop.f32.mrb[82].mxu0 }
 0x198   :  { %v4574_v51 = vpop.f32.mrb[79].mxu1  ;;  %v4632_v21 = vpop.f32.mrb[83].mxu0 }
 0x199   :  { %v3109_v62 = vadd.f32 %v4572_v30, %v6623_v47  ;;  %v4575_v53 = vadd.f32 %v4574_v51, %v4573_v26  ;;  %v4633_v55 = vadd.f32 %v4632_v21, %v4631_v39 }
 0x19b   :  { %v3112_v22 = vadd.f32 %v4575_v53, %v6627_v48  ;;  %v6716_v56 = vadd.f32 %v4630_v57, %v3109_v62 }
 0x19d   :  { %v6718_v38 = vadd.f32 %v4633_v55, %v3112_v22  ;;  %v4576_v18 = vpop.f32.mrb[80].mxu1  ;;  %v4634_v63 = vpop.f32.mrb[84].mxu0 }
 0x19e   :  { %v4577_v0 = vpop.f32.mrb[81].mxu1  ;;  %v4635_v1 = vpop.f32.mrb[85].mxu0 }
 0x19f   :  { %v4578_v2 = vadd.f32 %v4577_v0, %v4576_v18  ;;  %v4579_v8 = vpop.f32.mrb[82].mxu1  ;;  %v4636_v58 = vadd.f32 %v4635_v1, %v4634_v63  ;;  %v4637_v60 = vpop.f32.mrb[86].mxu0 }
 0x1a0   :  { %v4580_v9 = vpop.f32.mrb[83].mxu1  ;;  %v4638_v61 = vpop.f32.mrb[87].mxu0 }
 0x1a1   :  { %v3117_v47 = vadd.f32 %v4578_v2, %v6641_v6  ;;  %v4581_v25 = vadd.f32 %v4580_v9, %v4579_v8  ;;  %v4639_v11 = vadd.f32 %v4638_v61, %v4637_v60 }
 0x1a3   :  { %v3120_v48 = vadd.f32 %v4581_v25, %v6645_v7  ;;  %v6722_v12 = vadd.f32 %v4636_v58, %v3117_v47 }
 0x1a5   :  { %v6724_v13 = vadd.f32 %v4639_v11, %v3120_v48  ;;  %v4582_v14 = vpop.f32.mrb[84].mxu1  ;;  %v4640_v15 = vpop.f32.mrb[88].mxu0 }
 0x1a6   :  { %v4583_v16 = vpop.f32.mrb[85].mxu1  ;;  %v4641_v54 = vpop.f32.mrb[89].mxu0 }
 0x1a7   :  { %v4584_v17 = vadd.f32 %v4583_v16, %v4582_v14  ;;  %v4585_v19 = vpop.f32.mrb[86].mxu1  ;;  %v4642_v23 = vadd.f32 %v4641_v54, %v4640_v15  ;;  %v4643_v33 = vpop.f32.mrb[90].mxu0 }
 0x1a8   :  { %v4586_v31 = vpop.f32.mrb[87].mxu1  ;;  %v4644_v24 = vpop.f32.mrb[91].mxu0 }
 0x1a9   :  { %v3125_v6 = vadd.f32 %v4584_v17, %v6659_v27  ;;  %v4587_v28 = vadd.f32 %v4586_v31, %v4585_v19  ;;  %v4645_v34 = vadd.f32 %v4644_v24, %v4643_v33 }
 0x1ab   :  { %v3128_v7 = vadd.f32 %v4587_v28, %v6663_v29  ;;  %v6728_v32 = vadd.f32 %v4642_v23, %v3125_v6 }
 0x1ad   :  { %v6730_v59 = vadd.f32 %v4645_v34, %v3128_v7  ;;  %v4588_v35 = vpop.f32.mrb[88].mxu1  ;;  %v4646_v3 = vpop.f32.mrb[92].mxu0 }
 0x1ae   :  { %v4589_v37 = vpop.f32.mrb[89].mxu1  ;;  %v4647_v40 = vpop.f32.mrb[93].mxu0 }
 0x1af   :  { %v4590_v41 = vadd.f32 %v4589_v37, %v4588_v35  ;;  %v4591_v42 = vpop.f32.mrb[90].mxu1  ;;  %v4648_v4 = vadd.f32 %v4647_v40, %v4646_v3  ;;  %v4649_v45 = vpop.f32.mrb[94].mxu0 }
 0x1b0   :  { %v4592_v46 = vpop.f32.mrb[91].mxu1  ;;  %v4650_v36 = vpop.f32.mrb[95].mxu0 }
 0x1b1   :  { %v3133_v27 = vadd.f32 %v4590_v41, %v6677_v10  ;;  %v4593_v49 = vadd.f32 %v4592_v46, %v4591_v42  ;;  %v4651_v30 = vadd.f32 %v4650_v36, %v4649_v45 }
 0x1b3   :  { %v3136_v29 = vadd.f32 %v4593_v49, %v6684_v50  ;;  %v6734_v26 = vadd.f32 %v4648_v4, %v3133_v27 }
 0x1b5   :  { %v6736_v57 = vadd.f32 %v4651_v30, %v3136_v29  ;;  %v4594_v39 = vpop.f32.mrb[92].mxu1  ;;  %v4652_v51 = vpop.f32.mrb[96].mxu0 }
 0x1b6   :  { %v4595_v21 = vpop.f32.mrb[93].mxu1  ;;  %v4653_v62 = vpop.f32.mrb[97].mxu0 }
 0x1b7   :  { %v4596_v53 = vadd.f32 %v4595_v21, %v4594_v39  ;;  %v4597_v55 = vpop.f32.mrb[94].mxu1  ;;  %v4654_v22 = vadd.f32 %v4653_v62, %v4652_v51  ;;  %v4655_v18 = vpop.f32.mrb[98].mxu0 }
 0x1b8   :  { %v4598_v63 = vpop.f32.mrb[95].mxu1  ;;  %v4656_v0 = vpop.f32.mrb[99].mxu0 }
 0x1b9   :  { %v3141_v10 = vadd.f32 %v4596_v53, %v6694_v5 }
 0x1bb   :  { %v6739_v1 = vadd.f32 %v4654_v22, %v3141_v10 }
 0x1bd   :  { %v4674_v2 = vpop.f32.mrb[96].mxu1  ;;  %v4732_v50 = vpop.f32.mrb[100].mxu0 }
 0x1be   :  { %v4675_v8 = vpop.f32.mrb[97].mxu1  ;;  %v4733_v58 = vpop.f32.mrb[101].mxu0 }
 0x1bf   :  { %v4676_v60 = vadd.f32 %v4675_v8, %v4674_v2  ;;  %v4677_v9 = vpop.f32.mrb[98].mxu1  ;;  %v4734_v61 = vadd.f32 %v4733_v58, %v4732_v50  ;;  %v4735_v47 = vpop.f32.mrb[102].mxu0 }
 0x1c0   :  { %v4678_v25 = vpop.f32.mrb[99].mxu1  ;;  %v4736_v11 = vpop.f32.mrb[103].mxu0 }
 0x1c1   :  { %v3269_v48 = vadd.f32 %v4676_v60, %v6704_v52  ;;  %v4679_v14 = vadd.f32 %v4678_v25, %v4677_v9  ;;  %v4737_v15 = vadd.f32 %v4736_v11, %v4735_v47 }
 0x1c3   :  { %v3272_v16 = vadd.f32 %v4679_v14, %v6706_v20  ;;  %v6743_v54 = vadd.f32 %v4734_v61, %v3269_v48 }
 0x1c5   :  { %v6745_v5 = vadd.f32 %v4737_v15, %v3272_v16  ;;  %v4680_v17 = vpop.f32.mrb[100].mxu1  ;;  %v4738_v19 = vpop.f32.mrb[104].mxu0 }
 0x1c6   :  { %v4681_v23 = vpop.f32.mrb[101].mxu1  ;;  %v4739_v33 = vpop.f32.mrb[105].mxu0 }
 0x1c7   :  { %v4682_v31 = vadd.f32 %v4681_v23, %v4680_v17  ;;  %v4683_v24 = vpop.f32.mrb[102].mxu1  ;;  %v4740_v6 = vadd.f32 %v4739_v33, %v4738_v19  ;;  %v4741_v28 = vpop.f32.mrb[106].mxu0 }
 0x1c8   :  { %v4684_v34 = vpop.f32.mrb[103].mxu1  ;;  %v4742_v7 = vpop.f32.mrb[107].mxu0 }
 0x1c9   :  { %v3277_v52 = vadd.f32 %v4682_v31, %v6710_v43  ;;  %v4685_v35 = vadd.f32 %v4684_v34, %v4683_v24  ;;  %v4743_v3 = vadd.f32 %v4742_v7, %v4741_v28 }
 0x1cb   :  { %v3280_v20 = vadd.f32 %v4685_v35, %v6712_v44  ;;  %v6749_v37 = vadd.f32 %v4740_v6, %v3277_v52 }
 0x1cd   :  { %v6751_v40 = vadd.f32 %v4743_v3, %v3280_v20  ;;  %v4686_v41 = vpop.f32.mrb[104].mxu1  ;;  %v4744_v42 = vpop.f32.mrb[108].mxu0 }
 0x1ce   :  { %v4687_v4 = vpop.f32.mrb[105].mxu1  ;;  %v4745_v45 = vpop.f32.mrb[109].mxu0 }
 0x1cf   :  { %v4688_v46 = vadd.f32 %v4687_v4, %v4686_v41  ;;  %v4689_v36 = vpop.f32.mrb[106].mxu1  ;;  %v4746_v27 = vadd.f32 %v4745_v45, %v4744_v42  ;;  %v4747_v49 = vpop.f32.mrb[110].mxu0 }
 0x1d0   :  { %v4690_v30 = vpop.f32.mrb[107].mxu1  ;;  %v4748_v29 = vpop.f32.mrb[111].mxu0 }
 0x1d1   :  { %v3285_v43 = vadd.f32 %v4688_v46, %v6716_v56  ;;  %v4691_v39 = vadd.f32 %v4690_v30, %v4689_v36  ;;  %v4749_v51 = vadd.f32 %v4748_v29, %v4747_v49 }
 0x1d3   :  { %v3288_v44 = vadd.f32 %v4691_v39, %v6718_v38  ;;  %v6755_v21 = vadd.f32 %v4746_v27, %v3285_v43 }
 0x1d5   :  { %v6757_v62 = vadd.f32 %v4749_v51, %v3288_v44  ;;  %v4692_v53 = vpop.f32.mrb[108].mxu1  ;;  %v4750_v55 = vpop.f32.mrb[112].mxu0 }
 0x1d6   :  { %v4693_v22 = vpop.f32.mrb[109].mxu1  ;;  %v4751_v18 = vpop.f32.mrb[113].mxu0 }
 0x1d7   :  { %v4694_v63 = vadd.f32 %v4693_v22, %v4692_v53  ;;  %v4695_v0 = vpop.f32.mrb[110].mxu1  ;;  %v4752_v10 = vadd.f32 %v4751_v18, %v4750_v55  ;;  %v4753_v2 = vpop.f32.mrb[114].mxu0 }
 0x1d8   :  { %v4696_v50 = vpop.f32.mrb[111].mxu1  ;;  %v4754_v8 = vpop.f32.mrb[115].mxu0 }
 0x1d9   :  { %v3293_v56 = vadd.f32 %v4694_v63, %v6722_v12  ;;  %v4697_v58 = vadd.f32 %v4696_v50, %v4695_v0  ;;  %v4755_v60 = vadd.f32 %v4754_v8, %v4753_v2 }
 0x1db   :  { %v3296_v38 = vadd.f32 %v4697_v58, %v6724_v13  ;;  %v6761_v9 = vadd.f32 %v4752_v10, %v3293_v56 }
 0x1dd   :  { %v6763_v61 = vadd.f32 %v4755_v60, %v3296_v38  ;;  %v4698_v47 = vpop.f32.mrb[112].mxu1  ;;  %v4756_v25 = vpop.f32.mrb[116].mxu0 }
 0x1de   :  { %v4699_v11 = vpop.f32.mrb[113].mxu1  ;;  %v4757_v48 = vpop.f32.mrb[117].mxu0 }
 0x1df   :  { %v4700_v14 = vadd.f32 %v4699_v11, %v4698_v47  ;;  %v4701_v15 = vpop.f32.mrb[114].mxu1  ;;  %v4758_v16 = vadd.f32 %v4757_v48, %v4756_v25  ;;  %v4759_v17 = vpop.f32.mrb[118].mxu0 }
 0x1e0   :  { %v4702_v19 = vpop.f32.mrb[115].mxu1  ;;  %v4760_v23 = vpop.f32.mrb[119].mxu0 }
 0x1e1   :  { %v3301_v12 = vadd.f32 %v4700_v14, %v6728_v32  ;;  %v4703_v33 = vadd.f32 %v4702_v19, %v4701_v15  ;;  %v4761_v31 = vadd.f32 %v4760_v23, %v4759_v17 }
 0x1e3   :  { %v3304_v13 = vadd.f32 %v4703_v33, %v6730_v59  ;;  %v6767_v24 = vadd.f32 %v4758_v16, %v3301_v12 }
 0x1e5   :  { %v6769_v6 = vadd.f32 %v4761_v31, %v3304_v13  ;;  %v4704_v28 = vpop.f32.mrb[116].mxu1  ;;  %v4762_v34 = vpop.f32.mrb[120].mxu0 }
 0x1e6   :  { %v4705_v7 = vpop.f32.mrb[117].mxu1  ;;  %v4763_v52 = vpop.f32.mrb[121].mxu0 }
 0x1e7   :  { %v4706_v35 = vadd.f32 %v4705_v7, %v4704_v28  ;;  %v4707_v3 = vpop.f32.mrb[118].mxu1  ;;  %v4764_v20 = vadd.f32 %v4763_v52, %v4762_v34  ;;  %v4765_v41 = vpop.f32.mrb[122].mxu0 }
 0x1e8   :  { %v4708_v42 = vpop.f32.mrb[119].mxu1  ;;  %v4766_v4 = vpop.f32.mrb[123].mxu0 }
 0x1e9   :  { %v3309_v32 = vadd.f32 %v4706_v35, %v6734_v26  ;;  %v4709_v45 = vadd.f32 %v4708_v42, %v4707_v3  ;;  %v4767_v46 = vadd.f32 %v4766_v4, %v4765_v41 }
 0x1eb   :  { %v3312_v59 = vadd.f32 %v4709_v45, %v6736_v57  ;;  %v6773_v36 = vadd.f32 %v4764_v20, %v3309_v32 }
 0x1ed   :  { %v6775_v27 = vadd.f32 %v4767_v46, %v3312_v59  ;;  %v4710_v49 = vpop.f32.mrb[120].mxu1  ;;  %v4768_v30 = vpop.f32.mrb[124].mxu0 }
 0x1ee   :  { %v4711_v29 = vpop.f32.mrb[121].mxu1  ;;  %v4769_v43 = vpop.f32.mrb[125].mxu0 }
 0x1ef   :  { %v4712_v39 = vadd.f32 %v4711_v29, %v4710_v49  ;;  %v4713_v51 = vpop.f32.mrb[122].mxu1  ;;  %v4770_v44 = vadd.f32 %v4769_v43, %v4768_v30  ;;  %v4771_v53 = vpop.f32.mrb[126].mxu0 }
 0x1f0   :  { %v4714_v55 = vpop.f32.mrb[123].mxu1  ;;  %v4772_v22 = vpop.f32.mrb[127].mxu0 }
 0x1f1   :  { %v3317_v26 = vadd.f32 %v4712_v39, %v6739_v1 }
 0x1f3   :  { %v6778_v18 = vadd.f32 %v4770_v44, %v3317_v26 }
 0x1f5   :  { %v4790_v63 = vpop.f32.mrb[124].mxu1  ;;  %v4848_v57 = vpop.f32.mrb[128].mxu0 }
 0x1f6   :  { %v4791_v0 = vpop.f32.mrb[125].mxu1  ;;  %v4849_v10 = vpop.f32.mrb[129].mxu0 }
 0x1f7   :  { %v4792_v2 = vadd.f32 %v4791_v0, %v4790_v63  ;;  %v4793_v50 = vpop.f32.mrb[126].mxu1  ;;  %v4850_v8 = vadd.f32 %v4849_v10, %v4848_v57  ;;  %v4851_v56 = vpop.f32.mrb[130].mxu0 }
 0x1f8   :  { %v4794_v58 = vpop.f32.mrb[127].mxu1  ;;  %v4852_v60 = vpop.f32.mrb[131].mxu0 }
 0x1f9   :  { %v3445_v38 = vadd.f32 %v4792_v2, %v6743_v54  ;;  %v4795_v47 = vadd.f32 %v4794_v58, %v4793_v50  ;;  %v4853_v25 = vadd.f32 %v4852_v60, %v4851_v56 }
 0x1fb   :  { %v3448_v11 = vadd.f32 %v4795_v47, %v6745_v5  ;;  %v6782_v48 = vadd.f32 %v4850_v8, %v3445_v38 }
 0x1fd   :  { %v6784_v1 = vadd.f32 %v4853_v25, %v3448_v11  ;;  %v4796_v14 = vpop.f32.mrb[128].mxu1  ;;  %v4854_v15 = vpop.f32.mrb[132].mxu0 }
 0x1fe   :  { %v4797_v16 = vpop.f32.mrb[129].mxu1  ;;  %v4855_v17 = vpop.f32.mrb[133].mxu0 }
 0x1ff   :  { %v4798_v19 = vadd.f32 %v4797_v16, %v4796_v14  ;;  %v4799_v23 = vpop.f32.mrb[130].mxu1  ;;  %v4856_v12 = vadd.f32 %v4855_v17, %v4854_v15  ;;  %v4857_v33 = vpop.f32.mrb[134].mxu0 }
 0x200   :  { %v4800_v31 = vpop.f32.mrb[131].mxu1  ;;  %v4858_v13 = vpop.f32.mrb[135].mxu0 }
 0x201   :  { %v3453_v54 = vadd.f32 %v4798_v19, %v6749_v37  ;;  %v4801_v28 = vadd.f32 %v4800_v31, %v4799_v23  ;;  %v4859_v34 = vadd.f32 %v4858_v13, %v4857_v33 }
 0x203   :  { %v3456_v5 = vadd.f32 %v4801_v28, %v6751_v40  ;;  %v6788_v7 = vadd.f32 %v4856_v12, %v3453_v54 }
 0x205   :  { %v6790_v52 = vadd.f32 %v4859_v34, %v3456_v5  ;;  %v4802_v35 = vpop.f32.mrb[132].mxu1  ;;  %v4860_v3 = vpop.f32.mrb[136].mxu0 }
 0x206   :  { %v4803_v20 = vpop.f32.mrb[133].mxu1  ;;  %v4861_v41 = vpop.f32.mrb[137].mxu0 }
 0x207   :  { %v4804_v42 = vadd.f32 %v4803_v20, %v4802_v35  ;;  %v4805_v4 = vpop.f32.mrb[134].mxu1  ;;  %v4862_v32 = vadd.f32 %v4861_v41, %v4860_v3  ;;  %v4863_v45 = vpop.f32.mrb[138].mxu0 }
 0x208   :  { %v4806_v46 = vpop.f32.mrb[135].mxu1  ;;  %v4864_v59 = vpop.f32.mrb[139].mxu0 }
 0x209   :  { %v3461_v37 = vadd.f32 %v4804_v42, %v6755_v21  ;;  %v4807_v49 = vadd.f32 %v4806_v46, %v4805_v4  ;;  %v4865_v30 = vadd.f32 %v4864_v59, %v4863_v45 }
 0x20b   :  { %v3464_v40 = vadd.f32 %v4807_v49, %v6757_v62  ;;  %v6794_v29 = vadd.f32 %v4862_v32, %v3461_v37 }
 0x20d   :  { %v6796_v43 = vadd.f32 %v4865_v30, %v3464_v40  ;;  %v4808_v39 = vpop.f32.mrb[136].mxu1  ;;  %v4866_v51 = vpop.f32.mrb[140].mxu0 }
 0x20e   :  { %v4809_v44 = vpop.f32.mrb[137].mxu1  ;;  %v4867_v53 = vpop.f32.mrb[141].mxu0 }
 0x20f   :  { %v4810_v55 = vadd.f32 %v4809_v44, %v4808_v39  ;;  %v4811_v22 = vpop.f32.mrb[138].mxu1  ;;  %v4868_v26 = vadd.f32 %v4867_v53, %v4866_v51  ;;  %v4869_v63 = vpop.f32.mrb[142].mxu0 }
 0x210   :  { %v4812_v57 = vpop.f32.mrb[139].mxu1  ;;  %v4870_v0 = vpop.f32.mrb[143].mxu0 }
 0x211   :  { %v3469_v21 = vadd.f32 %v4810_v55, %v6761_v9  ;;  %v4813_v10 = vadd.f32 %v4812_v57, %v4811_v22  ;;  %v4871_v2 = vadd.f32 %v4870_v0, %v4869_v63 }
 0x213   :  { %v3472_v62 = vadd.f32 %v4813_v10, %v6763_v61  ;;  %v6800_v50 = vadd.f32 %v4868_v26, %v3469_v21 }
 0x215   :  { %v6802_v8 = vadd.f32 %v4871_v2, %v3472_v62  ;;  %v4814_v56 = vpop.f32.mrb[140].mxu1  ;;  %v4872_v58 = vpop.f32.mrb[144].mxu0 }
 0x216   :  { %v4815_v60 = vpop.f32.mrb[141].mxu1  ;;  %v4873_v38 = vpop.f32.mrb[145].mxu0 }
 0x217   :  { %v4816_v47 = vadd.f32 %v4815_v60, %v4814_v56  ;;  %v4817_v25 = vpop.f32.mrb[142].mxu1  ;;  %v4874_v11 = vadd.f32 %v4873_v38, %v4872_v58  ;;  %v4875_v14 = vpop.f32.mrb[146].mxu0 }
 0x218   :  { %v4818_v15 = vpop.f32.mrb[143].mxu1  ;;  %v4876_v16 = vpop.f32.mrb[147].mxu0 }
 0x219   :  { %v3477_v9 = vadd.f32 %v4816_v47, %v6767_v24  ;;  %v4819_v17 = vadd.f32 %v4818_v15, %v4817_v25  ;;  %v4877_v19 = vadd.f32 %v4876_v16, %v4875_v14 }
 0x21b   :  { %v3480_v61 = vadd.f32 %v4819_v17, %v6769_v6  ;;  %v6806_v23 = vadd.f32 %v4874_v11, %v3477_v9 }
 0x21d   :  { %v6808_v12 = vadd.f32 %v4877_v19, %v3480_v61  ;;  %v4820_v33 = vpop.f32.mrb[144].mxu1  ;;  %v4878_v31 = vpop.f32.mrb[148].mxu0 }
 0x21e   :  { %v4821_v13 = vpop.f32.mrb[145].mxu1  ;;  %v4879_v54 = vpop.f32.mrb[149].mxu0 }
 0x21f   :  { %v4822_v28 = vadd.f32 %v4821_v13, %v4820_v33  ;;  %v4823_v34 = vpop.f32.mrb[146].mxu1  ;;  %v4880_v5 = vadd.f32 %v4879_v54, %v4878_v31  ;;  %v4881_v35 = vpop.f32.mrb[150].mxu0 }
 0x220   :  { %v4824_v3 = vpop.f32.mrb[147].mxu1  ;;  %v4882_v20 = vpop.f32.mrb[151].mxu0 }
 0x221   :  { %v3485_v24 = vadd.f32 %v4822_v28, %v6773_v36  ;;  %v4825_v41 = vadd.f32 %v4824_v3, %v4823_v34  ;;  %v4883_v42 = vadd.f32 %v4882_v20, %v4881_v35 }
 0x223   :  { %v3488_v6 = vadd.f32 %v4825_v41, %v6775_v27  ;;  %v6812_v4 = vadd.f32 %v4880_v5, %v3485_v24 }
 0x225   :  { %v6814_v32 = vadd.f32 %v4883_v42, %v3488_v6  ;;  %v4826_v45 = vpop.f32.mrb[148].mxu1  ;;  %v4884_v46 = vpop.f32.mrb[152].mxu0 }
 0x226   :  { %v4827_v59 = vpop.f32.mrb[149].mxu1  ;;  %v4885_v37 = vpop.f32.mrb[153].mxu0 }
 0x227   :  { %v4828_v49 = vadd.f32 %v4827_v59, %v4826_v45  ;;  %v4829_v30 = vpop.f32.mrb[150].mxu1  ;;  %v4886_v40 = vadd.f32 %v4885_v37, %v4884_v46  ;;  %v4887_v39 = vpop.f32.mrb[154].mxu0 }
 0x228   :  { %v4830_v51 = vpop.f32.mrb[151].mxu1  ;;  %v4888_v44 = vpop.f32.mrb[155].mxu0 }
 0x229   :  { %v3493_v36 = vadd.f32 %v4828_v49, %v6778_v18 }
 0x22b   :  { %v6817_v53 = vadd.f32 %v4886_v40, %v3493_v36 }
 0x22d   :  { %v4906_v55 = vpop.f32.mrb[152].mxu1  ;;  %v3708_v27 = vpop.f32.mrb[156].mxu0 }
 0x22e   :  { %v4907_v22 = vpop.f32.mrb[153].mxu1  ;;  %v4969_v26 = vpop.f32.mrb[157].mxu0 }
 0x22f   :  { %v4908_v63 = vadd.f32 %v4907_v22, %v4906_v55  ;;  %v4909_v57 = vpop.f32.mrb[154].mxu1  ;;  %v3711_v0 = vpop.f32.mrb[158].mxu0 }
 0x230   :  { %v4910_v21 = vpop.f32.mrb[155].mxu1  ;;  %v4970_v10 = vpop.f32.mrb[159].mxu0 }
 0x231   :  { %v4911_v2 = vadd.f32 %v4910_v21, %v4909_v57  ;;  %v3621_v62 = vadd.f32 %v4908_v63, %v6782_v48 }
 0x233   :  { %v3709_v56 = vadd.f32 %v3708_v27, %v3621_v62  ;;  %v3624_v58 = vadd.f32 %v4911_v2, %v6784_v1 }
 0x235   :  { %v3762_v60 = vmax.f32 %v3709_v56, 0.0  ;;  %v3712_v38 = vadd.f32 %v3711_v0, %v3624_v58  ;;  %v4912_v18 = vpop.f32.mrb[156].mxu1  ;;  %v3716_v47 = vpop.f32.mrb[160].mxu0 }
 0x236   :  { %v4913_v25 = vpop.f32.mrb[157].mxu1  ;;  %v4973_v11 = vpop.f32.mrb[161].mxu0 }
 0x237   :  { %v4239_v14 = vpack.c.bf16 %v3762_v60, %v3762_v60  ;;  %v3763_v15 = vmax.f32 %v3712_v38, 0.0  ;;  %v4914_v16 = vadd.f32 %v4913_v25, %v4912_v18  ;;  %v4915_v9 = vpop.f32.mrb[158].mxu1  ;;  %v3719_v17 = vpop.f32.mrb[162].mxu0 }
 0x238   :  { %v4916_v19 = vpop.f32.mrb[159].mxu1  ;;  %v4974_v61 = vpop.f32.mrb[163].mxu0 }
 0x239   :  { %3829 = vst.msk [vmem:[%s6886_s3] sm:$0xf] %vm3828_vm2, %v4239_v14  ;;  %v4240_v48 = vpack.c.bf16 %v3763_v15, %v3763_v15  ;;  %v4917_v1 = vadd.f32 %v4916_v19, %v4915_v9  ;;  %v3629_v33 = vadd.f32 %v4914_v16, %v6788_v7 }
 0x23b   :  { %3830 = vst.msk [vmem:[%s6886_s3 + $0x4] sm:$0xf] %vm3828_vm2, %v4240_v48  ;;  %v3717_v31 = vadd.f32 %v3716_v47, %v3629_v33  ;;  %v3632_v13 = vadd.f32 %v4917_v1, %v6790_v52 }
 0x23d   :  { %v3764_v54 = vmax.f32 %v3717_v31, 0.0  ;;  %v3720_v28 = vadd.f32 %v3719_v17, %v3632_v13  ;;  %v4918_v34 = vpop.f32.mrb[160].mxu1  ;;  %v3724_v5 = vpop.f32.mrb[164].mxu0 }
 0x23e   :  { %v4919_v35 = vpop.f32.mrb[161].mxu1  ;;  %v4977_v3 = vpop.f32.mrb[165].mxu0 }
 0x23f   :  { %v4241_v20 = vpack.c.bf16 %v3764_v54, %v3764_v54  ;;  %v3765_v24 = vmax.f32 %v3720_v28, 0.0  ;;  %v4920_v41 = vadd.f32 %v4919_v35, %v4918_v34  ;;  %v4921_v42 = vpop.f32.mrb[162].mxu1  ;;  %v3727_v6 = vpop.f32.mrb[166].mxu0 }
 0x240   :  { %v4922_v7 = vpop.f32.mrb[163].mxu1  ;;  %v4978_v45 = vpop.f32.mrb[167].mxu0 }
 0x241   :  { %3831 = vst.msk [vmem:[%s6886_s3 + $0x8] sm:$0xf] %vm3828_vm2, %v4241_v20  ;;  %v4242_v46 = vpack.c.bf16 %v3765_v24, %v3765_v24  ;;  %v4923_v52 = vadd.f32 %v4922_v7, %v4921_v42  ;;  %v3637_v59 = vadd.f32 %v4920_v41, %v6794_v29 }
 0x243   :  { %3832 = vst.msk [vmem:[%s6886_s3 + $0xc] sm:$0xf] %vm3828_vm2, %v4242_v46  ;;  %v3725_v37 = vadd.f32 %v3724_v5, %v3637_v59  ;;  %v3640_v49 = vadd.f32 %v4923_v52, %v6796_v43 }
 0x245   :  { %v3766_v30 = vmax.f32 %v3725_v37, 0.0  ;;  %v3728_v40 = vadd.f32 %v3727_v6, %v3640_v49  ;;  %v4924_v39 = vpop.f32.mrb[164].mxu1  ;;  %v3732_v51 = vpop.f32.mrb[168].mxu0 }
 0x246   :  { %v4925_v44 = vpop.f32.mrb[165].mxu1  ;;  %v4981_v36 = vpop.f32.mrb[169].mxu0 }
 0x247   :  { %v4243_v55 = vpack.c.bf16 %v3766_v30, %v3766_v30  ;;  %v3767_v27 = vmax.f32 %v3728_v40, 0.0  ;;  %v4926_v22 = vadd.f32 %v4925_v44, %v4924_v39  ;;  %v4927_v26 = vpop.f32.mrb[166].mxu1  ;;  %v3735_v63 = vpop.f32.mrb[170].mxu0 }
 0x248   :  { %v4928_v29 = vpop.f32.mrb[167].mxu1  ;;  %v4982_v57 = vpop.f32.mrb[171].mxu0 }
 0x249   :  { %3833 = vst.msk [vmem:[%s6886_s3 + $0x10] sm:$0xf] %vm3828_vm2, %v4243_v55  ;;  %v4244_v0 = vpack.c.bf16 %v3767_v27, %v3767_v27  ;;  %v4929_v43 = vadd.f32 %v4928_v29, %v4927_v26  ;;  %v3645_v21 = vadd.f32 %v4926_v22, %v6800_v50 }
 0x24b   :  { %3834 = vst.msk [vmem:[%s6886_s3 + $0x14] sm:$0xf] %vm3828_vm2, %v4244_v0  ;;  %v3733_v10 = vadd.f32 %v3732_v51, %v3645_v21  ;;  %v3648_v2 = vadd.f32 %v4929_v43, %v6802_v8 }
 0x24d   :  { %v3768_v62 = vmax.f32 %v3733_v10, 0.0  ;;  %v3736_v56 = vadd.f32 %v3735_v63, %v3648_v2  ;;  %v4930_v58 = vpop.f32.mrb[168].mxu1  ;;  %v3740_v60 = vpop.f32.mrb[172].mxu0 }
 0x24e   :  { %v4931_v38 = vpop.f32.mrb[169].mxu1  ;;  %v4985_v18 = vpop.f32.mrb[173].mxu0 }
 0x24f   :  { %v4245_v47 = vpack.c.bf16 %v3768_v62, %v3768_v62  ;;  %v3769_v25 = vmax.f32 %v3736_v56, 0.0  ;;  %v4932_v11 = vadd.f32 %v4931_v38, %v4930_v58  ;;  %v4933_v14 = vpop.f32.mrb[170].mxu1  ;;  %v3743_v15 = vpop.f32.mrb[174].mxu0 }
 0x250   :  { %v4934_v50 = vpop.f32.mrb[171].mxu1  ;;  %v4986_v16 = vpop.f32.mrb[175].mxu0 }
 0x251   :  { %3835 = vst.msk [vmem:[%s6886_s3 + $0x18] sm:$0xf] %vm3828_vm2, %v4245_v47  ;;  %v4246_v9 = vpack.c.bf16 %v3769_v25, %v3769_v25  ;;  %v4935_v8 = vadd.f32 %v4934_v50, %v4933_v14  ;;  %v3653_v17 = vadd.f32 %v4932_v11, %v6806_v23 }
 0x253   :  { %3836 = vst.msk [vmem:[%s6886_s3 + $0x1c] sm:$0xf] %vm3828_vm2, %v4246_v9  ;;  %v3741_v19 = vadd.f32 %v3740_v60, %v3653_v17  ;;  %v3656_v61 = vadd.f32 %v4935_v8, %v6808_v12 }
 0x255   :  { %v3770_v48 = vmax.f32 %v3741_v19, 0.0  ;;  %v3744_v1 = vadd.f32 %v3743_v15, %v3656_v61  ;;  %v4936_v33 = vpop.f32.mrb[172].mxu1  ;;  %v3748_v31 = vpop.f32.mrb[176].mxu0 }
 0x256   :  { %v4937_v13 = vpop.f32.mrb[173].mxu1  ;;  %v4989_v54 = vpop.f32.mrb[177].mxu0 }
 0x257   :  { %v4247_v28 = vpack.c.bf16 %v3770_v48, %v3770_v48  ;;  %v3771_v34 = vmax.f32 %v3744_v1, 0.0  ;;  %v4938_v5 = vadd.f32 %v4937_v13, %v4936_v33  ;;  %v4939_v35 = vpop.f32.mrb[174].mxu1  ;;  %v3751_v3 = vpop.f32.mrb[178].mxu0 }
 0x258   :  { %v4940_v23 = vpop.f32.mrb[175].mxu1  ;;  %v4990_v20 = vpop.f32.mrb[179].mxu0 }
 0x259   :  { %3837 = vst.msk [vmem:[%s6886_s3 + $0x20] sm:$0xf] %vm3828_vm2, %v4247_v28  ;;  %v4248_v24 = vpack.c.bf16 %v3771_v34, %v3771_v34  ;;  %v4941_v12 = vadd.f32 %v4940_v23, %v4939_v35  ;;  %v3661_v41 = vadd.f32 %v4938_v5, %v6812_v4 }
 0x25b   :  { %3838 = vst.msk [vmem:[%s6886_s3 + $0x24] sm:$0xf] %vm3828_vm2, %v4248_v24  ;;  %v3749_v42 = vadd.f32 %v3748_v31, %v3661_v41  ;;  %v3664_v6 = vadd.f32 %v4941_v12, %v6814_v32 }
 0x25d   :  { %v3772_v7 = vmax.f32 %v3749_v42, 0.0  ;;  %v3752_v45 = vadd.f32 %v3751_v3, %v3664_v6  ;;  %v4942_v46 = vpop.f32.mrb[176].mxu1  ;;  %v3756_v52 = vpop.f32.mrb[180].mxu0 }
 0x25e   :  { %v4943_v59 = vpop.f32.mrb[177].mxu1  ;;  %v4993_v37 = vpop.f32.mrb[181].mxu0 }
 0x25f   :  { %v4249_v49 = vpack.c.bf16 %v3772_v7, %v3772_v7  ;;  %v3773_v30 = vmax.f32 %v3752_v45, 0.0  ;;  %v4944_v40 = vadd.f32 %v4943_v59, %v4942_v46  ;;  %v4945_v39 = vpop.f32.mrb[178].mxu1  ;;  %v3759_v51 = vpop.f32.mrb[182].mxu0 }
 0x260   :  { %v4946_v4 = vpop.f32.mrb[179].mxu1  ;;  %v4994_v44 = vpop.f32.mrb[183].mxu0 }
 0x261   :  { %3839 = vst.msk [vmem:[%s6886_s3 + $0x28] sm:$0xf] %vm3828_vm2, %v4249_v49  ;;  %v4250_v36 = vpack.c.bf16 %v3773_v30, %v3773_v30  ;;  %v3669_v32 = vadd.f32 %v4944_v40, %v6817_v53 }
 0x263   :  { %3840 = vst.msk [vmem:[%s6886_s3 + $0x2c] sm:$0xf] %vm3828_vm2, %v4250_v36  ;;  %v3757_v55 = vadd.f32 %v3756_v52, %v3669_v32 }
 0x265   :  { %v3774_v27 = vmax.f32 %v3757_v55, 0.0 }
 0x267   :  { %v4251_v22 = vpack.c.bf16 %v3774_v27, %v3774_v27 }
 0x269   :  { %3842 = vst.msk [vmem:[%s6886_s3 + $0x30] sm:$0x1] %vm3841_vm3, %v4251_v22 }

// kernel: _lambda_.10
= control target key start
LH: loop header
LB: loop body
LE: loop exit
PB: predicated region body
PF: predicated region fallthrough
CT: control target
= control target key end

     0   :  { %v2040_v0 = vmov 0   ;;  %v2041_v2 = vmov 0.0   ;;  %vm2042_vm0 = vmmov 0   ;;  %vm634_vm1 = vcmask 261120   ;;  %s2814_s1 = inlined_call_operand.vmem [shape: bf16[288,16], index: 1, kind: input, shape index: {}]   ;;  %s2815_s0 = inlined_call_operand.vmem [shape: bf16[392,288], index: 0, kind: input, shape index: {}]   ;;  %s2816_s2 = inlined_call_operand.vmem [shape: f32[1,16], index: 2, kind: input, shape index: {}]   ;;  %s2817_s3 = inlined_call_operand.vmem [shape: bf16[392,16], index: 3, kind: output, shape index: {}]  }
   0x1   :  { %710 = vmatprep.subr.bf16.mxu1 %v2040_v0  ;;  %v1923_v1 = vld [vmem:[%s2814_s1] sm:$0xff]   ;;  %1718 = vmatprep.subr.bf16.mxu0 %v2041_v2  ;;  %v1924_v3 = vld [vmem:[%s2814_s1 + $0x8] sm:$0xff]   ;;  %v1925_v4 = vld [vmem:[%s2814_s1 + $0x10] sm:$0xff]   ;;  %vm1420_vm2 = vcmask 125952  }
   0x2   :  { %1722 = vmatprep.mubr.msk.bf16.mxu0 %vm2042_vm0, %v2041_v2  ;;  %711 = vmatpush1.bf16.msra.mxu1 %v1923_v1  ;;  %v1926_v5 = vld [vmem:[%s2814_s1 + $0x18] sm:$0xff]   ;;  %v1927_v6 = vld [vmem:[%s2814_s1 + $0x20] sm:$0xff]   ;;  %v1939_v8 = vld [vmem:[%s2814_s1 + $0x88] sm:$0xff]  }
   0x3   :  { %712 = vmatprep.subr.bf16.mxu1 %v2040_v0  ;;  %v1937_v7 = vld [vmem:[%s2814_s1 + $0x80] sm:$0xff]   ;;  %v1928_v9 = vld [vmem:[%s2814_s1 + $0x28] sm:$0xff]   ;;  %v1929_v12 = vld [vmem:[%s2814_s1 + $0x30] sm:$0xff]  }
   0x4   :  { %1719 = vmatpush3.bf16.msra.mxu0 %v1937_v7  ;;  %v1943_v10 = vld [vmem:[%s2815_s0 + $0x4] ss:$12 sps:$4 sm:$0xff]   ;;  %v1944_v11 = vld [vmem:[%s2815_s0 + $0x8] ss:$12 sps:$4 sm:$0xff]   ;;  %v1930_v13 = vld [vmem:[%s2814_s1 + $0x38] sm:$0xff]  }
   0x5   :  { %1720 = vmatprep.subr.bf16.mxu0 %v2041_v2  ;;  %742 = vmatprep.mubr.bf16.mxu1 %v1943_v10  ;;  %v1947_v14 = vld [vmem:[%s2815_s0 + $0x20] ss:$12 sps:$4 sm:$0xff]   ;;  %v1951_v17 = vld [vmem:[%s2815_s0 + $0x38] ss:$12 sps:$4 sm:$0xff]   ;;  %v1933_v18 = vld [vmem:[%s2814_s1 + $0x50] sm:$0xff]  }
   0x6   :  { %713 = vmatpush1.bf16.msra.mxu1 %v1924_v3  ;;  %v1931_v15 = vld [vmem:[%s2814_s1 + $0x40] sm:$0xff]   ;;  %v1932_v16 = vld [vmem:[%s2814_s1 + $0x48] sm:$0xff]   ;;  %v1934_v19 = vld [vmem:[%s2814_s1 + $0x58] sm:$0xff]  }
   0x7   :  { %714 = vmatprep.subr.bf16.mxu1 %v2040_v0  ;;  %v1955_v20 = vld [vmem:[%s2815_s0 + $0x50] ss:$12 sps:$4 sm:$0xff]   ;;  %v1935_v21 = vld [vmem:[%s2814_s1 + $0x60] sm:$0xff]   ;;  %v1936_v22 = vld [vmem:[%s2814_s1 + $0x68] sm:$0xff]  }
   0x8   :  { %1721 = vmatpush3.bf16.msra.mxu0 %v1939_v8  ;;  %v1959_v23 = vld [vmem:[%s2815_s0 + $0x68] ss:$12 sps:$4 sm:$0xff]   ;;  %v1940_v25 = vld [vmem:[%s2814_s1 + $0x78] sm:$0xff]   ;;  %v1963_v26 = vld [vmem:[%s2815_s0 + $0x80] ss:$12 sps:$4 sm:$0xff]  }
   0x9   :  { %v1938_v24 = vld [vmem:[%s2814_s1 + $0x70] sm:$0xff]   ;;  %v1941_v27 = vld [vmem:[%s2815_s0] ss:$12 sps:$4 sm:$0xff]   ;;  %v1945_v28 = vld [vmem:[%s2815_s0 + $0x1c] ss:$12 sps:$4 sm:$0xff]  }
   0xa   :  { %715 = vmatpush1.bf16.msra.mxu1 %v1925_v4  ;;  %v1967_v29 = vld [vmem:[%s2815_s0 + $0x98] ss:$12 sps:$4 sm:$0xff]   ;;  %v1949_v31 = vld [vmem:[%s2815_s0 + $0x34] ss:$12 sps:$4 sm:$0xff]   ;;  %v1971_v32 = vld [vmem:[%s2815_s0 + $0xb0] ss:$12 sps:$4 sm:$0xff]  }
   0xb   :  { %716 = vmatprep.subr.bf16.mxu1 %v2040_v0  ;;  %1723 = vmatmul.mubr.msk.bf16.vlgmr.msra.gmra.mrb[0].mxu0 %vm634_vm1, %v1944_v11  ;;  %v1948_v30 = vld [vmem:[%s2815_s0 + $0x18] ss:$12 sps:$4 sm:$0xff]   ;;  %v1952_v33 = vld [vmem:[%s2815_s0 + $0x30] ss:$12 sps:$4 sm:$0xff]   ;;  %v1975_v35 = vld [vmem:[%s2815_s0 + $0xc8] ss:$12 sps:$4 sm:$0xff]  }
   0xc   :  { %1726 = vmatprep.mubr.msk.bf16.mxu0 %vm2042_vm0, %v2041_v2  ;;  %v1953_v34 = vld [vmem:[%s2815_s0 + $0x4c] ss:$12 sps:$4 sm:$0xff]   ;;  %v1956_v36 = vld [vmem:[%s2815_s0 + $0x48] ss:$12 sps:$4 sm:$0xff]   ;;  %v1957_v37 = vld [vmem:[%s2815_s0 + $0x64] ss:$12 sps:$4 sm:$0xff]  }
   0xd   :  { %v1979_v38 = vld [vmem:[%s2815_s0 + $0xe0] ss:$12 sps:$4 sm:$0xff]   ;;  %v1961_v40 = vld [vmem:[%s2815_s0 + $0x7c] ss:$12 sps:$4 sm:$0xff]   ;;  %v1983_v41 = vld [vmem:[%s2815_s0 + $0xf8] ss:$12 sps:$4 sm:$0xff]  }
   0xe   :  { %717 = vmatpush1.bf16.msra.mxu1 %v1926_v5  ;;  %v1960_v39 = vld [vmem:[%s2815_s0 + $0x60] ss:$12 sps:$4 sm:$0xff]   ;;  %v1964_v42 = vld [vmem:[%s2815_s0 + $0x78] ss:$12 sps:$4 sm:$0xff]   ;;  %v1987_v44 = vld [vmem:[%s2815_s0 + $0x110] ss:$12 sps:$4 sm:$0xff]  }
   0xf   :  { %718 = vmatprep.subr.bf16.mxu1 %v2040_v0  ;;  %v1965_v43 = vld [vmem:[%s2815_s0 + $0x94] ss:$12 sps:$4 sm:$0xff]   ;;  %v1968_v45 = vld [vmem:[%s2815_s0 + $0x90] ss:$12 sps:$4 sm:$0xff]   ;;  %v1969_v46 = vld [vmem:[%s2815_s0 + $0xac] ss:$12 sps:$4 sm:$0xff]  }
  0x10   :  { %v1991_v47 = vld [vmem:[%s2815_s0 + $0x128] ss:$12 sps:$4 sm:$0xff]   ;;  %v1973_v49 = vld [vmem:[%s2815_s0 + $0xc4] ss:$12 sps:$4 sm:$0xff]   ;;  %v1995_v50 = vld [vmem:[%s2815_s0 + $0x140] ss:$12 sps:$4 sm:$0xff]  }
  0x11   :  { %v1972_v48 = vld [vmem:[%s2815_s0 + $0xa8] ss:$12 sps:$4 sm:$0xff]   ;;  %v1976_v51 = vld [vmem:[%s2815_s0 + $0xc0] ss:$12 sps:$4 sm:$0xff]   ;;  %v1999_v53 = vld [vmem:[%s2815_s0 + $0x158] ss:$12 sps:$4 sm:$0xff]  }
  0x12   :  { %719 = vmatpush1.bf16.msra.mxu1 %v1927_v6  ;;  %v1977_v52 = vld [vmem:[%s2815_s0 + $0xdc] ss:$12 sps:$4 sm:$0xff]   ;;  %v1980_v54 = vld [vmem:[%s2815_s0 + $0xd8] ss:$12 sps:$4 sm:$0xff]   ;;  %v1981_v55 = vld [vmem:[%s2815_s0 + $0xf4] ss:$12 sps:$4 sm:$0xff]  }
  0x13   :  { %720 = vmatprep.subr.bf16.mxu1 %v2040_v0  ;;  %1727 = vmatmul.mubr.msk.bf16.gmra.mrb[4].mxu0 %vm634_vm1, %v1947_v14  ;;  %v2003_v56 = vld [vmem:[%s2815_s0 + $0x170] ss:$12 sps:$4 sm:$0xff]   ;;  %v1985_v58 = vld [vmem:[%s2815_s0 + $0x10c] ss:$12 sps:$4 sm:$0xff]   ;;  %v2007_v59 = vld [vmem:[%s2815_s0 + $0x188] ss:$12 sps:$4 sm:$0xff]  }
  0x14   :  { %1730 = vmatprep.mubr.msk.bf16.mxu0 %vm2042_vm0, %v2041_v2  ;;  %v1984_v57 = vld [vmem:[%s2815_s0 + $0xf0] ss:$12 sps:$4 sm:$0xff]   ;;  %v1988_v60 = vld [vmem:[%s2815_s0 + $0x108] ss:$12 sps:$4 sm:$0xff]   ;;  %v2011_v62 = vld [vmem:[%s2815_s0 + $0x1a0] ss:$12 sps:$4 sm:$0xff]  }
  0x15   :  { %v1989_v61 = vld [vmem:[%s2815_s0 + $0x124] ss:$12 sps:$4 sm:$0xff]   ;;  %v1992_v63 = vld [vmem:[%s2815_s0 + $0x120] ss:$12 sps:$4 sm:$0xff]   ;;  %v2023_v8 = vld [vmem:[%s2815_s0 + $0x1e8] ss:$12 sps:$4 sm:$0xff]  }
  0x16   :  { %721 = vmatpush1.bf16.msra.mxu1 %v1928_v9  ;;  %v2015_v1 = vld [vmem:[%s2815_s0 + $0x1b8] ss:$12 sps:$4 sm:$0xff]   ;;  %v1997_v4 = vld [vmem:[%s2815_s0 + $0x154] ss:$12 sps:$4 sm:$0xff]   ;;  %v2019_v5 = vld [vmem:[%s2815_s0 + $0x1d0] ss:$12 sps:$4 sm:$0xff]  }
  0x17   :  { %722 = vmatprep.subr.bf16.mxu1 %v2040_v0  ;;  %v1996_v3 = vld [vmem:[%s2815_s0 + $0x138] ss:$12 sps:$4 sm:$0xff]   ;;  %v2000_v6 = vld [vmem:[%s2815_s0 + $0x150] ss:$12 sps:$4 sm:$0xff]   ;;  %v2004_v9 = vld [vmem:[%s2815_s0 + $0x168] ss:$12 sps:$4 sm:$0xff]  }
  0x18   :  { %v2001_v7 = vld [vmem:[%s2815_s0 + $0x16c] ss:$12 sps:$4 sm:$0xff]   ;;  %v2005_v10 = vld [vmem:[%s2815_s0 + $0x184] ss:$12 sps:$4 sm:$0xff]  }
  0x19   :  { %v2027_v11 = vld [vmem:[%s2815_s0 + $0x200] ss:$12 sps:$4 sm:$0xff]   ;;  %v2031_v14 = vld [vmem:[%s2815_s0 + $0x218] ss:$12 sps:$4 sm:$0xff]  }
  0x1a   :  { %723 = vmatpush1.bf16.msra.mxu1 %v1929_v12  ;;  %v2008_v12 = vld [vmem:[%s2815_s0 + $0x180] ss:$12 sps:$4 sm:$0xff]  }
  0x1b   :  { %724 = vmatprep.subr.bf16.mxu1 %v2040_v0  ;;  %1731 = vmatmul.mubr.msk.bf16.gmra.mrb[8].mxu0 %vm634_vm1, %v1951_v17  ;;  %v2035_v17 = vld [vmem:[%s2815_s0 + $0x230] ss:$12 sps:$4 sm:$0xff]  }
  0x1c   :  { %1734 = vmatprep.mubr.msk.bf16.mxu0 %vm2042_vm0, %v2041_v2 }
  0x1e   :  { %725 = vmatpush1.bf16.msra.mxu1 %v1930_v13  ;;  %v2009_v13 = vld [vmem:[%s2815_s0 + $0x19c] ss:$12 sps:$4 sm:$0xff]  }
  0x1f   :  { %726 = vmatprep.subr.bf16.mxu1 %v2040_v0 }
  0x22   :  { %727 = vmatpush1.bf16.msra.mxu1 %v1931_v15  ;;  %v2012_v15 = vld [vmem:[%s2815_s0 + $0x198] ss:$12 sps:$4 sm:$0xff]  }
  0x23   :  { %728 = vmatprep.subr.bf16.mxu1 %v2040_v0  ;;  %1735 = vmatmul.mubr.msk.bf16.gmra.mrb[12].mxu0 %vm634_vm1, %v1955_v20  ;;  %v2038_v20 = vld [vmem:[%s2815_s0 + $0x248] ss:$0 sps:$4 sm:$0xff]  }
  0x24   :  { %1738 = vmatprep.mubr.msk.bf16.mxu0 %vm2042_vm0, %v2041_v2 }
  0x26   :  { %729 = vmatpush1.bf16.msra.mxu1 %v1932_v16  ;;  %v2013_v16 = vld [vmem:[%s2815_s0 + $0x1b4] ss:$12 sps:$4 sm:$0xff]  }
  0x27   :  { %730 = vmatprep.subr.bf16.mxu1 %v2040_v0 }
  0x2a   :  { %731 = vmatpush1.bf16.msra.mxu1 %v1933_v18  ;;  %v2016_v18 = vld [vmem:[%s2815_s0 + $0x1b0] ss:$12 sps:$4 sm:$0xff]  }
  0x2b   :  { %732 = vmatprep.subr.bf16.mxu1 %v2040_v0  ;;  %1739 = vmatmul.mubr.msk.bf16.gmra.mrb[16].mxu0 %vm634_vm1, %v1959_v23  ;;  %v2025_v23 = vld [vmem:[%s2815_s0 + $0x1fc] ss:$12 sps:$4 sm:$0xff]  }
  0x2c   :  { %1742 = vmatprep.mubr.msk.bf16.mxu0 %vm2042_vm0, %v2041_v2 }
  0x2e   :  { %733 = vmatpush1.bf16.msra.mxu1 %v1934_v19  ;;  %v2017_v19 = vld [vmem:[%s2815_s0 + $0x1cc] ss:$12 sps:$4 sm:$0xff]  }
  0x2f   :  { %734 = vmatprep.subr.bf16.mxu1 %v2040_v0 }
  0x32   :  { %735 = vmatpush1.bf16.msra.mxu1 %v1935_v21  ;;  %v2020_v21 = vld [vmem:[%s2815_s0 + $0x1c8] ss:$12 sps:$4 sm:$0xff]  }
  0x33   :  { %736 = vmatprep.subr.bf16.mxu1 %v2040_v0  ;;  %1743 = vmatmul.mubr.msk.bf16.gmra.mrb[20].mxu0 %vm634_vm1, %v1963_v26 }
  0x34   :  { %1746 = vmatprep.mubr.msk.bf16.mxu0 %vm2042_vm0, %v2041_v2 }
  0x36   :  { %737 = vmatpush1.bf16.msra.mxu1 %v1936_v22  ;;  %v2021_v22 = vld [vmem:[%s2815_s0 + $0x1e4] ss:$12 sps:$4 sm:$0xff]  }
  0x37   :  { %738 = vmatprep.subr.bf16.mxu1 %v2040_v0 }
  0x3a   :  { %739 = vmatpush1.bf16.msra.mxu1 %v1938_v24  ;;  %v2028_v24 = vld [vmem:[%s2815_s0 + $0x1f8] ss:$12 sps:$4 sm:$0xff]  }
  0x3b   :  { %740 = vmatprep.subr.bf16.mxu1 %v2040_v0  ;;  %1747 = vmatmul.mubr.msk.bf16.gmra.mrb[24].mxu0 %vm634_vm1, %v1967_v29  ;;  %v1993_v0 = vld [vmem:[%s2815_s0 + $0x13c] ss:$12 sps:$4 sm:$0xff]  }
  0x3c   :  { %1750 = vmatprep.mubr.msk.bf16.mxu0 %vm2042_vm0, %v2041_v2  ;;  %v2032_v29 = vld [vmem:[%s2815_s0 + $0x210] ss:$12 sps:$4 sm:$0xff]  }
  0x3e   :  { %741 = vmatpush1.bf16.msra.mxu1 %v1940_v25  ;;  %v2029_v25 = vld [vmem:[%s2815_s0 + $0x214] ss:$12 sps:$4 sm:$0xff]  }
  0x41   :  { %743 = vmatmul.mubr.bf16.vlgmr.msra.gmra.mrb[0].mxu1 %v1941_v27 }
  0x42   :  { %750 = vmatprep.mubr.bf16.mxu1 %v1945_v28 }
  0x43   :  { %1751 = vmatmul.mubr.msk.bf16.gmra.mrb[28].mxu0 %vm634_vm1, %v1971_v32 }
  0x44   :  { %1754 = vmatprep.mubr.msk.bf16.mxu0 %vm2042_vm0, %v2041_v2 }
  0x49   :  { %751 = vmatmul.mubr.bf16.gmra.mrb[4].mxu1 %v1948_v30 }
  0x4a   :  { %758 = vmatprep.mubr.bf16.mxu1 %v1949_v31  ;;  %v2033_v31 = vld [vmem:[%s2815_s0 + $0x22c] ss:$12 sps:$4 sm:$0xff]  }
  0x4b   :  { %1755 = vmatmul.mubr.msk.bf16.gmra.mrb[32].mxu0 %vm634_vm1, %v1975_v35 }
  0x4c   :  { %1758 = vmatprep.mubr.msk.bf16.mxu0 %vm2042_vm0, %v2041_v2 }
  0x51   :  { %759 = vmatmul.mubr.bf16.gmra.mrb[8].mxu1 %v1952_v33  ;;  %v111_v33 = vld [vmem:[%s2815_s0 + $0x240] sm:$0xff] }
  0x52   :  { %766 = vmatprep.mubr.bf16.mxu1 %v1953_v34 }
  0x53   :  { %1759 = vmatmul.mubr.msk.bf16.gmra.mrb[36].mxu0 %vm634_vm1, %v1979_v38  ;;  %v1548_v38 = vcombine.high %v111_v33, %v111_v33 }
  0x54   :  { %1762 = vmatprep.mubr.msk.bf16.mxu0 %vm2042_vm0, %v2041_v2 }
  0x59   :  { %767 = vmatmul.mubr.bf16.gmra.mrb[12].mxu1 %v1956_v36  ;;  %v2036_v36 = vld [vmem:[%s2815_s0 + $0x228] ss:$12 sps:$4 sm:$0xff]  }
  0x5a   :  { %774 = vmatprep.mubr.bf16.mxu1 %v1957_v37 }
  0x5b   :  { %1763 = vmatmul.mubr.msk.bf16.gmra.mrb[40].mxu0 %vm634_vm1, %v1983_v41 }
  0x5c   :  { %1766 = vmatprep.mubr.msk.bf16.mxu0 %vm2042_vm0, %v2041_v2 }
  0x61   :  { %775 = vmatmul.mubr.bf16.gmra.mrb[16].mxu1 %v1960_v39 }
  0x62   :  { %782 = vmatprep.mubr.bf16.mxu1 %v1961_v40 }
  0x63   :  { %1767 = vmatmul.mubr.msk.bf16.gmra.mrb[44].mxu0 %vm634_vm1, %v1987_v44 }
  0x64   :  { %1770 = vmatprep.mubr.msk.bf16.mxu0 %vm2042_vm0, %v2041_v2 }
  0x69   :  { %783 = vmatmul.mubr.bf16.gmra.mrb[20].mxu1 %v1964_v42  ;;  %v1547_v42 = vcombine.low %v111_v33, %v111_v33 }
  0x6a   :  { %790 = vmatprep.mubr.bf16.mxu1 %v1965_v43 }
  0x6b   :  { %1771 = vmatmul.mubr.msk.bf16.gmra.mrb[48].mxu0 %vm634_vm1, %v1991_v47 }
  0x6c   :  { %1774 = vmatprep.mubr.msk.bf16.mxu0 %vm2042_vm0, %v2041_v2 }
  0x71   :  { %791 = vmatmul.mubr.bf16.gmra.mrb[24].mxu1 %v1968_v45 }
  0x72   :  { %798 = vmatprep.mubr.bf16.mxu1 %v1969_v46 }
  0x73   :  { %1775 = vmatmul.mubr.msk.bf16.gmra.mrb[52].mxu0 %vm634_vm1, %v1995_v50 }
  0x74   :  { %1778 = vmatprep.mubr.msk.bf16.mxu0 %vm2042_vm0, %v2041_v2 }
  0x79   :  { %799 = vmatmul.mubr.bf16.gmra.mrb[28].mxu1 %v1972_v48 }
  0x7a   :  { %806 = vmatprep.mubr.bf16.mxu1 %v1973_v49 }
  0x7b   :  { %1779 = vmatmul.mubr.msk.bf16.gmra.mrb[56].mxu0 %vm634_vm1, %v1999_v53 }
  0x7c   :  { %1782 = vmatprep.mubr.msk.bf16.mxu0 %vm2042_vm0, %v2041_v2 }
  0x81   :  { %807 = vmatmul.mubr.bf16.gmra.mrb[32].mxu1 %v1976_v51 }
  0x82   :  { %814 = vmatprep.mubr.bf16.mxu1 %v1977_v52  ;;  %v2445_v52 = vld [vmem:[%s2816_s2] ss:$0 sm:$0xff] }
  0x83   :  { %1783 = vmatmul.mubr.msk.bf16.gmra.mrb[60].mxu0 %vm634_vm1, %v2003_v56 }
  0x84   :  { %1786 = vmatprep.mubr.msk.bf16.mxu0 %vm2042_vm0, %v2041_v2 }
  0x89   :  { %815 = vmatmul.mubr.bf16.gmra.mrb[36].mxu1 %v1980_v54 }
  0x8a   :  { %822 = vmatprep.mubr.bf16.mxu1 %v1981_v55 }
  0x8b   :  { %1787 = vmatmul.mubr.msk.bf16.gmra.mrb[64].mxu0 %vm634_vm1, %v2007_v59 }
  0x8c   :  { %1790 = vmatprep.mubr.msk.bf16.mxu0 %vm2042_vm0, %v2041_v2 }
  0x91   :  { %823 = vmatmul.mubr.bf16.gmra.mrb[40].mxu1 %v1984_v57 }
  0x92   :  { %830 = vmatprep.mubr.bf16.mxu1 %v1985_v58 }
  0x93   :  { %1791 = vmatmul.mubr.msk.bf16.gmra.mrb[68].mxu0 %vm634_vm1, %v2011_v62 }
  0x94   :  { %1794 = vmatprep.mubr.msk.bf16.mxu0 %vm2042_vm0, %v2041_v2 }
  0x99   :  { %831 = vmatmul.mubr.bf16.gmra.mrb[44].mxu1 %v1988_v60 }
  0x9a   :  { %838 = vmatprep.mubr.bf16.mxu1 %v1989_v61 }
  0x9b   :  { %1795 = vmatmul.mubr.msk.bf16.gmra.mrb[72].mxu0 %vm634_vm1, %v2015_v1 }
  0x9c   :  { %1798 = vmatprep.mubr.msk.bf16.mxu0 %vm2042_vm0, %v2041_v2 }
  0xa1   :  { %839 = vmatmul.mubr.bf16.gmra.mrb[48].mxu1 %v1992_v63 }
  0xa2   :  { %846 = vmatprep.mubr.bf16.mxu1 %v1993_v0 }
  0xa3   :  { %1799 = vmatmul.mubr.msk.bf16.gmra.mrb[76].mxu0 %vm634_vm1, %v2019_v5 }
  0xa4   :  { %1802 = vmatprep.mubr.msk.bf16.mxu0 %vm2042_vm0, %v2041_v2 }
  0xa9   :  { %847 = vmatmul.mubr.bf16.gmra.mrb[52].mxu1 %v1996_v3 }
  0xaa   :  { %854 = vmatprep.mubr.bf16.mxu1 %v1997_v4 }
  0xab   :  { %1803 = vmatmul.mubr.msk.bf16.gmra.mrb[80].mxu0 %vm634_vm1, %v2023_v8 }
  0xac   :  { %1806 = vmatprep.mubr.msk.bf16.mxu0 %vm2042_vm0, %v2041_v2 }
  0xb1   :  { %855 = vmatmul.mubr.bf16.gmra.mrb[56].mxu1 %v2000_v6 }
  0xb2   :  { %862 = vmatprep.mubr.bf16.mxu1 %v2001_v7 }
  0xb3   :  { %1807 = vmatmul.mubr.msk.bf16.gmra.mrb[84].mxu0 %vm634_vm1, %v2027_v11 }
  0xb4   :  { %1810 = vmatprep.mubr.msk.bf16.mxu0 %vm2042_vm0, %v2041_v2 }
  0xb9   :  { %863 = vmatmul.mubr.bf16.gmra.mrb[60].mxu1 %v2004_v9 }
  0xba   :  { %870 = vmatprep.mubr.bf16.mxu1 %v2005_v10 }
  0xbb   :  { %1811 = vmatmul.mubr.msk.bf16.gmra.mrb[88].mxu0 %vm634_vm1, %v2031_v14 }
  0xbc   :  { %1814 = vmatprep.mubr.msk.bf16.mxu0 %vm2042_vm0, %v2041_v2 }
  0xc1   :  { %871 = vmatmul.mubr.bf16.gmra.mrb[64].mxu1 %v2008_v12 }
  0xc2   :  { %878 = vmatprep.mubr.bf16.mxu1 %v2009_v13 }
  0xc3   :  { %1815 = vmatmul.mubr.msk.bf16.gmra.mrb[92].mxu0 %vm634_vm1, %v2035_v17 }
  0xc4   :  { %1818 = vmatprep.mubr.msk.bf16.mxu0 %vm2042_vm0, %v2041_v2  ;;  %v2024_v2 = vld [vmem:[%s2815_s0 + $0x1e0] ss:$12 sps:$4 sm:$0xff]  }
  0xc9   :  { %879 = vmatmul.mubr.bf16.gmra.mrb[68].mxu1 %v2012_v15 }
  0xca   :  { %886 = vmatprep.mubr.bf16.mxu1 %v2013_v16 }
  0xcb   :  { %1819 = vmatmul.mubr.msk.bf16.gmra.mrb[96].mxu0 %vm634_vm1, %v2038_v20 }
  0xd1   :  { %887 = vmatmul.mubr.bf16.gmra.mrb[72].mxu1 %v2016_v18 }
  0xd2   :  { %894 = vmatprep.mubr.bf16.mxu1 %v2017_v19 }
  0xd9   :  { %895 = vmatmul.mubr.bf16.gmra.mrb[76].mxu1 %v2020_v21 }
  0xda   :  { %902 = vmatprep.mubr.bf16.mxu1 %v2021_v22 }
  0xde   :  { %v976_v26 = vpop.f32.mrb[0].mxu0 }
  0xdf   :  { %v1724_v27 = vpop.f32.mrb[1].mxu0 }
  0xe0   :  { %v979_v28 = vpop.f32.mrb[2].mxu0 }
  0xe1   :  { %903 = vmatmul.mubr.bf16.gmra.mrb[80].mxu1 %v2024_v2  ;;  %v1725_v30 = vpop.f32.mrb[3].mxu0 }
  0xe2   :  { %910 = vmatprep.mubr.bf16.mxu1 %v2025_v23 }
  0xe6   :  { %v984_v32 = vpop.f32.mrb[4].mxu0 }
  0xe7   :  { %v1728_v34 = vpop.f32.mrb[5].mxu0 }
  0xe8   :  { %v987_v35 = vpop.f32.mrb[6].mxu0 }
  0xe9   :  { %911 = vmatmul.mubr.bf16.gmra.mrb[84].mxu1 %v2028_v24  ;;  %v1729_v37 = vpop.f32.mrb[7].mxu0 }
  0xea   :  { %918 = vmatprep.mubr.bf16.mxu1 %v2029_v25 }
  0xee   :  { %v992_v39 = vpop.f32.mrb[8].mxu0 }
  0xef   :  { %v1732_v40 = vpop.f32.mrb[9].mxu0 }
  0xf0   :  { %v2432_v41 = vpop.f32.mrb[10].mxu0 }
  0xf1   :  { %919 = vmatmul.mubr.bf16.gmra.mrb[88].mxu1 %v2032_v29  ;;  %v1733_v43 = vpop.f32.mrb[11].mxu0 }
  0xf2   :  { %926 = vmatprep.mubr.bf16.mxu1 %v2033_v31 }
  0xf6   :  { %v2434_v44 = vpop.f32.mrb[12].mxu0 }
  0xf7   :  { %v1736_v45 = vpop.f32.mrb[13].mxu0 }
  0xf8   :  { %v2436_v46 = vpop.f32.mrb[14].mxu0 }
  0xf9   :  { %927 = vmatmul.mubr.bf16.gmra.mrb[92].mxu1 %v2036_v36  ;;  %v1737_v47 = vpop.f32.mrb[15].mxu0 }
  0xfa   :  { %934 = vmatprep.mubr.bf16.mxu1 %v1548_v38 }
  0xfe   :  { %v2438_v48 = vpop.f32.mrb[16].mxu0 }
  0xff   :  { %v1740_v49 = vpop.f32.mrb[17].mxu0 }
 0x100   :  { %v2440_v50 = vpop.f32.mrb[18].mxu0 }
 0x101   :  { %935 = vmatmul.mubr.bf16.gmra.mrb[96].mxu1 %v1547_v42  ;;  %v1741_v51 = vpop.f32.mrb[19].mxu0 }
 0x106   :  { %v2447_v53 = vpop.f32.mrb[20].mxu0 }
 0x107   :  { %v1744_v54 = vpop.f32.mrb[21].mxu0 }
 0x108   :  { %v2449_v56 = vpop.f32.mrb[22].mxu0 }
 0x109   :  { %v1745_v59 = vpop.f32.mrb[23].mxu0 }
 0x10e   :  { %v2453_v3 = vpop.f32.mrb[24].mxu0 }
 0x10f   :  { %v1748_v6 = vpop.f32.mrb[25].mxu0 }
 0x110   :  { %v2455_v8 = vpop.f32.mrb[26].mxu0 }
 0x111   :  { %v1749_v12 = vpop.f32.mrb[27].mxu0 }
 0x114   :  { %v744_v55 = vpop.f32.mrb[0].mxu1 }
 0x115   :  { %v745_v57 = vadd.f32 %v2445_v52, %v744_v55  ;;  %v746_v58 = vpop.f32.mrb[1].mxu1 }
 0x116   :  { %v747_v60 = vpop.f32.mrb[2].mxu1  ;;  %v2467_v19 = vpop.f32.mrb[28].mxu0 }
 0x117   :  { %v977_v61 = vadd.f32 %v976_v26, %v745_v57  ;;  %v748_v62 = vadd.f32 %v2445_v52, %v747_v60  ;;  %v749_v63 = vpop.f32.mrb[3].mxu1  ;;  %v1752_v22 = vpop.f32.mrb[29].mxu0 }
 0x118   :  { %v2469_v23 = vpop.f32.mrb[30].mxu0 }
 0x119   :  { %v1174_v0 = vmax.f32 %v977_v61, 0.0  ;;  %v980_v1 = vadd.f32 %v979_v28, %v748_v62  ;;  %v1753_v27 = vpop.f32.mrb[31].mxu0 }
 0x11b   :  { %v1642_v4 = vpack.c.bf16 %v1174_v0, %v1174_v0  ;;  %v1175_v5 = vmax.f32 %v980_v1, 0.0 }
 0x11c   :  { %v752_v7 = vpop.f32.mrb[4].mxu1 }
 0x11d   :  { %1421 = vst.msk [vmem:[%s2817_s3] sm:$0xf] %vm1420_vm2, %v1642_v4  ;;  %v1643_v9 = vpack.c.bf16 %v1175_v5, %v1175_v5  ;;  %v753_v10 = vadd.f32 %v2445_v52, %v752_v7  ;;  %v754_v11 = vpop.f32.mrb[5].mxu1 }
 0x11e   :  { %v755_v13 = vpop.f32.mrb[6].mxu1  ;;  %v2482_v34 = vpop.f32.mrb[32].mxu0 }
 0x11f   :  { %1422 = vst.msk [vmem:[%s2817_s3 + $0x4] sm:$0xf] %vm1420_vm2, %v1643_v9  ;;  %v985_v14 = vadd.f32 %v984_v32, %v753_v10  ;;  %v756_v15 = vadd.f32 %v2445_v52, %v755_v13  ;;  %v757_v16 = vpop.f32.mrb[7].mxu1  ;;  %v1756_v37 = vpop.f32.mrb[33].mxu0 }
 0x120   :  { %v2484_v40 = vpop.f32.mrb[34].mxu0 }
 0x121   :  { %v1176_v17 = vmax.f32 %v985_v14, 0.0  ;;  %v988_v18 = vadd.f32 %v987_v35, %v756_v15  ;;  %v1757_v45 = vpop.f32.mrb[35].mxu0 }
 0x123   :  { %v1644_v20 = vpack.c.bf16 %v1176_v17, %v1176_v17  ;;  %v1177_v21 = vmax.f32 %v988_v18, 0.0 }
 0x124   :  { %v760_v2 = vpop.f32.mrb[8].mxu1 }
 0x125   :  { %1423 = vst.msk [vmem:[%s2817_s3 + $0x8] sm:$0xf] %vm1420_vm2, %v1644_v20  ;;  %v1645_v24 = vpack.c.bf16 %v1177_v21, %v1177_v21  ;;  %v761_v25 = vadd.f32 %v2445_v52, %v760_v2  ;;  %v762_v26 = vpop.f32.mrb[9].mxu1 }
 0x126   :  { %v763_v28 = vpop.f32.mrb[10].mxu1  ;;  %v2498_v57 = vpop.f32.mrb[36].mxu0 }
 0x127   :  { %1424 = vst.msk [vmem:[%s2817_s3 + $0xc] sm:$0xf] %vm1420_vm2, %v1645_v24  ;;  %v993_v29 = vadd.f32 %v992_v39, %v761_v25  ;;  %v764_v30 = vadd.f32 %v2445_v52, %v763_v28  ;;  %v765_v31 = vpop.f32.mrb[11].mxu1  ;;  %v1760_v60 = vpop.f32.mrb[37].mxu0 }
 0x128   :  { %v2500_v62 = vpop.f32.mrb[38].mxu0 }
 0x129   :  { %v1178_v32 = vmax.f32 %v993_v29, 0.0  ;;  %v996_v33 = vadd.f32 %v2432_v41, %v764_v30  ;;  %v1761_v1 = vpop.f32.mrb[39].mxu0 }
 0x12b   :  { %v1646_v35 = vpack.c.bf16 %v1178_v32, %v1178_v32  ;;  %v1179_v36 = vmax.f32 %v996_v33, 0.0 }
 0x12c   :  { %v768_v38 = vpop.f32.mrb[12].mxu1 }
 0x12d   :  { %1425 = vst.msk [vmem:[%s2817_s3 + $0x10] sm:$0xf] %vm1420_vm2, %v1646_v35  ;;  %v1647_v39 = vpack.c.bf16 %v1179_v36, %v1179_v36  ;;  %v769_v42 = vadd.f32 %v2445_v52, %v768_v38  ;;  %v770_v43 = vpop.f32.mrb[13].mxu1 }
 0x12e   :  { %v771_v47 = vpop.f32.mrb[14].mxu1  ;;  %v2514_v10 = vpop.f32.mrb[40].mxu0 }
 0x12f   :  { %1426 = vst.msk [vmem:[%s2817_s3 + $0x14] sm:$0xf] %vm1420_vm2, %v1647_v39  ;;  %v1001_v41 = vadd.f32 %v2434_v44, %v769_v42  ;;  %v772_v49 = vadd.f32 %v2445_v52, %v771_v47  ;;  %v773_v51 = vpop.f32.mrb[15].mxu1  ;;  %v1764_v13 = vpop.f32.mrb[41].mxu0 }
 0x130   :  { %v2516_v15 = vpop.f32.mrb[42].mxu0 }
 0x131   :  { %v1180_v54 = vmax.f32 %v1001_v41, 0.0  ;;  %v1004_v55 = vadd.f32 %v2436_v46, %v772_v49  ;;  %v1765_v18 = vpop.f32.mrb[43].mxu0 }
 0x133   :  { %v1648_v58 = vpack.c.bf16 %v1180_v54, %v1180_v54  ;;  %v1181_v59 = vmax.f32 %v1004_v55, 0.0 }
 0x134   :  { %v776_v61 = vpop.f32.mrb[16].mxu1 }
 0x135   :  { %1427 = vst.msk [vmem:[%s2817_s3 + $0x18] sm:$0xf] %vm1420_vm2, %v1648_v58  ;;  %v1649_v44 = vpack.c.bf16 %v1181_v59, %v1181_v59  ;;  %v777_v63 = vadd.f32 %v2445_v52, %v776_v61  ;;  %v778_v0 = vpop.f32.mrb[17].mxu1 }
 0x136   :  { %v779_v4 = vpop.f32.mrb[18].mxu1  ;;  %v2530_v25 = vpop.f32.mrb[44].mxu0 }
 0x137   :  { %1428 = vst.msk [vmem:[%s2817_s3 + $0x1c] sm:$0xf] %vm1420_vm2, %v1649_v44  ;;  %v1009_v46 = vadd.f32 %v2438_v48, %v777_v63  ;;  %v780_v5 = vadd.f32 %v2445_v52, %v779_v4  ;;  %v781_v6 = vpop.f32.mrb[19].mxu1  ;;  %v1768_v28 = vpop.f32.mrb[45].mxu0 }
 0x138   :  { %v2532_v30 = vpop.f32.mrb[46].mxu0 }
 0x139   :  { %v1182_v7 = vmax.f32 %v1009_v46, 0.0  ;;  %v1012_v9 = vadd.f32 %v2440_v50, %v780_v5  ;;  %v1769_v33 = vpop.f32.mrb[47].mxu0 }
 0x13b   :  { %v1650_v11 = vpack.c.bf16 %v1182_v7, %v1182_v7  ;;  %v1183_v12 = vmax.f32 %v1012_v9, 0.0 }
 0x13c   :  { %v784_v14 = vpop.f32.mrb[20].mxu1 }
 0x13d   :  { %1429 = vst.msk [vmem:[%s2817_s3 + $0x20] sm:$0xf] %vm1420_vm2, %v1650_v11  ;;  %v1651_v48 = vpack.c.bf16 %v1183_v12, %v1183_v12  ;;  %v785_v16 = vadd.f32 %v2445_v52, %v784_v14  ;;  %v786_v17 = vpop.f32.mrb[21].mxu1 }
 0x13e   :  { %v787_v20 = vpop.f32.mrb[22].mxu1  ;;  %v2546_v42 = vpop.f32.mrb[48].mxu0 }
 0x13f   :  { %1430 = vst.msk [vmem:[%s2817_s3 + $0x24] sm:$0xf] %vm1420_vm2, %v1651_v48  ;;  %v1017_v50 = vadd.f32 %v2447_v53, %v785_v16  ;;  %v788_v21 = vadd.f32 %v2445_v52, %v787_v20  ;;  %v789_v22 = vpop.f32.mrb[23].mxu1  ;;  %v1772_v47 = vpop.f32.mrb[49].mxu0 }
 0x140   :  { %v2548_v49 = vpop.f32.mrb[50].mxu0 }
 0x141   :  { %v1184_v2 = vmax.f32 %v1017_v50, 0.0  ;;  %v1020_v24 = vadd.f32 %v2449_v56, %v788_v21  ;;  %v1773_v55 = vpop.f32.mrb[51].mxu0 }
 0x143   :  { %v1652_v26 = vpack.c.bf16 %v1184_v2, %v1184_v2  ;;  %v1185_v27 = vmax.f32 %v1020_v24, 0.0 }
 0x144   :  { %v792_v29 = vpop.f32.mrb[24].mxu1 }
 0x145   :  { %1431 = vst.msk [vmem:[%s2817_s3 + $0x28] sm:$0xf] %vm1420_vm2, %v1652_v26  ;;  %v1653_v53 = vpack.c.bf16 %v1185_v27, %v1185_v27  ;;  %v793_v31 = vadd.f32 %v2445_v52, %v792_v29  ;;  %v794_v32 = vpop.f32.mrb[25].mxu1 }
 0x146   :  { %v795_v35 = vpop.f32.mrb[26].mxu1  ;;  %v2562_v63 = vpop.f32.mrb[52].mxu0 }
 0x147   :  { %1432 = vst.msk [vmem:[%s2817_s3 + $0x2c] sm:$0xf] %vm1420_vm2, %v1653_v53  ;;  %v1025_v56 = vadd.f32 %v2453_v3, %v793_v31  ;;  %v796_v36 = vadd.f32 %v2445_v52, %v795_v35  ;;  %v797_v37 = vpop.f32.mrb[27].mxu1  ;;  %v1776_v4 = vpop.f32.mrb[53].mxu0 }
 0x148   :  { %v2564_v5 = vpop.f32.mrb[54].mxu0 }
 0x149   :  { %v1186_v38 = vmax.f32 %v1025_v56, 0.0  ;;  %v1028_v39 = vadd.f32 %v2455_v8, %v796_v36  ;;  %v1777_v9 = vpop.f32.mrb[55].mxu0 }
 0x14b   :  { %v1654_v43 = vpack.c.bf16 %v1186_v38, %v1186_v38  ;;  %v1187_v45 = vmax.f32 %v1028_v39, 0.0 }
 0x14c   :  { %v800_v41 = vpop.f32.mrb[28].mxu1 }
 0x14d   :  { %1433 = vst.msk [vmem:[%s2817_s3 + $0x30] sm:$0xf] %vm1420_vm2, %v1654_v43  ;;  %v1655_v3 = vpack.c.bf16 %v1187_v45, %v1187_v45  ;;  %v801_v51 = vadd.f32 %v2445_v52, %v800_v41  ;;  %v802_v54 = vpop.f32.mrb[29].mxu1 }
 0x14e   :  { %v803_v58 = vpop.f32.mrb[30].mxu1  ;;  %v2578_v16 = vpop.f32.mrb[56].mxu0 }
 0x14f   :  { %1434 = vst.msk [vmem:[%s2817_s3 + $0x34] sm:$0xf] %vm1420_vm2, %v1655_v3  ;;  %v1033_v8 = vadd.f32 %v2467_v19, %v801_v51  ;;  %v804_v59 = vadd.f32 %v2445_v52, %v803_v58  ;;  %v805_v60 = vpop.f32.mrb[31].mxu1  ;;  %v1780_v20 = vpop.f32.mrb[57].mxu0 }
 0x150   :  { %v2580_v21 = vpop.f32.mrb[58].mxu0 }
 0x151   :  { %v1188_v61 = vmax.f32 %v1033_v8, 0.0  ;;  %v1036_v44 = vadd.f32 %v2469_v23, %v804_v59  ;;  %v1781_v24 = vpop.f32.mrb[59].mxu0 }
 0x153   :  { %v1656_v0 = vpack.c.bf16 %v1188_v61, %v1188_v61  ;;  %v1189_v1 = vmax.f32 %v1036_v44, 0.0 }
 0x154   :  { %v808_v46 = vpop.f32.mrb[32].mxu1 }
 0x155   :  { %1435 = vst.msk [vmem:[%s2817_s3 + $0x38] sm:$0xf] %vm1420_vm2, %v1656_v0  ;;  %v1657_v19 = vpack.c.bf16 %v1189_v1, %v1189_v1  ;;  %v809_v6 = vadd.f32 %v2445_v52, %v808_v46  ;;  %v810_v7 = vpop.f32.mrb[33].mxu1 }
 0x156   :  { %v811_v11 = vpop.f32.mrb[34].mxu1  ;;  %v2594_v31 = vpop.f32.mrb[60].mxu0 }
 0x157   :  { %1436 = vst.msk [vmem:[%s2817_s3 + $0x3c] sm:$0xf] %vm1420_vm2, %v1657_v19  ;;  %v1041_v23 = vadd.f32 %v2482_v34, %v809_v6  ;;  %v812_v12 = vadd.f32 %v2445_v52, %v811_v11  ;;  %v813_v13 = vpop.f32.mrb[35].mxu1  ;;  %v1784_v35 = vpop.f32.mrb[61].mxu0 }
 0x158   :  { %v2596_v36 = vpop.f32.mrb[62].mxu0 }
 0x159   :  { %v1190_v14 = vmax.f32 %v1041_v23, 0.0  ;;  %v1044_v48 = vadd.f32 %v2484_v40, %v812_v12  ;;  %v1785_v39 = vpop.f32.mrb[63].mxu0 }
 0x15b   :  { %v1658_v17 = vpack.c.bf16 %v1190_v14, %v1190_v14  ;;  %v1191_v18 = vmax.f32 %v1044_v48, 0.0 }
 0x15c   :  { %v816_v50 = vpop.f32.mrb[36].mxu1 }
 0x15d   :  { %1437 = vst.msk [vmem:[%s2817_s3 + $0x40] sm:$0xf] %vm1420_vm2, %v1658_v17  ;;  %v1659_v34 = vpack.c.bf16 %v1191_v18, %v1191_v18  ;;  %v817_v22 = vadd.f32 %v2445_v52, %v816_v50  ;;  %v818_v2 = vpop.f32.mrb[37].mxu1 }
 0x15e   :  { %v819_v26 = vpop.f32.mrb[38].mxu1  ;;  %v2610_v51 = vpop.f32.mrb[64].mxu0 }
 0x15f   :  { %1438 = vst.msk [vmem:[%s2817_s3 + $0x44] sm:$0xf] %vm1420_vm2, %v1659_v34  ;;  %v1049_v40 = vadd.f32 %v2498_v57, %v817_v22  ;;  %v820_v27 = vadd.f32 %v2445_v52, %v819_v26  ;;  %v821_v28 = vpop.f32.mrb[39].mxu1  ;;  %v1788_v58 = vpop.f32.mrb[65].mxu0 }
 0x160   :  { %v2612_v59 = vpop.f32.mrb[66].mxu0 }
 0x161   :  { %v1192_v29 = vmax.f32 %v1049_v40, 0.0  ;;  %v1052_v53 = vadd.f32 %v2500_v62, %v820_v27  ;;  %v1789_v44 = vpop.f32.mrb[67].mxu0 }
 0x163   :  { %v1660_v32 = vpack.c.bf16 %v1192_v29, %v1192_v29  ;;  %v1193_v33 = vmax.f32 %v1052_v53, 0.0 }
 0x164   :  { %v824_v56 = vpop.f32.mrb[40].mxu1 }
 0x165   :  { %1439 = vst.msk [vmem:[%s2817_s3 + $0x48] sm:$0xf] %vm1420_vm2, %v1660_v32  ;;  %v1661_v57 = vpack.c.bf16 %v1193_v33, %v1193_v33  ;;  %v825_v37 = vadd.f32 %v2445_v52, %v824_v56  ;;  %v826_v38 = vpop.f32.mrb[41].mxu1 }
 0x166   :  { %v827_v43 = vpop.f32.mrb[42].mxu1  ;;  %v2626_v6 = vpop.f32.mrb[68].mxu0 }
 0x167   :  { %1440 = vst.msk [vmem:[%s2817_s3 + $0x4c] sm:$0xf] %vm1420_vm2, %v1661_v57  ;;  %v1057_v62 = vadd.f32 %v2514_v10, %v825_v37  ;;  %v828_v45 = vadd.f32 %v2445_v52, %v827_v43  ;;  %v829_v47 = vpop.f32.mrb[43].mxu1  ;;  %v1792_v11 = vpop.f32.mrb[69].mxu0 }
 0x168   :  { %v2628_v12 = vpop.f32.mrb[70].mxu0 }
 0x169   :  { %v1194_v41 = vmax.f32 %v1057_v62, 0.0  ;;  %v1060_v3 = vadd.f32 %v2516_v15, %v828_v45  ;;  %v1793_v48 = vpop.f32.mrb[71].mxu0 }
 0x16b   :  { %v1662_v54 = vpack.c.bf16 %v1194_v41, %v1194_v41  ;;  %v1195_v55 = vmax.f32 %v1060_v3, 0.0 }
 0x16c   :  { %v832_v8 = vpop.f32.mrb[44].mxu1 }
 0x16d   :  { %1441 = vst.msk [vmem:[%s2817_s3 + $0x50] sm:$0xf] %vm1420_vm2, %v1662_v54  ;;  %v1663_v10 = vpack.c.bf16 %v1195_v55, %v1195_v55  ;;  %v833_v60 = vadd.f32 %v2445_v52, %v832_v8  ;;  %v834_v61 = vpop.f32.mrb[45].mxu1 }
 0x16e   :  { %v835_v0 = vpop.f32.mrb[46].mxu1  ;;  %v2642_v22 = vpop.f32.mrb[72].mxu0 }
 0x16f   :  { %1442 = vst.msk [vmem:[%s2817_s3 + $0x54] sm:$0xf] %vm1420_vm2, %v1663_v10  ;;  %v1065_v15 = vadd.f32 %v2530_v25, %v833_v60  ;;  %v836_v1 = vadd.f32 %v2445_v52, %v835_v0  ;;  %v837_v4 = vpop.f32.mrb[47].mxu1  ;;  %v1796_v26 = vpop.f32.mrb[73].mxu0 }
 0x170   :  { %v2644_v27 = vpop.f32.mrb[74].mxu0 }
 0x171   :  { %v1196_v46 = vmax.f32 %v1065_v15, 0.0  ;;  %v1068_v19 = vadd.f32 %v2532_v30, %v836_v1  ;;  %v1797_v53 = vpop.f32.mrb[75].mxu0 }
 0x173   :  { %v1664_v7 = vpack.c.bf16 %v1196_v46, %v1196_v46  ;;  %v1197_v9 = vmax.f32 %v1068_v19, 0.0 }
 0x174   :  { %v840_v23 = vpop.f32.mrb[48].mxu1 }
 0x175   :  { %1443 = vst.msk [vmem:[%s2817_s3 + $0x58] sm:$0xf] %vm1420_vm2, %v1664_v7  ;;  %v1665_v25 = vpack.c.bf16 %v1197_v9, %v1197_v9  ;;  %v841_v13 = vadd.f32 %v2445_v52, %v840_v23  ;;  %v842_v14 = vpop.f32.mrb[49].mxu1 }
 0x176   :  { %v843_v17 = vpop.f32.mrb[50].mxu1  ;;  %v2658_v37 = vpop.f32.mrb[76].mxu0 }
 0x177   :  { %1444 = vst.msk [vmem:[%s2817_s3 + $0x5c] sm:$0xf] %vm1420_vm2, %v1665_v25  ;;  %v1073_v30 = vadd.f32 %v2546_v42, %v841_v13  ;;  %v844_v18 = vadd.f32 %v2445_v52, %v843_v17  ;;  %v845_v20 = vpop.f32.mrb[51].mxu1  ;;  %v1800_v43 = vpop.f32.mrb[77].mxu0 }
 0x178   :  { %v2660_v45 = vpop.f32.mrb[78].mxu0 }
 0x179   :  { %v1198_v50 = vmax.f32 %v1073_v30, 0.0  ;;  %v1076_v34 = vadd.f32 %v2548_v49, %v844_v18  ;;  %v1801_v3 = vpop.f32.mrb[79].mxu0 }
 0x17b   :  { %v1666_v2 = vpack.c.bf16 %v1198_v50, %v1198_v50  ;;  %v1199_v24 = vmax.f32 %v1076_v34, 0.0 }
 0x17c   :  { %v848_v40 = vpop.f32.mrb[52].mxu1 }
 0x17d   :  { %1445 = vst.msk [vmem:[%s2817_s3 + $0x60] sm:$0xf] %vm1420_vm2, %v1666_v2  ;;  %v1667_v42 = vpack.c.bf16 %v1199_v24, %v1199_v24  ;;  %v849_v28 = vadd.f32 %v2445_v52, %v848_v40  ;;  %v850_v29 = vpop.f32.mrb[53].mxu1 }
 0x17e   :  { %v851_v32 = vpop.f32.mrb[54].mxu1  ;;  %v2674_v60 = vpop.f32.mrb[80].mxu0 }
 0x17f   :  { %1446 = vst.msk [vmem:[%s2817_s3 + $0x64] sm:$0xf] %vm1420_vm2, %v1667_v42  ;;  %v1081_v49 = vadd.f32 %v2562_v63, %v849_v28  ;;  %v852_v33 = vadd.f32 %v2445_v52, %v851_v32  ;;  %v853_v35 = vpop.f32.mrb[55].mxu1  ;;  %v1804_v0 = vpop.f32.mrb[81].mxu0 }
 0x180   :  { %v2676_v1 = vpop.f32.mrb[82].mxu0 }
 0x181   :  { %v1200_v56 = vmax.f32 %v1081_v49, 0.0  ;;  %v1084_v57 = vadd.f32 %v2564_v5, %v852_v33  ;;  %v1805_v19 = vpop.f32.mrb[83].mxu0 }
 0x183   :  { %v1668_v38 = vpack.c.bf16 %v1200_v56, %v1200_v56  ;;  %v1201_v39 = vmax.f32 %v1084_v57, 0.0 }
 0x184   :  { %v856_v62 = vpop.f32.mrb[56].mxu1 }
 0x185   :  { %1447 = vst.msk [vmem:[%s2817_s3 + $0x68] sm:$0xf] %vm1420_vm2, %v1668_v38  ;;  %v1669_v63 = vpack.c.bf16 %v1201_v39, %v1201_v39  ;;  %v857_v47 = vadd.f32 %v2445_v52, %v856_v62  ;;  %v858_v41 = vpop.f32.mrb[57].mxu1 }
 0x186   :  { %v859_v54 = vpop.f32.mrb[58].mxu1  ;;  %v2690_v13 = vpop.f32.mrb[84].mxu0 }
 0x187   :  { %1448 = vst.msk [vmem:[%s2817_s3 + $0x6c] sm:$0xf] %vm1420_vm2, %v1669_v63  ;;  %v1089_v5 = vadd.f32 %v2578_v16, %v857_v47  ;;  %v860_v55 = vadd.f32 %v2445_v52, %v859_v54  ;;  %v861_v58 = vpop.f32.mrb[59].mxu1  ;;  %v1808_v17 = vpop.f32.mrb[85].mxu0 }
 0x188   :  { %v2692_v18 = vpop.f32.mrb[86].mxu0 }
 0x189   :  { %v1202_v8 = vmax.f32 %v1089_v5, 0.0  ;;  %v1092_v10 = vadd.f32 %v2580_v21, %v860_v55  ;;  %v1809_v34 = vpop.f32.mrb[87].mxu0 }
 0x18b   :  { %v1670_v61 = vpack.c.bf16 %v1202_v8, %v1202_v8  ;;  %v1203_v44 = vmax.f32 %v1092_v10, 0.0 }
 0x18c   :  { %v864_v15 = vpop.f32.mrb[60].mxu1 }
 0x18d   :  { %1449 = vst.msk [vmem:[%s2817_s3 + $0x70] sm:$0xf] %vm1420_vm2, %v1670_v61  ;;  %v1671_v16 = vpack.c.bf16 %v1203_v44, %v1203_v44  ;;  %v865_v4 = vadd.f32 %v2445_v52, %v864_v15  ;;  %v866_v46 = vpop.f32.mrb[61].mxu1 }
 0x18e   :  { %v867_v7 = vpop.f32.mrb[62].mxu1  ;;  %v2706_v28 = vpop.f32.mrb[88].mxu0 }
 0x18f   :  { %1450 = vst.msk [vmem:[%s2817_s3 + $0x74] sm:$0xf] %vm1420_vm2, %v1671_v16  ;;  %v1097_v21 = vadd.f32 %v2594_v31, %v865_v4  ;;  %v868_v9 = vadd.f32 %v2445_v52, %v867_v7  ;;  %v869_v11 = vpop.f32.mrb[63].mxu1  ;;  %v1812_v32 = vpop.f32.mrb[89].mxu0 }
 0x190   :  { %v2708_v33 = vpop.f32.mrb[90].mxu0 }
 0x191   :  { %v1204_v23 = vmax.f32 %v1097_v21, 0.0  ;;  %v1100_v25 = vadd.f32 %v2596_v36, %v868_v9  ;;  %v1813_v57 = vpop.f32.mrb[91].mxu0 }
 0x193   :  { %v1672_v14 = vpack.c.bf16 %v1204_v23, %v1204_v23  ;;  %v1205_v48 = vmax.f32 %v1100_v25, 0.0 }
 0x194   :  { %v872_v30 = vpop.f32.mrb[64].mxu1 }
 0x195   :  { %1451 = vst.msk [vmem:[%s2817_s3 + $0x78] sm:$0xf] %vm1420_vm2, %v1672_v14  ;;  %v1673_v31 = vpack.c.bf16 %v1205_v48, %v1205_v48  ;;  %v873_v20 = vadd.f32 %v2445_v52, %v872_v30  ;;  %v874_v50 = vpop.f32.mrb[65].mxu1 }
 0x196   :  { %v875_v2 = vpop.f32.mrb[66].mxu1  ;;  %v2722_v47 = vpop.f32.mrb[92].mxu0 }
 0x197   :  { %1452 = vst.msk [vmem:[%s2817_s3 + $0x7c] sm:$0xf] %vm1420_vm2, %v1673_v31  ;;  %v1105_v36 = vadd.f32 %v2610_v51, %v873_v20  ;;  %v876_v24 = vadd.f32 %v2445_v52, %v875_v2  ;;  %v877_v26 = vpop.f32.mrb[67].mxu1  ;;  %v1816_v54 = vpop.f32.mrb[93].mxu0 }
 0x198   :  { %v2724_v55 = vpop.f32.mrb[94].mxu0 }
 0x199   :  { %v1206_v40 = vmax.f32 %v1105_v36, 0.0  ;;  %v1108_v42 = vadd.f32 %v2612_v59, %v876_v24  ;;  %v1817_v10 = vpop.f32.mrb[95].mxu0 }
 0x19b   :  { %v1674_v29 = vpack.c.bf16 %v1206_v40, %v1206_v40  ;;  %v1207_v53 = vmax.f32 %v1108_v42, 0.0 }
 0x19c   :  { %v880_v49 = vpop.f32.mrb[68].mxu1 }
 0x19d   :  { %1453 = vst.msk [vmem:[%s2817_s3 + $0x80] sm:$0xf] %vm1420_vm2, %v1674_v29  ;;  %v1675_v51 = vpack.c.bf16 %v1207_v53, %v1207_v53  ;;  %v881_v35 = vadd.f32 %v2445_v52, %v880_v49  ;;  %v882_v56 = vpop.f32.mrb[69].mxu1 }
 0x19e   :  { %v883_v38 = vpop.f32.mrb[70].mxu1  ;;  %v2738_v4 = vpop.f32.mrb[96].mxu0 }
 0x19f   :  { %1454 = vst.msk [vmem:[%s2817_s3 + $0x84] sm:$0xf] %vm1420_vm2, %v1675_v51  ;;  %v1113_v59 = vadd.f32 %v2626_v6, %v881_v35  ;;  %v884_v39 = vadd.f32 %v2445_v52, %v883_v38  ;;  %v885_v43 = vpop.f32.mrb[71].mxu1  ;;  %v1820_v7 = vpop.f32.mrb[97].mxu0 }
 0x1a0   :  { %v1171_v9 = vpop.f32.mrb[98].mxu0 }
 0x1a1   :  { %v1208_v62 = vmax.f32 %v1113_v59, 0.0  ;;  %v1116_v63 = vadd.f32 %v2628_v12, %v884_v39  ;;  %v1821_v25 = vpop.f32.mrb[99].mxu0 }
 0x1a3   :  { %v1676_v41 = vpack.c.bf16 %v1208_v62, %v1208_v62  ;;  %v1209_v3 = vmax.f32 %v1116_v63, 0.0 }
 0x1a4   :  { %v888_v5 = vpop.f32.mrb[72].mxu1 }
 0x1a5   :  { %1455 = vst.msk [vmem:[%s2817_s3 + $0x88] sm:$0xf] %vm1420_vm2, %v1676_v41  ;;  %v1677_v6 = vpack.c.bf16 %v1209_v3, %v1209_v3  ;;  %v889_v58 = vadd.f32 %v2445_v52, %v888_v5  ;;  %v890_v8 = vpop.f32.mrb[73].mxu1 }
 0x1a6   :  { %v891_v61 = vpop.f32.mrb[74].mxu1 }
 0x1a7   :  { %1456 = vst.msk [vmem:[%s2817_s3 + $0x8c] sm:$0xf] %vm1420_vm2, %v1677_v6  ;;  %v1121_v12 = vadd.f32 %v2642_v22, %v889_v58  ;;  %v892_v44 = vadd.f32 %v2445_v52, %v891_v61  ;;  %v893_v0 = vpop.f32.mrb[75].mxu1 }
 0x1a9   :  { %v1210_v15 = vmax.f32 %v1121_v12, 0.0  ;;  %v1124_v16 = vadd.f32 %v2644_v27, %v892_v44 }
 0x1ab   :  { %v1678_v46 = vpack.c.bf16 %v1210_v15, %v1210_v15  ;;  %v1211_v19 = vmax.f32 %v1124_v16, 0.0 }
 0x1ac   :  { %v896_v21 = vpop.f32.mrb[76].mxu1 }
 0x1ad   :  { %1457 = vst.msk [vmem:[%s2817_s3 + $0x90] sm:$0xf] %vm1420_vm2, %v1678_v46  ;;  %v1679_v11 = vpack.c.bf16 %v1211_v19, %v1211_v19  ;;  %v897_v22 = vadd.f32 %v2445_v52, %v896_v21  ;;  %v898_v23 = vpop.f32.mrb[77].mxu1 }
 0x1ae   :  { %v899_v14 = vpop.f32.mrb[78].mxu1 }
 0x1af   :  { %1458 = vst.msk [vmem:[%s2817_s3 + $0x94] sm:$0xf] %vm1420_vm2, %v1679_v11  ;;  %v1129_v27 = vadd.f32 %v2658_v37, %v897_v22  ;;  %v900_v48 = vadd.f32 %v2445_v52, %v899_v14  ;;  %v901_v17 = vpop.f32.mrb[79].mxu1 }
 0x1b1   :  { %v1212_v30 = vmax.f32 %v1129_v27, 0.0  ;;  %v1132_v31 = vadd.f32 %v2660_v45, %v900_v48 }
 0x1b3   :  { %v1680_v20 = vpack.c.bf16 %v1212_v30, %v1212_v30  ;;  %v1213_v50 = vmax.f32 %v1132_v31, 0.0 }
 0x1b4   :  { %v904_v34 = vpop.f32.mrb[80].mxu1 }
 0x1b5   :  { %1459 = vst.msk [vmem:[%s2817_s3 + $0x98] sm:$0xf] %vm1420_vm2, %v1680_v20  ;;  %v1681_v2 = vpack.c.bf16 %v1213_v50, %v1213_v50  ;;  %v905_v36 = vadd.f32 %v2445_v52, %v904_v34  ;;  %v906_v24 = vpop.f32.mrb[81].mxu1 }
 0x1b6   :  { %v907_v26 = vpop.f32.mrb[82].mxu1 }
 0x1b7   :  { %1460 = vst.msk [vmem:[%s2817_s3 + $0x9c] sm:$0xf] %vm1420_vm2, %v1681_v2  ;;  %v1137_v37 = vadd.f32 %v2674_v60, %v905_v36  ;;  %v908_v45 = vadd.f32 %v2445_v52, %v907_v26  ;;  %v909_v40 = vpop.f32.mrb[83].mxu1 }
 0x1b9   :  { %v1214_v42 = vmax.f32 %v1137_v37, 0.0  ;;  %v1140_v29 = vadd.f32 %v2676_v1, %v908_v45 }
 0x1bb   :  { %v1682_v53 = vpack.c.bf16 %v1214_v42, %v1214_v42  ;;  %v1215_v32 = vmax.f32 %v1140_v29, 0.0 }
 0x1bc   :  { %v912_v49 = vpop.f32.mrb[84].mxu1 }
 0x1bd   :  { %1461 = vst.msk [vmem:[%s2817_s3 + $0xa0] sm:$0xf] %vm1420_vm2, %v1682_v53  ;;  %v1683_v51 = vpack.c.bf16 %v1215_v32, %v1215_v32  ;;  %v913_v35 = vadd.f32 %v2445_v52, %v912_v49  ;;  %v914_v56 = vpop.f32.mrb[85].mxu1 }
 0x1be   :  { %v915_v57 = vpop.f32.mrb[86].mxu1 }
 0x1bf   :  { %1462 = vst.msk [vmem:[%s2817_s3 + $0xa4] sm:$0xf] %vm1420_vm2, %v1683_v51  ;;  %v1145_v60 = vadd.f32 %v2690_v13, %v913_v35  ;;  %v916_v1 = vadd.f32 %v2445_v52, %v915_v57  ;;  %v917_v38 = vpop.f32.mrb[87].mxu1 }
 0x1c1   :  { %v1216_v59 = vmax.f32 %v1145_v60, 0.0  ;;  %v1148_v39 = vadd.f32 %v2692_v18, %v916_v1 }
 0x1c3   :  { %v1684_v43 = vpack.c.bf16 %v1216_v59, %v1216_v59  ;;  %v1217_v62 = vmax.f32 %v1148_v39, 0.0 }
 0x1c4   :  { %v920_v63 = vpop.f32.mrb[88].mxu1 }
 0x1c5   :  { %1463 = vst.msk [vmem:[%s2817_s3 + $0xa8] sm:$0xf] %vm1420_vm2, %v1684_v43  ;;  %v1685_v41 = vpack.c.bf16 %v1217_v62, %v1217_v62  ;;  %v921_v3 = vadd.f32 %v2445_v52, %v920_v63  ;;  %v922_v54 = vpop.f32.mrb[89].mxu1 }
 0x1c6   :  { %v923_v5 = vpop.f32.mrb[90].mxu1 }
 0x1c7   :  { %1464 = vst.msk [vmem:[%s2817_s3 + $0xac] sm:$0xf] %vm1420_vm2, %v1685_v41  ;;  %v1153_v13 = vadd.f32 %v2706_v28, %v921_v3  ;;  %v924_v18 = vadd.f32 %v2445_v52, %v923_v5  ;;  %v925_v6 = vpop.f32.mrb[91].mxu1 }
 0x1c9   :  { %v1218_v58 = vmax.f32 %v1153_v13, 0.0  ;;  %v1156_v8 = vadd.f32 %v2708_v33, %v924_v18 }
 0x1cb   :  { %v1686_v10 = vpack.c.bf16 %v1218_v58, %v1218_v58  ;;  %v1219_v61 = vmax.f32 %v1156_v8, 0.0 }
 0x1cc   :  { %v928_v12 = vpop.f32.mrb[92].mxu1 }
 0x1cd   :  { %1465 = vst.msk [vmem:[%s2817_s3 + $0xb0] sm:$0xf] %vm1420_vm2, %v1686_v10  ;;  %v1687_v44 = vpack.c.bf16 %v1219_v61, %v1219_v61  ;;  %v929_v0 = vadd.f32 %v2445_v52, %v928_v12  ;;  %v930_v15 = vpop.f32.mrb[93].mxu1 }
 0x1ce   :  { %v931_v16 = vpop.f32.mrb[94].mxu1 }
 0x1cf   :  { %1466 = vst.msk [vmem:[%s2817_s3 + $0xb4] sm:$0xf] %vm1420_vm2, %v1687_v44  ;;  %v1161_v28 = vadd.f32 %v2722_v47, %v929_v0  ;;  %v932_v33 = vadd.f32 %v2445_v52, %v931_v16  ;;  %v933_v46 = vpop.f32.mrb[95].mxu1 }
 0x1d1   :  { %v1220_v19 = vmax.f32 %v1161_v28, 0.0  ;;  %v1164_v7 = vadd.f32 %v2724_v55, %v932_v33 }
 0x1d3   :  { %v1688_v21 = vpack.c.bf16 %v1220_v19, %v1220_v19  ;;  %v1221_v9 = vmax.f32 %v1164_v7, 0.0 }
 0x1d4   :  { %v936_v11 = vpop.f32.mrb[96].mxu1 }
 0x1d5   :  { %1467 = vst.msk [vmem:[%s2817_s3 + $0xb8] sm:$0xf] %vm1420_vm2, %v1688_v21  ;;  %v1689_v22 = vpack.c.bf16 %v1221_v9, %v1221_v9  ;;  %v937_v23 = vadd.f32 %v2445_v52, %v936_v11  ;;  %v938_v25 = vpop.f32.mrb[97].mxu1 }
 0x1d6   :  { %v939_v14 = vpop.f32.mrb[98].mxu1 }
 0x1d7   :  { %1468 = vst.msk [vmem:[%s2817_s3 + $0xbc] sm:$0xf] %vm1420_vm2, %v1689_v22  ;;  %v1169_v47 = vadd.f32 %v2738_v4, %v937_v23  ;;  %v940_v55 = vpop.f32.mrb[99].mxu1 }
 0x1d9   :  { %v1222_v27 = vmax.f32 %v1169_v47, 0.0 }
 0x1db   :  { %v1690_v48 = vpack.c.bf16 %v1222_v27, %v1222_v27 }
 0x1dd   :  { %1469 = vst.msk [vmem:[%s2817_s3 + $0xc0] sm:$0xf] %vm1420_vm2, %v1690_v48 }

// kernel: _lambda_.11
= control target key start
LH: loop header
LB: loop body
LE: loop exit
PB: predicated region body
PF: predicated region fallthrough
CT: control target
= control target key end

     0   :  { %s855_s14 = smov 0   ;;  %s1235_s0 = inlined_call_operand.vmem [shape: bf16[1568,144], index: 0, kind: input, shape index: {}]   ;;  %s1236_s1 = inlined_call_operand.vmem [shape: bf16[1,144], index: 1, kind: input, shape index: {}]   ;;  %s1237_s2 = inlined_call_operand.<no memory space> [shape: f32[1,1], index: 2, kind: input, shape index: {}]   ;;  %s1238_s3 = inlined_call_operand.vmem [shape: f32[1568,1], index: 3, kind: output, shape index: {}]  }
   0x1   :  { %v8_v0 = vstv %s1237_s2 }
   0x2   :  { %9 = vst [vmem:[#allocation2] sm:$0x1] %v8_v0 }
   0x3 LB: > { %s804_s15 = sadd.s32 4294967295, %s830_s14   ;;  %p808_p0 = scmp.ge.s32.totalorder %s830_s14, 1  ;;  %s830_s14 = sphi %s855_s14, %s15_s14  }
   0x4   : > { %p141_p1 = scmp.lt.s32.totalorder %s830_s14, 5 }
   0x6   : > { %p142_p2 = pnand %p808_p0, %p141_p1 }
   0x7   : > { %s166_s16 = smul.u32 (!%p142_p2), 49, %s804_s15  ;;  %v326_v1 = vld [vmem:[%s1236_s1] sm:$0x3] (!%p142_p2)  ;;  %v329_v2 = vlaneseq (!%p142_p2)  ;;  %vm445_vm0 = vcmask (!%p142_p2), 130048   ;;  %vm698_vm1 = vcmask (!%p142_p2), 7168  }
   0x8   : > { %145 = sbr.rel (%p142_p2) target bundleno = 267 (0x10b), region = 32  ;;  %v327_v3 = vunpack.c.l.bf16 (!%p142_p2), %v326_v1 }
   0x9   : > { %p167_p3 = scmp.lt.s32.totalorder (!%p142_p2), %s166_s16, 195  ;;  %v330_v4 = vshrl.u32 (!%p142_p2), %v329_v2, 7 }
   0xb   : > { %v331_v5 = vsub.s32 (!%p142_p2), 0, %v330_v4  ;;  %v335_v6 = vsub.s32 (!%p142_p2), 2, %v330_v4 }
   0xd   : > { %v332_v7 = vrot.slane (!%p142_p2), %v327_v3, %v331_v5  ;;  %v336_v8 = vrot.slane (!%p142_p2), %v327_v3, %v335_v6 }
   0xf   : > { %s1240_s16 = smov (!%p167_p3, %s166_s16), 195  ;;  %v877_v10 = vrot.slane %v332_v7, %v331_v5  ;;  %v879_v11 = vrot.slane %v336_v8, %v331_v5 }
  0x10   : > { %s815_s2 = sshll.u32 %s1240_s16, 3 }
  0x11   : > { %s874_s21 = scalar_lea.vmem %s1235_s0, %s815_s2  ;;  %s1083_s24 = scalar_lea.vmem %s1238_s3, %s815_s2 }
  0x12   : > { %v179_v9 = vld [vmem:[%s874_s21] sm:$0xff]  ;;  %v181_v12 = vld [vmem:[%s874_s21 + $0x10] sm:$0xff]  ;;  %v180_v13 = vld [vmem:[%s874_s21 + $0x8] sm:$0xff] }
  0x13   : > { %v228_v14 = vunpack.c.l.bf16 %v179_v9  ;;  %v229_v15 = vunpack.c.h.bf16 %v179_v9  ;;  %v232_v16 = vunpack.c.l.bf16 %v181_v12  ;;  %v233_v17 = vunpack.c.h.bf16 %v181_v12  ;;  %v182_v18 = vld [vmem:[%s874_s21 + $0x18] sm:$0xff]  ;;  %v183_v23 = vld [vmem:[%s874_s21 + $0x20] sm:$0xff]  ;;  %v184_v36 = vld [vmem:[%s874_s21 + $0x28] sm:$0xff] }
  0x14   : > { %v230_v19 = vunpack.c.l.bf16 %v180_v13  ;;  %v231_v20 = vunpack.c.h.bf16 %v180_v13  ;;  %v234_v21 = vunpack.c.l.bf16 %v182_v18  ;;  %v235_v22 = vunpack.c.h.bf16 %v182_v18  ;;  %v185_v37 = vld [vmem:[%s874_s21 + $0x30] sm:$0xff]  ;;  %v186_v42 = vld [vmem:[%s874_s21 + $0x38] sm:$0xff]  ;;  %v187_v47 = vld [vmem:[%s874_s21 + $0x40] sm:$0xff] }
  0x15   : > { %v347_v24 = vmul.f32 %v877_v10, %v228_v14  ;;  %v348_v25 = vmul.f32 %v879_v11, %v229_v15  ;;  %v351_v26 = vmul.f32 %v877_v10, %v232_v16  ;;  %v352_v27 = vmul.f32 %v879_v11, %v233_v17  ;;  %v188_v55 = vld [vmem:[%s874_s21 + $0x48] sm:$0xff]  ;;  %v189_v4 = vld [vmem:[%s874_s21 + $0x50] sm:$0xff]  ;;  %v190_v9 = vld [vmem:[%s874_s21 + $0x58] sm:$0xff] }
  0x16   : > { %v349_v28 = vmul.f32 %v877_v10, %v230_v19  ;;  %v350_v29 = vmul.f32 %v879_v11, %v231_v20  ;;  %v353_v30 = vmul.f32 %v877_v10, %v234_v21  ;;  %v354_v31 = vmul.f32 %v879_v11, %v235_v22  ;;  %v191_v19 = vld [vmem:[%s874_s21 + $0x60] sm:$0xff] }
  0x17   : > { %v446_v32 = vsel %vm445_vm0, %v348_v25, 0.0  ;;  %v454_v33 = vsel %vm445_vm0, %v352_v27, 0.0  ;;  %v236_v34 = vunpack.c.l.bf16 %v183_v23  ;;  %v237_v35 = vunpack.c.h.bf16 %v183_v23  ;;  %v193_v25 = vld [vmem:[%s874_s21 + $0x70] sm:$0xff] }
  0x18   : > { %v447_v38 = vadd.f32 %v446_v32, %v347_v24  ;;  %v455_v39 = vadd.f32 %v454_v33, %v351_v26  ;;  %v450_v40 = vsel %vm445_vm0, %v350_v29, 0.0  ;;  %v458_v41 = vsel %vm445_vm0, %v354_v31, 0.0  ;;  %v192_v24 = vld [vmem:[%s874_s21 + $0x68] sm:$0xff] }
  0x19   : > { %v451_v43 = vadd.f32 %v450_v40, %v349_v28  ;;  %v459_v44 = vadd.f32 %v458_v41, %v353_v30  ;;  %v355_v45 = vmul.f32 %v877_v10, %v236_v34  ;;  %v356_v46 = vmul.f32 %v879_v11, %v237_v35  ;;  %v194_v35 = vld [vmem:[%s874_s21 + $0x78] sm:$0xff]  ;;  %v195_v40 = vld [vmem:[%s874_s21 + $0x80] sm:$0xff] }
  0x1a   : > { %448 = vadd.xlane.f32.xlu0 %v447_v38  ;;  %456 = vadd.xlane.f32.xlu1 %v455_v39  ;;  %v238_v48 = vunpack.c.l.bf16 %v184_v36  ;;  %v239_v49 = vunpack.c.h.bf16 %v184_v36  ;;  %v240_v50 = vunpack.c.l.bf16 %v185_v37  ;;  %v241_v51 = vunpack.c.h.bf16 %v185_v37 }
  0x1b   : > { %v462_v52 = vsel %vm445_vm0, %v356_v46, 0.0  ;;  %v242_v53 = vunpack.c.l.bf16 %v186_v42  ;;  %v243_v54 = vunpack.c.h.bf16 %v186_v42  ;;  %v244_v59 = vunpack.c.l.bf16 %v187_v47 }
  0x1c   : > { %v357_v56 = vmul.f32 %v877_v10, %v238_v48  ;;  %v358_v57 = vmul.f32 %v879_v11, %v239_v49  ;;  %v359_v58 = vmul.f32 %v877_v10, %v240_v50  ;;  %v463_v60 = vadd.f32 %v462_v52, %v355_v45  ;;  %v196_v45 = vld [vmem:[%s874_s21 + $0x88] sm:$0xff] }
  0x1d   : > { %v360_v61 = vmul.f32 %v879_v11, %v241_v51  ;;  %v362_v62 = vmul.f32 %v879_v11, %v243_v54  ;;  %v245_v63 = vunpack.c.h.bf16 %v187_v47  ;;  %v361_v1 = vmul.f32 %v877_v10, %v242_v53 }
  0x1e   : > { %452 = vadd.xlane.f32.xlu0 %v451_v43  ;;  %460 = vadd.xlane.f32.xlu1 %v459_v44  ;;  %v466_v0 = vsel %vm445_vm0, %v358_v57, 0.0  ;;  %v246_v2 = vunpack.c.l.bf16 %v188_v55  ;;  %v247_v3 = vunpack.c.h.bf16 %v188_v55  ;;  %v363_v13 = vmul.f32 %v877_v10, %v244_v59  ;;  %v197_v57 = vld [vmem:[%s874_s21 + $0x90] sm:$0xff] }
  0x1f   : > { %v467_v5 = vadd.f32 %v466_v0, %v357_v56  ;;  %v470_v6 = vsel %vm445_vm0, %v360_v61, 0.0  ;;  %v474_v7 = vsel %vm445_vm0, %v362_v62, 0.0  ;;  %v364_v8 = vmul.f32 %v879_v11, %v245_v63 }
  0x20   : > { %v471_v12 = vadd.f32 %v470_v6, %v359_v58  ;;  %v366_v14 = vmul.f32 %v879_v11, %v247_v3  ;;  %v365_v16 = vmul.f32 %v877_v10, %v246_v2  ;;  %v248_v17 = vunpack.c.l.bf16 %v189_v4 }
  0x21   : > { %v478_v15 = vsel %vm445_vm0, %v364_v8, 0.0  ;;  %v249_v18 = vunpack.c.h.bf16 %v189_v4  ;;  %v475_v20 = vadd.f32 %v474_v7, %v361_v1  ;;  %v250_v22 = vunpack.c.l.bf16 %v190_v9  ;;  %v199_v7 = vld [vmem:[%s874_s21 + $0xa0] sm:$0xff] }
  0x22   : > { %464 = vadd.xlane.f32.xlu0 %v463_v60  ;;  %468 = vadd.xlane.f32.xlu1 %v467_v5  ;;  %v482_v21 = vsel %vm445_vm0, %v366_v14, 0.0  ;;  %v251_v23 = vunpack.c.h.bf16 %v190_v9  ;;  %v479_v27 = vadd.f32 %v478_v15, %v363_v13  ;;  %v252_v29 = vunpack.c.l.bf16 %v191_v19  ;;  %v198_v60 = vld [vmem:[%s874_s21 + $0x98] sm:$0xff] }
  0x23   : > { %v368_v26 = vmul.f32 %v879_v11, %v249_v18  ;;  %v253_v30 = vunpack.c.h.bf16 %v191_v19  ;;  %v483_v31 = vadd.f32 %v482_v21, %v365_v16  ;;  %v367_v32 = vmul.f32 %v877_v10, %v248_v17 }
  0x24   : > { %v370_v28 = vmul.f32 %v879_v11, %v251_v23  ;;  %v255_v33 = vunpack.c.h.bf16 %v192_v24  ;;  %v257_v34 = vunpack.c.h.bf16 %v193_v25  ;;  %v369_v37 = vmul.f32 %v877_v10, %v250_v22  ;;  %v201_v23 = vld [vmem:[%s874_s21 + $0xb0] sm:$0xff] }
  0x25   : > { %v486_v36 = vsel %vm445_vm0, %v368_v26, 0.0  ;;  %v372_v38 = vmul.f32 %v879_v11, %v253_v30  ;;  %v254_v39 = vunpack.c.l.bf16 %v192_v24  ;;  %v256_v43 = vunpack.c.l.bf16 %v193_v25  ;;  %v202_v25 = vld [vmem:[%s874_s21 + $0xb8] sm:$0xff] }
  0x26   : > { %472 = vadd.xlane.f32.xlu0 %v471_v12  ;;  %476 = vadd.xlane.f32.xlu1 %v475_v20  ;;  %v490_v41 = vsel %vm445_vm0, %v370_v28, 0.0  ;;  %v374_v42 = vmul.f32 %v879_v11, %v255_v33  ;;  %v259_v44 = vunpack.c.h.bf16 %v194_v35  ;;  %v487_v46 = vadd.f32 %v486_v36, %v367_v32  ;;  %v200_v12 = vld [vmem:[%s874_s21 + $0xa8] sm:$0xff] }
  0x27   : > { %v371_v47 = vmul.f32 %v877_v10, %v252_v29  ;;  %v376_v48 = vmul.f32 %v879_v11, %v257_v34  ;;  %v261_v49 = vunpack.c.h.bf16 %v195_v40  ;;  %v491_v50 = vadd.f32 %v490_v41, %v369_v37  ;;  %v203_v34 = vld [vmem:[%s874_s21 + $0xc0] sm:$0xff] }
  0x28   : > { %v494_v51 = vsel %vm445_vm0, %v372_v38, 0.0  ;;  %v373_v52 = vmul.f32 %v877_v10, %v254_v39  ;;  %v258_v53 = vunpack.c.l.bf16 %v194_v35  ;;  %v498_v54 = vsel %vm445_vm0, %v374_v42, 0.0  ;;  %v204_v39 = vld [vmem:[%s874_s21 + $0xc8] sm:$0xff] }
  0x29   : > { %v378_v55 = vmul.f32 %v879_v11, %v259_v44  ;;  %v263_v56 = vunpack.c.h.bf16 %v196_v45  ;;  %v375_v58 = vmul.f32 %v877_v10, %v256_v43  ;;  %v260_v59 = vunpack.c.l.bf16 %v195_v40 }
  0x2a   : > { %480 = vadd.xlane.f32.xlu0 %v479_v27  ;;  %484 = vadd.xlane.f32.xlu1 %v483_v31  ;;  %v495_v61 = vadd.f32 %v494_v51, %v371_v47  ;;  %v502_v62 = vsel %vm445_vm0, %v376_v48, 0.0  ;;  %v380_v63 = vmul.f32 %v879_v11, %v261_v49  ;;  %v262_v0 = vunpack.c.l.bf16 %v196_v45  ;;  %v205_v51 = vld [vmem:[%s874_s21 + $0xd0] sm:$0xff] }
  0x2b   : > { %v499_v1 = vadd.f32 %v498_v54, %v373_v52  ;;  %v377_v2 = vmul.f32 %v877_v10, %v258_v53  ;;  %v382_v3 = vmul.f32 %v879_v11, %v263_v56  ;;  %v265_v4 = vunpack.c.h.bf16 %v197_v57  ;;  %v206_v53 = vld [vmem:[%s874_s21 + $0xd8] sm:$0xff] }
  0x2c   : > { %v506_v5 = vsel %vm445_vm0, %v378_v55, 0.0  ;;  %v267_v6 = vunpack.c.h.bf16 %v198_v60  ;;  %v503_v8 = vadd.f32 %v502_v62, %v375_v58  ;;  %v379_v9 = vmul.f32 %v877_v10, %v260_v59 }
  0x2d   : > { %v510_v13 = vsel %vm445_vm0, %v380_v63, 0.0  ;;  %v381_v14 = vmul.f32 %v877_v10, %v262_v0  ;;  %v264_v15 = vunpack.c.l.bf16 %v197_v57  ;;  %v266_v16 = vunpack.c.l.bf16 %v198_v60 }
  0x2e   : > { %488 = vadd.xlane.f32.xlu0 %v487_v46  ;;  %492 = vadd.xlane.f32.xlu1 %v491_v50  ;;  %v507_v17 = vadd.f32 %v506_v5, %v377_v2  ;;  %v514_v18 = vsel %vm445_vm0, %v382_v3, 0.0  ;;  %v384_v19 = vmul.f32 %v879_v11, %v265_v4  ;;  %v269_v20 = vunpack.c.h.bf16 %v199_v7  ;;  %v208_v3 = vld [vmem:[%s874_s21 + $0xe8] sm:$0xff] }
  0x2f   : > { %v386_v21 = vmul.f32 %v879_v11, %v267_v6  ;;  %v271_v22 = vunpack.c.h.bf16 %v200_v12  ;;  %v268_v24 = vunpack.c.l.bf16 %v199_v7  ;;  %v511_v26 = vadd.f32 %v510_v13, %v379_v9 }
  0x30   : > { %v515_v27 = vadd.f32 %v514_v18, %v381_v14  ;;  %v383_v28 = vmul.f32 %v877_v10, %v264_v15  ;;  %v385_v29 = vmul.f32 %v877_v10, %v266_v16  ;;  %v518_v30 = vsel %vm445_vm0, %v384_v19, 0.0  ;;  %v209_v14 = vld [vmem:[%s874_s21 + $0xf0] sm:$0xff]  ;;  %v210_v19 = vld [vmem:[%s874_s21 + $0xf8] sm:$0xff] }
  0x31   : > { %v388_v31 = vmul.f32 %v879_v11, %v269_v20  ;;  %v270_v32 = vunpack.c.l.bf16 %v200_v12  ;;  %v273_v33 = vunpack.c.h.bf16 %v201_v23  ;;  %v522_v35 = vsel %vm445_vm0, %v386_v21, 0.0 }
  0x32   : > { %496 = vadd.xlane.f32.xlu0 %v495_v61  ;;  %500 = vadd.xlane.f32.xlu1 %v499_v1  ;;  %v390_v36 = vmul.f32 %v879_v11, %v271_v22  ;;  %v275_v37 = vunpack.c.h.bf16 %v202_v25  ;;  %v387_v38 = vmul.f32 %v877_v10, %v268_v24  ;;  %v519_v40 = vadd.f32 %v518_v30, %v383_v28  ;;  %v207_v1 = vld [vmem:[%s874_s21 + $0xe0] sm:$0xff] }
  0x33   : > { %v272_v41 = vunpack.c.l.bf16 %v201_v23  ;;  %v274_v42 = vunpack.c.l.bf16 %v202_v25  ;;  %v277_v43 = vunpack.c.h.bf16 %v203_v34  ;;  %v523_v44 = vadd.f32 %v522_v35, %v385_v29  ;;  %v211_v28 = vld [vmem:[%s874_s21 + $0x100] sm:$0xff] }
  0x34   : > { %v526_v45 = vsel %vm445_vm0, %v388_v31, 0.0  ;;  %v389_v46 = vmul.f32 %v877_v10, %v270_v32  ;;  %v392_v47 = vmul.f32 %v879_v11, %v273_v33  ;;  %v530_v48 = vsel %vm445_vm0, %v390_v36, 0.0  ;;  %v212_v33 = vld [vmem:[%s874_s21 + $0x108] sm:$0xff] }
  0x35   : > { %v394_v49 = vmul.f32 %v879_v11, %v275_v37  ;;  %v279_v50 = vunpack.c.h.bf16 %v204_v39  ;;  %v276_v52 = vunpack.c.l.bf16 %v203_v34  ;;  %v527_v54 = vadd.f32 %v526_v45, %v387_v38  ;;  %v213_v45 = vld [vmem:[%s874_s21 + $0x110] sm:$0xff] }
  0x36   : > { %504 = vadd.xlane.f32.xlu0 %v503_v8  ;;  %508 = vadd.xlane.f32.xlu1 %v507_v17  ;;  %v391_v55 = vmul.f32 %v877_v10, %v272_v41  ;;  %v393_v56 = vmul.f32 %v877_v10, %v274_v42  ;;  %v396_v57 = vmul.f32 %v879_v11, %v277_v43  ;;  %v534_v59 = vsel %vm445_vm0, %v392_v47, 0.0 }
  0x37   : > { %v531_v58 = vadd.f32 %v530_v48, %v389_v46  ;;  %v278_v60 = vunpack.c.l.bf16 %v204_v39  ;;  %v281_v61 = vunpack.c.h.bf16 %v205_v51  ;;  %v538_v62 = vsel %vm445_vm0, %v394_v49, 0.0  ;;  %v214_v48 = vld [vmem:[%s874_s21 + $0x118] sm:$0xff] }
  0x38   : > { %v398_v63 = vmul.f32 %v879_v11, %v279_v50  ;;  %v283_v0 = vunpack.c.h.bf16 %v206_v53  ;;  %v395_v2 = vmul.f32 %v877_v10, %v276_v52  ;;  %v535_v4 = vadd.f32 %v534_v59, %v391_v55 }
  0x39   : > { %v542_v5 = vsel %vm445_vm0, %v396_v57, 0.0  ;;  %v280_v6 = vunpack.c.l.bf16 %v205_v51  ;;  %v282_v7 = vunpack.c.l.bf16 %v206_v53  ;;  %v539_v8 = vadd.f32 %v538_v62, %v393_v56  ;;  %v215_v56 = vld [vmem:[%s874_s21 + $0x120] sm:$0xff]  ;;  %v216_v62 = vld [vmem:[%s874_s21 + $0x128] sm:$0xff] }
  0x3a   : > { %512 = vadd.xlane.f32.xlu0 %v511_v26  ;;  %516 = vadd.xlane.f32.xlu1 %v515_v27  ;;  %v397_v9 = vmul.f32 %v877_v10, %v278_v60  ;;  %v400_v12 = vmul.f32 %v879_v11, %v281_v61  ;;  %v285_v13 = vunpack.c.h.bf16 %v207_v1  ;;  %v546_v15 = vsel %vm445_vm0, %v398_v63, 0.0 }
  0x3b   : > { %v402_v16 = vmul.f32 %v879_v11, %v283_v0  ;;  %v287_v17 = vunpack.c.h.bf16 %v208_v3  ;;  %v543_v18 = vadd.f32 %v542_v5, %v395_v2  ;;  %v399_v20 = vmul.f32 %v877_v10, %v280_v6  ;;  %v217_v6 = vld [vmem:[%s874_s21 + $0x130] sm:$0xff] }
  0x3c   : > { %v401_v21 = vmul.f32 %v877_v10, %v282_v7  ;;  %v284_v22 = vunpack.c.l.bf16 %v207_v1  ;;  %v289_v23 = vunpack.c.h.bf16 %v209_v14  ;;  %v547_v24 = vadd.f32 %v546_v15, %v397_v9 }
  0x3d   : > { %v550_v25 = vsel %vm445_vm0, %v400_v12, 0.0  ;;  %v404_v26 = vmul.f32 %v879_v11, %v285_v13  ;;  %v286_v27 = vunpack.c.l.bf16 %v208_v3  ;;  %v554_v29 = vsel %vm445_vm0, %v402_v16, 0.0  ;;  %v218_v12 = vld [vmem:[%s874_s21 + $0x138] sm:$0xff] }
  0x3e   : > { %520 = vadd.xlane.f32.xlu0 %v519_v40  ;;  %524 = vadd.xlane.f32.xlu1 %v523_v44  ;;  %v406_v30 = vmul.f32 %v879_v11, %v287_v17  ;;  %v291_v31 = vunpack.c.h.bf16 %v210_v19  ;;  %v288_v32 = vunpack.c.l.bf16 %v209_v14  ;;  %v551_v34 = vadd.f32 %v550_v25, %v399_v20  ;;  %v219_v25 = vld [vmem:[%s874_s21 + $0x140] sm:$0xff] }
  0x3f   : > { %v403_v35 = vmul.f32 %v877_v10, %v284_v22  ;;  %v408_v36 = vmul.f32 %v879_v11, %v289_v23  ;;  %v293_v37 = vunpack.c.h.bf16 %v211_v28  ;;  %v555_v38 = vadd.f32 %v554_v29, %v401_v21 }
  0x40   : > { %v558_v39 = vsel %vm445_vm0, %v404_v26, 0.0  ;;  %v405_v40 = vmul.f32 %v877_v10, %v286_v27  ;;  %v290_v41 = vunpack.c.l.bf16 %v210_v19  ;;  %v562_v42 = vsel %vm445_vm0, %v406_v30, 0.0 }
  0x41   : > { %v410_v43 = vmul.f32 %v879_v11, %v291_v31  ;;  %v295_v44 = vunpack.c.h.bf16 %v212_v33  ;;  %v407_v46 = vmul.f32 %v877_v10, %v288_v32  ;;  %v292_v47 = vunpack.c.l.bf16 %v211_v28  ;;  %v220_v28 = vld [vmem:[%s874_s21 + $0x148] sm:$0xff] }
  0x42   : > { %528 = vadd.xlane.f32.xlu0 %v527_v54  ;;  %532 = vadd.xlane.f32.xlu1 %v531_v58  ;;  %v559_v49 = vadd.f32 %v558_v39, %v403_v35  ;;  %v566_v50 = vsel %vm445_vm0, %v408_v36, 0.0  ;;  %v412_v51 = vmul.f32 %v879_v11, %v293_v37  ;;  %v563_v52 = vadd.f32 %v562_v42, %v405_v40  ;;  %v221_v39 = vld [vmem:[%s874_s21 + $0x150] sm:$0xff]  ;;  %v222_v42 = vld [vmem:[%s874_s21 + $0x158] sm:$0xff] }
  0x43   : > { %v409_v53 = vmul.f32 %v877_v10, %v290_v41  ;;  %v294_v54 = vunpack.c.l.bf16 %v212_v33  ;;  %v297_v55 = vunpack.c.h.bf16 %v213_v45  ;;  %v570_v57 = vsel %vm445_vm0, %v410_v43, 0.0 }
  0x44   : > { %v414_v58 = vmul.f32 %v879_v11, %v295_v44  ;;  %v299_v59 = vunpack.c.h.bf16 %v214_v48  ;;  %v567_v60 = vadd.f32 %v566_v50, %v407_v46  ;;  %v411_v61 = vmul.f32 %v877_v10, %v292_v47 }
  0x45   : > { %v574_v63 = vsel %vm445_vm0, %v412_v51, 0.0  ;;  %v296_v0 = vunpack.c.l.bf16 %v213_v45  ;;  %v298_v1 = vunpack.c.l.bf16 %v214_v48  ;;  %v301_v2 = vunpack.c.h.bf16 %v215_v56 }
  0x46   : > { %536 = vadd.xlane.f32.xlu0 %v535_v4  ;;  %540 = vadd.xlane.f32.xlu1 %v539_v8  ;;  %v571_v3 = vadd.f32 %v570_v57, %v409_v53  ;;  %v413_v4 = vmul.f32 %v877_v10, %v294_v54  ;;  %v416_v5 = vmul.f32 %v879_v11, %v297_v55  ;;  %v578_v7 = vsel %vm445_vm0, %v414_v58, 0.0  ;;  %v223_v53 = vld [vmem:[%s874_s21 + $0x160] sm:$0xff]  ;;  %v224_v55 = vld [vmem:[%s874_s21 + $0x168] sm:$0xff] }
  0x47   : > { %v418_v8 = vmul.f32 %v879_v11, %v299_v59  ;;  %v303_v9 = vunpack.c.h.bf16 %v216_v62  ;;  %v575_v13 = vadd.f32 %v574_v63, %v411_v61  ;;  %v300_v14 = vunpack.c.l.bf16 %v215_v56 }
  0x48   : > { %v415_v15 = vmul.f32 %v877_v10, %v296_v0  ;;  %v417_v16 = vmul.f32 %v877_v10, %v298_v1  ;;  %v420_v17 = vmul.f32 %v879_v11, %v301_v2  ;;  %v579_v19 = vadd.f32 %v578_v7, %v413_v4  ;;  %v226_v4 = vld [vmem:[%s874_s21 + $0x178] sm:$0xff] }
  0x49   : > { %v582_v20 = vsel %vm445_vm0, %v416_v5, 0.0  ;;  %v302_v21 = vunpack.c.l.bf16 %v216_v62  ;;  %v307_v22 = vunpack.c.h.bf16 %v218_v12  ;;  %v586_v23 = vsel %vm445_vm0, %v418_v8, 0.0 }
  0x4a   : > { %544 = vadd.xlane.f32.xlu0 %v543_v18  ;;  %548 = vadd.xlane.f32.xlu1 %v547_v24  ;;  %v305_v18 = vunpack.c.h.bf16 %v217_v6  ;;  %v422_v24 = vmul.f32 %v879_v11, %v303_v9  ;;  %v419_v26 = vmul.f32 %v877_v10, %v300_v14  ;;  %v304_v27 = vunpack.c.l.bf16 %v217_v6 }
  0x4b   : > { %v583_v29 = vadd.f32 %v582_v20, %v415_v15  ;;  %v590_v30 = vsel %vm445_vm0, %v420_v17, 0.0  ;;  %v306_v32 = vunpack.c.l.bf16 %v218_v12  ;;  %v587_v33 = vadd.f32 %v586_v23, %v417_v16 }
  0x4c   : > { %v424_v31 = vmul.f32 %v879_v11, %v305_v18  ;;  %v426_v35 = vmul.f32 %v879_v11, %v307_v22  ;;  %v309_v36 = vunpack.c.h.bf16 %v219_v25  ;;  %v594_v37 = vsel %vm445_vm0, %v422_v24, 0.0 }
  0x4d   : > { %v591_v40 = vadd.f32 %v590_v30, %v419_v26  ;;  %v423_v41 = vmul.f32 %v877_v10, %v304_v27  ;;  %v425_v44 = vmul.f32 %v877_v10, %v306_v32  ;;  %v308_v45 = vunpack.c.l.bf16 %v219_v25 }
  0x4e   : > { %552 = vadd.xlane.f32.xlu0 %v551_v34  ;;  %556 = vadd.xlane.f32.xlu1 %v555_v38  ;;  %v421_v34 = vmul.f32 %v877_v10, %v302_v21  ;;  %v311_v38 = vunpack.c.h.bf16 %v220_v28  ;;  %v598_v43 = vsel %vm445_vm0, %v424_v31, 0.0  ;;  %v310_v46 = vunpack.c.l.bf16 %v220_v28 }
  0x4f   : > { %v602_v48 = vsel %vm445_vm0, %v426_v35, 0.0  ;;  %v313_v50 = vunpack.c.h.bf16 %v221_v39  ;;  %v599_v54 = vadd.f32 %v598_v43, %v423_v41  ;;  %v427_v57 = vmul.f32 %v877_v10, %v308_v45 }
  0x50   : > { %v595_v47 = vadd.f32 %v594_v37, %v421_v34  ;;  %v430_v51 = vmul.f32 %v879_v11, %v311_v38  ;;  %v603_v56 = vadd.f32 %v602_v48, %v425_v44  ;;  %v429_v58 = vmul.f32 %v877_v10, %v310_v46  ;;  %v1076_v44 = vld [vmem:[#allocation2] ss:$0 sm:$0xff] }
  0x51   : > { %v312_v59 = vunpack.c.l.bf16 %v221_v39  ;;  %v432_v61 = vmul.f32 %v879_v11, %v313_v50  ;;  %v314_v62 = vunpack.c.l.bf16 %v222_v42  ;;  %v317_v63 = vunpack.c.h.bf16 %v223_v53 }
  0x52   : > { %560 = vadd.xlane.f32.xlu0 %v559_v49  ;;  %564 = vadd.xlane.f32.xlu1 %v563_v52  ;;  %v428_v49 = vmul.f32 %v879_v11, %v309_v36  ;;  %v315_v52 = vunpack.c.h.bf16 %v222_v42  ;;  %v610_v0 = vsel %vm445_vm0, %v430_v51, 0.0  ;;  %v319_v2 = vunpack.c.h.bf16 %v224_v55 }
  0x53   : > { %v431_v6 = vmul.f32 %v877_v10, %v312_v59  ;;  %v316_v7 = vunpack.c.l.bf16 %v223_v53  ;;  %v318_v8 = vunpack.c.l.bf16 %v224_v55  ;;  %v611_v9 = vadd.f32 %v610_v0, %v429_v58 }
  0x54   : > { %v434_v1 = vmul.f32 %v879_v11, %v315_v52  ;;  %v614_v12 = vsel %vm445_vm0, %v432_v61, 0.0  ;;  %v436_v14 = vmul.f32 %v879_v11, %v317_v63  ;;  %v438_v16 = vmul.f32 %v879_v11, %v319_v2 }
  0x55   : > { %v323_v18 = vunpack.c.h.bf16 %v226_v4  ;;  %v615_v20 = vadd.f32 %v614_v12, %v431_v6  ;;  %v435_v21 = vmul.f32 %v877_v10, %v316_v7  ;;  %v437_v22 = vmul.f32 %v877_v10, %v318_v8 }
  0x56   : > { %568 = vadd.xlane.f32.xlu0 %v567_v60  ;;  %572 = vadd.xlane.f32.xlu1 %v571_v3  ;;  %v606_v60 = vsel %vm445_vm0, %v428_v49, 0.0  ;;  %v225_v3 = vld [vmem:[%s874_s21 + $0x170] sm:$0xff]  ;;  %v618_v15 = vsel %vm445_vm0, %v434_v1, 0.0  ;;  %v622_v24 = vsel %vm445_vm0, %v436_v14, 0.0  ;;  %v322_v26 = vunpack.c.l.bf16 %v226_v4 }
  0x57   : > { %v607_v5 = vadd.f32 %v606_v60, %v427_v57  ;;  %v321_v17 = vunpack.c.h.bf16 %v225_v3  ;;  %v320_v25 = vunpack.c.l.bf16 %v225_v3  ;;  %v626_v27 = vsel %vm445_vm0, %v438_v16, 0.0 }
  0x58   : > { %v623_v31 = vadd.f32 %v622_v24, %v435_v21  ;;  %v627_v32 = vadd.f32 %v626_v27, %v437_v22  ;;  %v441_v34 = vmul.f32 %v877_v10, %v322_v26 }
  0x59   : > { %v440_v28 = vmul.f32 %v879_v11, %v321_v17 }
  0x5a   : > { %576 = vadd.xlane.f32.xlu0 %v575_v13  ;;  %580 = vadd.xlane.f32.xlu1 %v579_v19  ;;  %v433_v13 = vmul.f32 %v877_v10, %v314_v62  ;;  %v227_v19 = vld [vmem:[%s874_s21 + $0x180] sm:$0xff] }
  0x5b   : > { %v325_v30 = vunpack.c.h.bf16 %v227_v19  ;;  %v324_v35 = vunpack.c.l.bf16 %v227_v19  ;;  %v630_v36 = vsel %vm445_vm0, %v440_v28, 0.0 }
  0x5c   : > { %v619_v23 = vadd.f32 %v618_v15, %v433_v13 }
  0x5d   : > { %v444_v38 = vmul.f32 %v879_v11, %v325_v30  ;;  %v443_v41 = vmul.f32 %v877_v10, %v324_v35 }
  0x5e   : > { %584 = vadd.xlane.f32.xlu0 %v583_v29  ;;  %588 = vadd.xlane.f32.xlu1 %v587_v33  ;;  %v442_v29 = vmul.f32 %v879_v11, %v323_v18  ;;  %v439_v33 = vmul.f32 %v877_v10, %v320_v25 }
  0x5f   : > { %v638_v42 = vsel %vm445_vm0, %v444_v38, 0.0 }
  0x60   : > { %v634_v37 = vsel %vm445_vm0, %v442_v29, 0.0  ;;  %v631_v39 = vadd.f32 %v630_v36, %v439_v33  ;;  %v639_v43 = vadd.f32 %v638_v42, %v443_v41 }
  0x62   : > { %592 = vadd.xlane.f32.xlu0 %v591_v40  ;;  %596 = vadd.xlane.f32.xlu1 %v595_v47  ;;  %v635_v40 = vadd.f32 %v634_v37, %v441_v34 }
  0x66   : > { %600 = vadd.xlane.f32.xlu0 %v599_v54  ;;  %604 = vadd.xlane.f32.xlu1 %v603_v56 }
  0x6a   : > { %608 = vadd.xlane.f32.xlu0 %v607_v5  ;;  %612 = vadd.xlane.f32.xlu1 %v611_v9 }
  0x6e   : > { %616 = vadd.xlane.f32.xlu0 %v615_v20  ;;  %620 = vadd.xlane.f32.xlu1 %v619_v23 }
  0x72   : > { %624 = vadd.xlane.f32.xlu0 %v623_v31  ;;  %628 = vadd.xlane.f32.xlu1 %v627_v32 }
  0x76   : > { %632 = vadd.xlane.f32.xlu0 %v631_v39  ;;  %636 = vadd.xlane.f32.xlu1 %v635_v40 }
  0x7a   : > { %640 = vadd.xlane.f32.xlu0 %v639_v43 }
  0xa7   : > { %v449_v10 = vpop.xlane.xlu0 %448  ;;  %v457_v11 = vpop.xlane.xlu1 %456 }
  0xa8   : > { %v649_v45 = vadd.f32 %v1076_v44, %v449_v10  ;;  %v651_v46 = vadd.f32 %v1076_v44, %v457_v11 }
  0xaa   : > { %699 = vst.msk [vmem:[%s1083_s24] sm:$0xff] %vm698_vm1, %v649_v45  ;;  %701 = vst.msk [vmem:[%s1083_s24 + $0x10] sm:$0xff] %vm698_vm1, %v651_v46 }
  0xab   : > { %v453_v47 = vpop.xlane.xlu0 %452  ;;  %v461_v48 = vpop.xlane.xlu1 %460 }
  0xac   : > { %v650_v49 = vadd.f32 %v1076_v44, %v453_v47  ;;  %v652_v50 = vadd.f32 %v1076_v44, %v461_v48 }
  0xae   : > { %700 = vst.msk [vmem:[%s1083_s24 + $0x8] sm:$0xff] %vm698_vm1, %v650_v49  ;;  %702 = vst.msk [vmem:[%s1083_s24 + $0x18] sm:$0xff] %vm698_vm1, %v652_v50 }
  0xaf   : > { %v465_v51 = vpop.xlane.xlu0 %464  ;;  %v469_v52 = vpop.xlane.xlu1 %468 }
  0xb0   : > { %v653_v53 = vadd.f32 %v1076_v44, %v465_v51  ;;  %v654_v54 = vadd.f32 %v1076_v44, %v469_v52 }
  0xb2   : > { %703 = vst.msk [vmem:[%s1083_s24 + $0x20] sm:$0xff] %vm698_vm1, %v653_v53  ;;  %704 = vst.msk [vmem:[%s1083_s24 + $0x28] sm:$0xff] %vm698_vm1, %v654_v54 }
  0xb3   : > { %v473_v55 = vpop.xlane.xlu0 %472  ;;  %v477_v56 = vpop.xlane.xlu1 %476 }
  0xb4   : > { %v655_v57 = vadd.f32 %v1076_v44, %v473_v55  ;;  %v656_v58 = vadd.f32 %v1076_v44, %v477_v56 }
  0xb6   : > { %705 = vst.msk [vmem:[%s1083_s24 + $0x30] sm:$0xff] %vm698_vm1, %v655_v57  ;;  %706 = vst.msk [vmem:[%s1083_s24 + $0x38] sm:$0xff] %vm698_vm1, %v656_v58 }
  0xb7   : > { %v481_v59 = vpop.xlane.xlu0 %480  ;;  %v485_v60 = vpop.xlane.xlu1 %484 }
  0xb8   : > { %v657_v61 = vadd.f32 %v1076_v44, %v481_v59  ;;  %v658_v62 = vadd.f32 %v1076_v44, %v485_v60 }
  0xba   : > { %707 = vst.msk [vmem:[%s1083_s24 + $0x40] sm:$0xff] %vm698_vm1, %v657_v61  ;;  %708 = vst.msk [vmem:[%s1083_s24 + $0x48] sm:$0xff] %vm698_vm1, %v658_v62 }
  0xbb   : > { %v489_v63 = vpop.xlane.xlu0 %488  ;;  %v493_v0 = vpop.xlane.xlu1 %492 }
  0xbc   : > { %v659_v1 = vadd.f32 %v1076_v44, %v489_v63  ;;  %v660_v2 = vadd.f32 %v1076_v44, %v493_v0 }
  0xbe   : > { %709 = vst.msk [vmem:[%s1083_s24 + $0x50] sm:$0xff] %vm698_vm1, %v659_v1  ;;  %710 = vst.msk [vmem:[%s1083_s24 + $0x58] sm:$0xff] %vm698_vm1, %v660_v2 }
  0xbf   : > { %v497_v3 = vpop.xlane.xlu0 %496  ;;  %v501_v4 = vpop.xlane.xlu1 %500 }
  0xc0   : > { %v661_v5 = vadd.f32 %v1076_v44, %v497_v3  ;;  %v662_v6 = vadd.f32 %v1076_v44, %v501_v4 }
  0xc2   : > { %711 = vst.msk [vmem:[%s1083_s24 + $0x60] sm:$0xff] %vm698_vm1, %v661_v5  ;;  %712 = vst.msk [vmem:[%s1083_s24 + $0x68] sm:$0xff] %vm698_vm1, %v662_v6 }
  0xc3   : > { %v505_v7 = vpop.xlane.xlu0 %504  ;;  %v509_v8 = vpop.xlane.xlu1 %508 }
  0xc4   : > { %v663_v9 = vadd.f32 %v1076_v44, %v505_v7  ;;  %v664_v12 = vadd.f32 %v1076_v44, %v509_v8 }
  0xc6   : > { %713 = vst.msk [vmem:[%s1083_s24 + $0x70] sm:$0xff] %vm698_vm1, %v663_v9  ;;  %714 = vst.msk [vmem:[%s1083_s24 + $0x78] sm:$0xff] %vm698_vm1, %v664_v12 }
  0xc7   : > { %v513_v13 = vpop.xlane.xlu0 %512  ;;  %v517_v14 = vpop.xlane.xlu1 %516 }
  0xc8   : > { %v665_v15 = vadd.f32 %v1076_v44, %v513_v13  ;;  %v666_v16 = vadd.f32 %v1076_v44, %v517_v14 }
  0xca   : > { %715 = vst.msk [vmem:[%s1083_s24 + $0x80] sm:$0xff] %vm698_vm1, %v665_v15  ;;  %716 = vst.msk [vmem:[%s1083_s24 + $0x88] sm:$0xff] %vm698_vm1, %v666_v16 }
  0xcb   : > { %v521_v17 = vpop.xlane.xlu0 %520  ;;  %v525_v18 = vpop.xlane.xlu1 %524 }
  0xcc   : > { %v667_v19 = vadd.f32 %v1076_v44, %v521_v17  ;;  %v668_v20 = vadd.f32 %v1076_v44, %v525_v18 }
  0xce   : > { %717 = vst.msk [vmem:[%s1083_s24 + $0x90] sm:$0xff] %vm698_vm1, %v667_v19  ;;  %718 = vst.msk [vmem:[%s1083_s24 + $0x98] sm:$0xff] %vm698_vm1, %v668_v20 }
  0xcf   : > { %v529_v21 = vpop.xlane.xlu0 %528  ;;  %v533_v22 = vpop.xlane.xlu1 %532 }
  0xd0   : > { %v669_v23 = vadd.f32 %v1076_v44, %v529_v21  ;;  %v670_v24 = vadd.f32 %v1076_v44, %v533_v22 }
  0xd2   : > { %719 = vst.msk [vmem:[%s1083_s24 + $0xa0] sm:$0xff] %vm698_vm1, %v669_v23  ;;  %720 = vst.msk [vmem:[%s1083_s24 + $0xa8] sm:$0xff] %vm698_vm1, %v670_v24 }
  0xd3   : > { %v537_v25 = vpop.xlane.xlu0 %536  ;;  %v541_v26 = vpop.xlane.xlu1 %540 }
  0xd4   : > { %v671_v27 = vadd.f32 %v1076_v44, %v537_v25  ;;  %v672_v28 = vadd.f32 %v1076_v44, %v541_v26 }
  0xd6   : > { %721 = vst.msk [vmem:[%s1083_s24 + $0xb0] sm:$0xff] %vm698_vm1, %v671_v27  ;;  %722 = vst.msk [vmem:[%s1083_s24 + $0xb8] sm:$0xff] %vm698_vm1, %v672_v28 }
  0xd7   : > { %v545_v29 = vpop.xlane.xlu0 %544  ;;  %v549_v30 = vpop.xlane.xlu1 %548 }
  0xd8   : > { %v673_v31 = vadd.f32 %v1076_v44, %v545_v29  ;;  %v674_v32 = vadd.f32 %v1076_v44, %v549_v30 }
  0xda   : > { %723 = vst.msk [vmem:[%s1083_s24 + $0xc0] sm:$0xff] %vm698_vm1, %v673_v31  ;;  %724 = vst.msk [vmem:[%s1083_s24 + $0xc8] sm:$0xff] %vm698_vm1, %v674_v32 }
  0xdb   : > { %v553_v33 = vpop.xlane.xlu0 %552  ;;  %v557_v34 = vpop.xlane.xlu1 %556 }
  0xdc   : > { %v675_v35 = vadd.f32 %v1076_v44, %v553_v33  ;;  %v676_v36 = vadd.f32 %v1076_v44, %v557_v34 }
  0xde   : > { %725 = vst.msk [vmem:[%s1083_s24 + $0xd0] sm:$0xff] %vm698_vm1, %v675_v35  ;;  %726 = vst.msk [vmem:[%s1083_s24 + $0xd8] sm:$0xff] %vm698_vm1, %v676_v36 }
  0xdf   : > { %v561_v37 = vpop.xlane.xlu0 %560  ;;  %v565_v38 = vpop.xlane.xlu1 %564 }
  0xe0   : > { %v677_v39 = vadd.f32 %v1076_v44, %v561_v37  ;;  %v678_v40 = vadd.f32 %v1076_v44, %v565_v38 }
  0xe2   : > { %727 = vst.msk [vmem:[%s1083_s24 + $0xe0] sm:$0xff] %vm698_vm1, %v677_v39  ;;  %728 = vst.msk [vmem:[%s1083_s24 + $0xe8] sm:$0xff] %vm698_vm1, %v678_v40 }
  0xe3   : > { %v569_v41 = vpop.xlane.xlu0 %568  ;;  %v573_v42 = vpop.xlane.xlu1 %572 }
  0xe4   : > { %v679_v43 = vadd.f32 %v1076_v44, %v569_v41  ;;  %v680_v10 = vadd.f32 %v1076_v44, %v573_v42 }
  0xe6   : > { %729 = vst.msk [vmem:[%s1083_s24 + $0xf0] sm:$0xff] %vm698_vm1, %v679_v43  ;;  %730 = vst.msk [vmem:[%s1083_s24 + $0xf8] sm:$0xff] %vm698_vm1, %v680_v10 }
  0xe7   : > { %v577_v11 = vpop.xlane.xlu0 %576  ;;  %v581_v45 = vpop.xlane.xlu1 %580 }
  0xe8   : > { %v681_v46 = vadd.f32 %v1076_v44, %v577_v11  ;;  %v682_v47 = vadd.f32 %v1076_v44, %v581_v45 }
  0xea   : > { %731 = vst.msk [vmem:[%s1083_s24 + $0x100] sm:$0xff] %vm698_vm1, %v681_v46  ;;  %732 = vst.msk [vmem:[%s1083_s24 + $0x108] sm:$0xff] %vm698_vm1, %v682_v47 }
  0xeb   : > { %v585_v48 = vpop.xlane.xlu0 %584  ;;  %v589_v49 = vpop.xlane.xlu1 %588 }
  0xec   : > { %v683_v50 = vadd.f32 %v1076_v44, %v585_v48  ;;  %v684_v51 = vadd.f32 %v1076_v44, %v589_v49 }
  0xee   : > { %733 = vst.msk [vmem:[%s1083_s24 + $0x110] sm:$0xff] %vm698_vm1, %v683_v50  ;;  %734 = vst.msk [vmem:[%s1083_s24 + $0x118] sm:$0xff] %vm698_vm1, %v684_v51 }
  0xef   : > { %v593_v52 = vpop.xlane.xlu0 %592  ;;  %v597_v53 = vpop.xlane.xlu1 %596 }
  0xf0   : > { %v685_v54 = vadd.f32 %v1076_v44, %v593_v52  ;;  %v686_v55 = vadd.f32 %v1076_v44, %v597_v53 }
  0xf2   : > { %735 = vst.msk [vmem:[%s1083_s24 + $0x120] sm:$0xff] %vm698_vm1, %v685_v54  ;;  %736 = vst.msk [vmem:[%s1083_s24 + $0x128] sm:$0xff] %vm698_vm1, %v686_v55 }
  0xf3   : > { %v601_v56 = vpop.xlane.xlu0 %600  ;;  %v605_v57 = vpop.xlane.xlu1 %604 }
  0xf4   : > { %v687_v58 = vadd.f32 %v1076_v44, %v601_v56  ;;  %v688_v59 = vadd.f32 %v1076_v44, %v605_v57 }
  0xf6   : > { %737 = vst.msk [vmem:[%s1083_s24 + $0x130] sm:$0xff] %vm698_vm1, %v687_v58  ;;  %738 = vst.msk [vmem:[%s1083_s24 + $0x138] sm:$0xff] %vm698_vm1, %v688_v59 }
  0xf7   : > { %v609_v60 = vpop.xlane.xlu0 %608  ;;  %v613_v61 = vpop.xlane.xlu1 %612 }
  0xf8   : > { %v689_v62 = vadd.f32 %v1076_v44, %v609_v60  ;;  %v690_v63 = vadd.f32 %v1076_v44, %v613_v61 }
  0xfa   : > { %739 = vst.msk [vmem:[%s1083_s24 + $0x140] sm:$0xff] %vm698_vm1, %v689_v62  ;;  %740 = vst.msk [vmem:[%s1083_s24 + $0x148] sm:$0xff] %vm698_vm1, %v690_v63 }
  0xfb   : > { %v617_v0 = vpop.xlane.xlu0 %616  ;;  %v621_v1 = vpop.xlane.xlu1 %620 }
  0xfc   : > { %v691_v2 = vadd.f32 %v1076_v44, %v617_v0  ;;  %v692_v3 = vadd.f32 %v1076_v44, %v621_v1 }
  0xfe   : > { %741 = vst.msk [vmem:[%s1083_s24 + $0x150] sm:$0xff] %vm698_vm1, %v691_v2  ;;  %742 = vst.msk [vmem:[%s1083_s24 + $0x158] sm:$0xff] %vm698_vm1, %v692_v3 }
  0xff   : > { %v625_v4 = vpop.xlane.xlu0 %624  ;;  %v629_v5 = vpop.xlane.xlu1 %628 }
 0x100   : > { %v693_v6 = vadd.f32 %v1076_v44, %v625_v4  ;;  %v694_v7 = vadd.f32 %v1076_v44, %v629_v5 }
 0x102   : > { %743 = vst.msk [vmem:[%s1083_s24 + $0x160] sm:$0xff] %vm698_vm1, %v693_v6  ;;  %744 = vst.msk [vmem:[%s1083_s24 + $0x168] sm:$0xff] %vm698_vm1, %v694_v7 }
 0x103   : > { %v633_v8 = vpop.xlane.xlu0 %632  ;;  %v637_v9 = vpop.xlane.xlu1 %636 }
 0x104   : > { %v695_v12 = vadd.f32 %v1076_v44, %v633_v8  ;;  %v696_v13 = vadd.f32 %v1076_v44, %v637_v9 }
 0x106   : > { %745 = vst.msk [vmem:[%s1083_s24 + $0x170] sm:$0xff] %vm698_vm1, %v695_v12  ;;  %746 = vst.msk [vmem:[%s1083_s24 + $0x178] sm:$0xff] %vm698_vm1, %v696_v13 }
 0x107   : > { %v641_v14 = vpop.xlane.xlu0 %640 }
 0x108   : > { %v697_v15 = vadd.f32 %v1076_v44, %v641_v14 }
 0x10a   : > { %747 = vst.msk [vmem:[%s1083_s24 + $0x180] sm:$0xff] %vm698_vm1, %v697_v15 }
 0x10b PF: > { %s15_s14 = sadd.s32 1, %s830_s14  }
 0x10c   : > { %p12_p4 = scmp.ge.s32.totalorder %s15_s14, 6  }
 0x10e   :  { %14 = sbr.rel (!%p12_p4) target bundleno = 3 (0x3), region = 62 }

</bundles_post_ra>
